<compile_context>
chip_gen: v5e
topology: v5e:2x2
jax: 0.10.0
libtpu: 0.0.40
codegen_flags: <defaults>
</compile_context>

<pallas_src>
import math

import jax
import jax.numpy as jnp
from jax import lax
from jax.experimental import pallas as pl
from jax.experimental.pallas import tpu as pltpu

# ----------------------------- small config -----------------------------------
TOK_DIM = 256
NUM_HEAD = 4
HEAD_DIM = 32
INNER_DIM = NUM_HEAD * HEAD_DIM          # 128
MLP_INNER_DIM = 256
NUM_EXPERT = 4
NUM_LAYER = 2
BATCH = 2
SEQ = 8
DTYPE = jnp.bfloat16
RMS_EPS = 1e-6
GATE_PAD = 128                           # gate columns zero-padded to lane width
EXP_COLS = NUM_EXPERT * 2 * MLP_INNER_DIM            # 2048 (w1|w3 per expert)
SLAB_COLS = EXP_COLS + GATE_PAD                      # 2176 (+ padded gate)


# ----------------------------- in-kernel helpers -------------------------------
def _rmsnorm(x_bf16, w_row):
    # TODO(synk): MistralRMSNorm source not provided; standard RMSNorm over the
    # flattened inner_dim (H*Dh) with a learned [inner_dim] scale is assumed.
    xf = x_bf16.astype(jnp.float32)
    var = jnp.mean(xf * xf, axis=-1, keepdims=True)
    y = xf * lax.rsqrt(var + RMS_EPS)
    return (y * w_row.astype(jnp.float32)).astype(jnp.bfloat16)


# ----------------------------- fused forward kernel ----------------------------
def _make_kernel(nb):
    """Build the fused kernel for `nb` batches per grid step (M = nb*SEQ rows)."""
    S, D = SEQ, INNER_DIM
    H, Dh = NUM_HEAD, HEAD_DIM
    F = MLP_INNER_DIM
    E = NUM_EXPERT
    M = nb * S                 # rows of the residual stream per grid step
    HM = H * M                 # rows of the head-batched attention layout
    half = Dh // 2

    def kernel(x_ref, cosq_ref, sqa_ref, sqb_ref, cosk_ref, ska_ref, skb_ref,
               bias_ref, ln1_ref, wqkv_ref, wo_ref, ln2_ref,
               wexp_ref, w2all_ref, norm_ref, lm_head_ref, out_ref):
        x = x_ref[...]                         # [M, D] bf16 residual (stays resident)
        cos_q = cosq_ref[...]                  # RoPE tables, [M, D] f32, pre-scaled
        sin_qa = sqa_ref[...]
        sin_qb = sqb_ref[...]
        cos_k = cosk_ref[...]
        sin_ka = ska_ref[...]
        sin_kb = skb_ref[...]
        attn_bias = bias_ref[...]              # [HM, HM] f32, 0 / -1e30 block-causal

        # router constants (traced once, shared across layers)
        eiota = lax.broadcasted_iota(jnp.int32, (M, GATE_PAD), 1)
        expert_mask = eiota < E

        def rope(t, cos_t, sin_a, sin_b):
            # rotate-half realised as two lane rolls; signs / zeros folded into
            # the sin_a (first half) and sin_b (second half) tables.
            return (t * cos_t
                    + pltpu.roll(t, D - half, axis=1) * sin_a
                    + pltpu.roll(t, half, axis=1) * sin_b).astype(jnp.bfloat16)

        def to_heads(t):                       # [M, D] -> [(h, b, s), Dh]
            return jnp.concatenate(
                [t[:, hh * Dh:(hh + 1) * Dh] for hh in range(H)], axis=0)

        def from_heads(t):                     # [(h, b, s), Dh] -> [M, D]
            return jnp.concatenate(
                [t[hh * M:(hh + 1) * M, :] for hh in range(H)], axis=1)

        for l in range(NUM_LAYER):
            # ----------------------- attention block -----------------------
            # TODO(synk): MistralSelfAttention source not provided; standard
            # rotate-half RoPE + causal multi-head attention (no GQA/KV-cache).
            h = _rmsnorm(x, ln1_ref[l])                                   # [M, D]
            qkv = jnp.dot(h, wqkv_ref[l],
                          preferred_element_type=jnp.float32)             # [M, 3D]
            q = rope(qkv[:, 0 * D:1 * D], cos_q, sin_qa, sin_qb)          # 1/sqrt(Dh) folded
            k = rope(qkv[:, 1 * D:2 * D], cos_k, sin_ka, sin_kb)
            v = qkv[:, 2 * D:3 * D].astype(jnp.bfloat16)

            qh, kh, vh = to_heads(q), to_heads(k), to_heads(v)            # [HM, Dh]
            s_mat = lax.dot_general(qh, kh, (((1,), (1,)), ((), ())),
                                    preferred_element_type=jnp.float32)    # [HM, HM]
            s_mat = s_mat + attn_bias
            s_mat = s_mat - jnp.max(s_mat, axis=-1, keepdims=True)
            p = jnp.exp(s_mat)
            p = p * pl.reciprocal(jnp.sum(p, axis=-1, keepdims=True), approx=True)
            oh = jnp.dot(p.astype(jnp.bfloat16), vh,
                         preferred_element_type=jnp.float32)               # [HM, Dh]
            attn = from_heads(oh).astype(jnp.bfloat16)                     # [M, D]
            o = jnp.dot(attn, wo_ref[l], preferred_element_type=jnp.float32)
            x = x + o.astype(x.dtype)                                      # residual

            # ----------------------- MoE block -----------------------
            h = _rmsnorm(x, ln2_ref[l])                                    # [M, D]
            # one wide matmul: all experts' [w1|w3] plus the (padded) gate.
            big = jnp.dot(h, wexp_ref[l],
                          preferred_element_type=jnp.float32)              # [M, SLAB_COLS]
            glog = big[:, EXP_COLS:]                                       # [M, 128]
            glog = jnp.where(expert_mask, glog, -jnp.inf)
            # top-2 routing (first-occurrence argmax via iota + min-reduce)
            m1 = jnp.max(glog, axis=-1, keepdims=True)
            idx1 = jnp.min(jnp.where(glog == m1, eiota, GATE_PAD).astype(jnp.float32),
                           axis=-1, keepdims=True).astype(jnp.int32)
            glog2 = jnp.where(eiota == idx1, -jnp.inf, glog)
            m2 = jnp.max(glog2, axis=-1, keepdims=True)
            idx2 = jnp.min(jnp.where(glog2 == m2, eiota, GATE_PAD).astype(jnp.float32),
                           axis=-1, keepdims=True).astype(jnp.int32)
            # softmax over the two selected logits (m1 >= m2 by construction)
            d2 = jnp.exp(m2 - m1)
            rw1 = 1.0 / (1.0 + d2)
            rw2 = d2 * rw1
            # reference quantizes routing weights to model dtype before combining
            rw1 = rw1.astype(DTYPE).astype(jnp.float32)
            rw2 = rw2.astype(DTYPE).astype(jnp.float32)

            # routing weight applied BEFORE the down projection, activations
            # stacked along K -> single [M, E*F] x [E*F, D] weighted combine.
            acts = []
            for e in range(E):
                g = big[:, e * 2 * F: e * 2 * F + F]
                u = big[:, e * 2 * F + F: (e + 1) * 2 * F]
                cw = (jnp.where(idx1 == e, rw1, 0.0)
                      + jnp.where(idx2 == e, rw2, 0.0))                    # [M, 1]
                acts.append((cw * (g * jax.nn.sigmoid(g)) * u).astype(jnp.bfloat16))
            act_all = jnp.concatenate(acts, axis=1)                        # [M, E*F]
            moe = jnp.dot(act_all, w2all_ref[l],
                          preferred_element_type=jnp.float32)              # [M, D]
            x = x + moe.astype(x.dtype)                                    # residual

        # ----------------------- final norm + lm head -----------------------
        # TODO(synk): MistralLazyConstants / inv_linear_scale registration omitted;
        # treated as None (no extra scaling), i.e. the un-quantized path.
        xf = _rmsnorm(x, norm_ref[...])
        out_ref[...] = jnp.dot(xf, lm_head_ref[...],
                               preferred_element_type=jnp.float32)          # [M, V]

    return kernel


# ----------------------------- wrapper (one pallas_call) -----------------------
def _batches_per_step(batch):
    """Flatten batch into M on single-TensorCore chips; keep grid on dual-TC."""
    try:
        kind = jax.devices()[0].device_kind.lower()
    except Exception:
        return 1
    single_tc = any(t in kind for t in
                    ("v5e", "v5 lite", "v5lite", "v6e", "v6 lite", "v6lite"))
    return batch if single_tc else 1


def mixtral_forward(tok, params, nb=None):
    B, S = tok.shape
    D, V, H, Dh = INNER_DIM, TOK_DIM, NUM_HEAD, HEAD_DIM
    if nb is None:
        nb = _batches_per_step(B)
    M = nb * S
    HM = H * M

    x0 = jnp.take(params['embed'], tok, axis=0).reshape(B * S, D)       # [B*S, D] bf16

    # --- full-width RoPE tables (f32): tile per head, fold rotate-half signs into
    # split sin tables and fold the 1/sqrt(Dh) query scale into the q tables.
    cos = params['rope_cos']                                            # [S, Dh]
    sin = params['rope_sin']
    half = Dh // 2
    zeros = jnp.zeros((S, half), jnp.float32)
    sin_a = jnp.concatenate([-sin[:, :half], zeros], axis=1)            # first half: -sin
    sin_b = jnp.concatenate([zeros, sin[:, half:]], axis=1)             # second half: +sin
    cos_t = jnp.tile(cos, (nb, H))                                      # [M, D]
    sin_at = jnp.tile(sin_a, (nb, H))
    sin_bt = jnp.tile(sin_b, (nb, H))
    q_scale = 1.0 / math.sqrt(Dh)
    cos_q, sin_qa, sin_qb = cos_t * q_scale, sin_at * q_scale, sin_bt * q_scale
    cos_k, sin_ka, sin_kb = cos_t, sin_at, sin_bt

    # --- additive block-diagonal (per batch-in-step, per head) causal bias.
    r = jnp.arange(HM)[:, None]
    c = jnp.arange(HM)[None, :]
    valid = (r // S == c // S) & ((c % S) <= (r % S))
    attn_bias = jnp.where(valid, 0.0, -1e30).astype(jnp.float32)        # [HM, HM]

    def rep(shape):
        nd = len(shape)
        return pl.BlockSpec(shape, lambda b, _nd=nd: (0,) * _nd)

    out = pl.pallas_call(
        _make_kernel(nb),
        out_shape=jax.ShapeDtypeStruct((B * S, V), jnp.float32),
        grid=(B // nb,),
        in_specs=[
            pl.BlockSpec((M, D), lambda b: (b, 0)),                      # x0
            rep((M, D)), rep((M, D)), rep((M, D)),                       # q rope tables
            rep((M, D)), rep((M, D)), rep((M, D)),                       # k rope tables
            rep((HM, HM)),                                               # attn bias
            rep((NUM_LAYER, 1, D)),                                      # ln1
            rep((NUM_LAYER, D, 3 * D)),                                  # wqkv
            rep((NUM_LAYER, D, D)),                                      # wo
            rep((NUM_LAYER, 1, D)),                                      # ln2
            rep((NUM_LAYER, D, SLAB_COLS)),                              # experts w1|w3 + gate
            rep((NUM_LAYER, NUM_EXPERT * MLP_INNER_DIM, D)),             # experts w2 stacked
            rep((1, D)),                                                 # final norm
            rep((D, V)),                                                 # lm head
        ],
        out_specs=pl.BlockSpec((M, V), lambda b: (b, 0)),
        compiler_params=pltpu.CompilerParams(
            dimension_semantics=("parallel",)),
    )(x0, cos_q, sin_qa, sin_qb, cos_k, sin_ka, sin_kb, attn_bias,
      params['ln1'], params['wqkv_t'], params['wo_t'], params['ln2'],
      params['wexp_t'], params['w2all_t'], params['norm'], params['lm_head_t'])
    return out.reshape(B, S, V)


# ----------------------------- deterministic params ----------------------------
def rope_tables(S, Dh, base=10000.0):
    inv_freq = 1.0 / (base ** (jnp.arange(0, Dh, 2, dtype=jnp.float32) / Dh))
    t = jnp.arange(S, dtype=jnp.float32)
    freqs = jnp.outer(t, inv_freq)                      # [S, Dh/2]
    emb = jnp.concatenate([freqs, freqs], axis=-1)      # [S, Dh]
    return jnp.cos(emb), jnp.sin(emb)


def init_params(key):
    def lin(k, in_dim, out_dim):
        return (0.02 * jax.random.normal(k, (in_dim, out_dim), jnp.float32)).astype(DTYPE)

    keys = iter(jax.random.split(key, 512))
    D, F, E, L = INNER_DIM, MLP_INNER_DIM, NUM_EXPERT, NUM_LAYER

    ln1, ln2, wqkv, wo, wexp, w2all = [], [], [], [], [], []
    for _ in range(L):
        ln1.append(jnp.ones((1, D), DTYPE))
        ln2.append(jnp.ones((1, D), DTYPE))
        wqkv.append(jnp.concatenate(
            [lin(next(keys), D, D) for _ in range(3)], axis=1))          # [D, 3D]
        wo.append(lin(next(keys), D, D))
        gate = lin(next(keys), D, E)
        cols, w2rows = [], []
        for _ in range(E):
            cols.append(jnp.concatenate(
                [lin(next(keys), D, F), lin(next(keys), D, F)], axis=1))  # [D, 2F]
            w2rows.append(lin(next(keys), F, D))
        cols.append(jnp.pad(gate, ((0, 0), (0, GATE_PAD - E))))          # gate -> [D, 128]
        wexp.append(jnp.concatenate(cols, axis=1))                       # [D, SLAB_COLS]
        w2all.append(jnp.concatenate(w2rows, axis=0))                    # [E*F, D]

    cos, sin = rope_tables(SEQ, HEAD_DIM)
    return {
        'embed': (0.02 * jax.random.normal(next(keys), (TOK_DIM, D),
                                           jnp.float32)).astype(DTYPE),
        'rope_cos': cos, 'rope_sin': sin,
        'ln1': jnp.stack(ln1), 'ln2': jnp.stack(ln2),
        'wqkv_t': jnp.stack(wqkv), 'wo_t': jnp.stack(wo),
        'wexp_t': jnp.stack(wexp), 'w2all_t': jnp.stack(w2all),
        'norm': jnp.ones((1, D), DTYPE),
        'lm_head_t': lin(next(keys), D, TOK_DIM),
    }


if __name__ == "__main__":
    key = jax.random.PRNGKey(0)
    pkey, tkey = jax.random.split(key)
    params = init_params(pkey)
    tok = jax.random.randint(tkey, (BATCH, SEQ), 0, TOK_DIM, dtype=jnp.int32)
    out = jax.jit(mixtral_forward)(tok, params)
    jax.block_until_ready(out)
    assert out.shape == (BATCH, SEQ, TOK_DIM) and out.dtype == jnp.float32
    assert bool(jnp.all(jnp.isfinite(out)))
    print("KERNEL_OK")
</pallas_src>

<mosaic_0001>
module attributes {stable_mosaic.version = 11 : i64} {
  func.func @kernel(%arg0: i32, %arg1: memref<8x128xbf16, #tpu.memory_space<vmem>>, %arg2: memref<8x128xf32, #tpu.memory_space<vmem>>, %arg3: memref<8x128xf32, #tpu.memory_space<vmem>>, %arg4: memref<8x128xf32, #tpu.memory_space<vmem>>, %arg5: memref<8x128xf32, #tpu.memory_space<vmem>>, %arg6: memref<8x128xf32, #tpu.memory_space<vmem>>, %arg7: memref<8x128xf32, #tpu.memory_space<vmem>>, %arg8: memref<32x32xf32, #tpu.memory_space<vmem>>, %arg9: memref<2x1x128xbf16, #tpu.memory_space<vmem>>, %arg10: memref<2x128x384xbf16, #tpu.memory_space<vmem>>, %arg11: memref<2x128x128xbf16, #tpu.memory_space<vmem>>, %arg12: memref<2x1x128xbf16, #tpu.memory_space<vmem>>, %arg13: memref<2x128x2176xbf16, #tpu.memory_space<vmem>>, %arg14: memref<2x1024x128xbf16, #tpu.memory_space<vmem>>, %arg15: memref<1x128xbf16, #tpu.memory_space<vmem>>, %arg16: memref<128x256xbf16, #tpu.memory_space<vmem>>, %arg17: memref<8x256xf32, #tpu.memory_space<vmem>>) attributes {dimension_semantics = [#tpu.dimension_semantics<parallel>], iteration_bounds = array<i64: 2>, scalar_prefetch = 0 : i64, scratch_operands = 0 : i64, tpu.core_type = #tpu.core_type<tc>, window_params = [{transform_indices = @transform_0, window_bounds = array<i64: 8, 128>}, {pipeline_mode = #tpu.pipeline_mode<synchronous>, transform_indices = @transform_1, window_bounds = array<i64: 8, 128>}, {pipeline_mode = #tpu.pipeline_mode<synchronous>, transform_indices = @transform_2, window_bounds = array<i64: 8, 128>}, {pipeline_mode = #tpu.pipeline_mode<synchronous>, transform_indices = @transform_3, window_bounds = array<i64: 8, 128>}, {pipeline_mode = #tpu.pipeline_mode<synchronous>, transform_indices = @transform_4, window_bounds = array<i64: 8, 128>}, {pipeline_mode = #tpu.pipeline_mode<synchronous>, transform_indices = @transform_5, window_bounds = array<i64: 8, 128>}, {pipeline_mode = #tpu.pipeline_mode<synchronous>, transform_indices = @transform_6, window_bounds = array<i64: 8, 128>}, {pipeline_mode = #tpu.pipeline_mode<synchronous>, transform_indices = @transform_7, window_bounds = array<i64: 32, 32>}, {pipeline_mode = #tpu.pipeline_mode<synchronous>, transform_indices = @transform_8, window_bounds = array<i64: 2, 1, 128>}, {pipeline_mode = #tpu.pipeline_mode<synchronous>, transform_indices = @transform_9, window_bounds = array<i64: 2, 128, 384>}, {pipeline_mode = #tpu.pipeline_mode<synchronous>, transform_indices = @transform_10, window_bounds = array<i64: 2, 128, 128>}, {pipeline_mode = #tpu.pipeline_mode<synchronous>, transform_indices = @transform_11, window_bounds = array<i64: 2, 1, 128>}, {pipeline_mode = #tpu.pipeline_mode<synchronous>, transform_indices = @transform_12, window_bounds = array<i64: 2, 128, 2176>}, {pipeline_mode = #tpu.pipeline_mode<synchronous>, transform_indices = @transform_13, window_bounds = array<i64: 2, 1024, 128>}, {pipeline_mode = #tpu.pipeline_mode<synchronous>, transform_indices = @transform_14, window_bounds = array<i64: 1, 128>}, {pipeline_mode = #tpu.pipeline_mode<synchronous>, transform_indices = @transform_15, window_bounds = array<i64: 128, 256>}, {transform_indices = @transform_16, window_bounds = array<i64: 8, 256>}]} {
    %c0 = arith.constant 0 : index
    %c0_0 = arith.constant 0 : index
    %0 = vector.load %arg1[%c0, %c0_0] : memref<8x128xbf16, #tpu.memory_space<vmem>>, vector<8x128xbf16>
    %c0_1 = arith.constant 0 : index
    %c0_2 = arith.constant 0 : index
    %1 = vector.load %arg2[%c0_1, %c0_2] : memref<8x128xf32, #tpu.memory_space<vmem>>, vector<8x128xf32>
    %c0_3 = arith.constant 0 : index
    %c0_4 = arith.constant 0 : index
    %2 = vector.load %arg3[%c0_3, %c0_4] : memref<8x128xf32, #tpu.memory_space<vmem>>, vector<8x128xf32>
    %c0_5 = arith.constant 0 : index
    %c0_6 = arith.constant 0 : index
    %3 = vector.load %arg4[%c0_5, %c0_6] : memref<8x128xf32, #tpu.memory_space<vmem>>, vector<8x128xf32>
    %c0_7 = arith.constant 0 : index
    %c0_8 = arith.constant 0 : index
    %4 = vector.load %arg5[%c0_7, %c0_8] : memref<8x128xf32, #tpu.memory_space<vmem>>, vector<8x128xf32>
    %c0_9 = arith.constant 0 : index
    %c0_10 = arith.constant 0 : index
    %5 = vector.load %arg6[%c0_9, %c0_10] : memref<8x128xf32, #tpu.memory_space<vmem>>, vector<8x128xf32>
    %c0_11 = arith.constant 0 : index
    %c0_12 = arith.constant 0 : index
    %6 = vector.load %arg7[%c0_11, %c0_12] : memref<8x128xf32, #tpu.memory_space<vmem>>, vector<8x128xf32>
    %c0_13 = arith.constant 0 : index
    %c0_14 = arith.constant 0 : index
    %7 = vector.load %arg8[%c0_13, %c0_14] : memref<32x32xf32, #tpu.memory_space<vmem>>, vector<32x32xf32>
    %8 = tpu.iota {dimensions = array<i32: 1>} : vector<8x128xi32>
    %c4_i32 = arith.constant 4 : i32
    %9 = vector.broadcast %c4_i32 : i32 to vector<8x128xi32>
    %10 = arith.cmpi slt, %8, %9 : vector<8x128xi32>
    %c0_15 = arith.constant 0 : index
    %c0_16 = arith.constant 0 : index
    %c0_17 = arith.constant 0 : index
    %11 = vector.load %arg9[%c0_15, %c0_16, %c0_17] : memref<2x1x128xbf16, #tpu.memory_space<vmem>>, vector<1x1x128xbf16>
    %12 = vector.shape_cast %11 : vector<1x1x128xbf16> to vector<1x128xbf16>
    %13 = arith.extf %0 : vector<8x128xbf16> to vector<8x128xf32>
    %14 = arith.mulf %13, %13 : vector<8x128xf32>
    %cst = arith.constant dense<0.000000e+00> : vector<8xf32>
    %15 = vector.multi_reduction <add>, %14, %cst [1] : vector<8x128xf32> to vector<8xf32>
    %16 = vector.shape_cast %15 : vector<8xf32> to vector<8x1xf32>
    %cst_18 = arith.constant 1.280000e+02 : f32
    %17 = vector.broadcast %cst_18 : f32 to vector<8x1xf32>
    %18 = arith.divf %16, %17 : vector<8x1xf32>
    %cst_19 = arith.constant 9.99999997E-7 : f32
    %19 = vector.broadcast %cst_19 : f32 to vector<8x1xf32>
    %20 = arith.addf %18, %19 : vector<8x1xf32>
    %21 = math.rsqrt %20 : vector<8x1xf32>
    %22 = vector.broadcast %21 : vector<8x1xf32> to vector<8x128xf32>
    %23 = arith.mulf %13, %22 : vector<8x128xf32>
    %24 = arith.extf %12 : vector<1x128xbf16> to vector<1x128xf32>
    %25 = vector.broadcast %24 : vector<1x128xf32> to vector<8x128xf32>
    %26 = arith.mulf %23, %25 : vector<8x128xf32>
    %27 = arith.truncf %26 : vector<8x128xf32> to vector<8x128xbf16>
    %c0_20 = arith.constant 0 : index
    %c0_21 = arith.constant 0 : index
    %c0_22 = arith.constant 0 : index
    %28 = vector.load %arg10[%c0_20, %c0_21, %c0_22] : memref<2x128x384xbf16, #tpu.memory_space<vmem>>, vector<1x128x384xbf16>
    %29 = vector.shape_cast %28 : vector<1x128x384xbf16> to vector<128x384xbf16>
    %cst_23 = arith.constant dense<0.000000e+00> : vector<8x384xf32>
    %30 = tpu.matmul %27, %29, %cst_23 {dimension_numbers = #tpu.dot_dimension_numbers<[1], [0], [0], [1], [0, 0, 1, 1], [], []>} : vector<8x128xbf16>, vector<128x384xbf16>, vector<8x384xf32> -> vector<8x384xf32>
    %31 = vector.extract_strided_slice %30 {offsets = [0, 0], sizes = [8, 128], strides = [1, 1]} : vector<8x384xf32> to vector<8x128xf32>
    %32 = arith.mulf %31, %1 : vector<8x128xf32>
    %c112_i32 = arith.constant 112 : i32
    %33 = tpu.dynamic_rotate %31 by %c112_i32 dim 1 : vector<8x128xf32>, i32 -> vector<8x128xf32>
    %34 = arith.mulf %33, %2 : vector<8x128xf32>
    %35 = arith.addf %32, %34 : vector<8x128xf32>
    %c16_i32 = arith.constant 16 : i32
    %36 = tpu.dynamic_rotate %31 by %c16_i32 dim 1 : vector<8x128xf32>, i32 -> vector<8x128xf32>
    %37 = arith.mulf %36, %3 : vector<8x128xf32>
    %38 = arith.addf %35, %37 : vector<8x128xf32>
    %39 = arith.truncf %38 : vector<8x128xf32> to vector<8x128xbf16>
    %40 = vector.extract_strided_slice %30 {offsets = [0, 128], sizes = [8, 128], strides = [1, 1]} : vector<8x384xf32> to vector<8x128xf32>
    %41 = arith.mulf %40, %4 : vector<8x128xf32>
    %c112_i32_24 = arith.constant 112 : i32
    %42 = tpu.dynamic_rotate %40 by %c112_i32_24 dim 1 : vector<8x128xf32>, i32 -> vector<8x128xf32>
    %43 = arith.mulf %42, %5 : vector<8x128xf32>
    %44 = arith.addf %41, %43 : vector<8x128xf32>
    %c16_i32_25 = arith.constant 16 : i32
    %45 = tpu.dynamic_rotate %40 by %c16_i32_25 dim 1 : vector<8x128xf32>, i32 -> vector<8x128xf32>
    %46 = arith.mulf %45, %6 : vector<8x128xf32>
    %47 = arith.addf %44, %46 : vector<8x128xf32>
    %48 = arith.truncf %47 : vector<8x128xf32> to vector<8x128xbf16>
    %49 = vector.extract_strided_slice %30 {offsets = [0, 256], sizes = [8, 128], strides = [1, 1]} : vector<8x384xf32> to vector<8x128xf32>
    %50 = arith.truncf %49 : vector<8x128xf32> to vector<8x128xbf16>
    %51 = vector.extract_strided_slice %39 {offsets = [0, 0], sizes = [8, 32], strides = [1, 1]} : vector<8x128xbf16> to vector<8x32xbf16>
    %52 = vector.extract_strided_slice %39 {offsets = [0, 32], sizes = [8, 32], strides = [1, 1]} : vector<8x128xbf16> to vector<8x32xbf16>
    %53 = vector.extract_strided_slice %39 {offsets = [0, 64], sizes = [8, 32], strides = [1, 1]} : vector<8x128xbf16> to vector<8x32xbf16>
    %54 = vector.extract_strided_slice %39 {offsets = [0, 96], sizes = [8, 32], strides = [1, 1]} : vector<8x128xbf16> to vector<8x32xbf16>
    %55 = tpu.concatenate %51, %52, %53, %54 in 0 : vector<8x32xbf16>, vector<8x32xbf16>, vector<8x32xbf16>, vector<8x32xbf16> -> vector<32x32xbf16>
    %56 = vector.extract_strided_slice %48 {offsets = [0, 0], sizes = [8, 32], strides = [1, 1]} : vector<8x128xbf16> to vector<8x32xbf16>
    %57 = vector.extract_strided_slice %48 {offsets = [0, 32], sizes = [8, 32], strides = [1, 1]} : vector<8x128xbf16> to vector<8x32xbf16>
    %58 = vector.extract_strided_slice %48 {offsets = [0, 64], sizes = [8, 32], strides = [1, 1]} : vector<8x128xbf16> to vector<8x32xbf16>
    %59 = vector.extract_strided_slice %48 {offsets = [0, 96], sizes = [8, 32], strides = [1, 1]} : vector<8x128xbf16> to vector<8x32xbf16>
    %60 = tpu.concatenate %56, %57, %58, %59 in 0 : vector<8x32xbf16>, vector<8x32xbf16>, vector<8x32xbf16>, vector<8x32xbf16> -> vector<32x32xbf16>
    %61 = vector.extract_strided_slice %50 {offsets = [0, 0], sizes = [8, 32], strides = [1, 1]} : vector<8x128xbf16> to vector<8x32xbf16>
    %62 = vector.extract_strided_slice %50 {offsets = [0, 32], sizes = [8, 32], strides = [1, 1]} : vector<8x128xbf16> to vector<8x32xbf16>
    %63 = vector.extract_strided_slice %50 {offsets = [0, 64], sizes = [8, 32], strides = [1, 1]} : vector<8x128xbf16> to vector<8x32xbf16>
    %64 = vector.extract_strided_slice %50 {offsets = [0, 96], sizes = [8, 32], strides = [1, 1]} : vector<8x128xbf16> to vector<8x32xbf16>
    %65 = tpu.concatenate %61, %62, %63, %64 in 0 : vector<8x32xbf16>, vector<8x32xbf16>, vector<8x32xbf16>, vector<8x32xbf16> -> vector<32x32xbf16>
    %cst_26 = arith.constant dense<0.000000e+00> : vector<32x32xf32>
    %66 = tpu.matmul %55, %60, %cst_26 {dimension_numbers = #tpu.dot_dimension_numbers<[1], [1], [0], [0], [0, 0, 1, 0], [], []>} : vector<32x32xbf16>, vector<32x32xbf16>, vector<32x32xf32> -> vector<32x32xf32>
    %67 = arith.addf %66, %7 : vector<32x32xf32>
    %cst_27 = arith.constant dense<0xFF800000> : vector<32xf32>
    %68 = vector.multi_reduction <maximumf>, %67, %cst_27 [1] : vector<32x32xf32> to vector<32xf32>
    %69 = vector.shape_cast %68 : vector<32xf32> to vector<32x1xf32>
    %70 = vector.broadcast %69 : vector<32x1xf32> to vector<32x32xf32>
    %71 = arith.subf %67, %70 : vector<32x32xf32>
    %72 = math.exp %71 : vector<32x32xf32>
    %cst_28 = arith.constant dense<0.000000e+00> : vector<32xf32>
    %73 = vector.multi_reduction <add>, %72, %cst_28 [1] : vector<32x32xf32> to vector<32xf32>
    %74 = vector.shape_cast %73 : vector<32xf32> to vector<32x1xf32>
    %75 = tpu.reciprocal %74 {approx = true} : vector<32x1xf32> -> vector<32x1xf32>
    %76 = vector.broadcast %75 : vector<32x1xf32> to vector<32x32xf32>
    %77 = arith.mulf %72, %76 : vector<32x32xf32>
    %78 = arith.truncf %77 : vector<32x32xf32> to vector<32x32xbf16>
    %cst_29 = arith.constant dense<0.000000e+00> : vector<32x32xf32>
    %79 = tpu.matmul %78, %65, %cst_29 {dimension_numbers = #tpu.dot_dimension_numbers<[1], [0], [0], [1], [0, 0, 1, 1], [], []>} : vector<32x32xbf16>, vector<32x32xbf16>, vector<32x32xf32> -> vector<32x32xf32>
    %80 = vector.extract_strided_slice %79 {offsets = [0, 0], sizes = [8, 32], strides = [1, 1]} : vector<32x32xf32> to vector<8x32xf32>
    %81 = vector.extract_strided_slice %79 {offsets = [8, 0], sizes = [8, 32], strides = [1, 1]} : vector<32x32xf32> to vector<8x32xf32>
    %82 = vector.extract_strided_slice %79 {offsets = [16, 0], sizes = [8, 32], strides = [1, 1]} : vector<32x32xf32> to vector<8x32xf32>
    %83 = vector.extract_strided_slice %79 {offsets = [24, 0], sizes = [8, 32], strides = [1, 1]} : vector<32x32xf32> to vector<8x32xf32>
    %84 = tpu.concatenate %80, %81, %82, %83 in 1 : vector<8x32xf32>, vector<8x32xf32>, vector<8x32xf32>, vector<8x32xf32> -> vector<8x128xf32>
    %85 = arith.truncf %84 : vector<8x128xf32> to vector<8x128xbf16>
    %c0_30 = arith.constant 0 : index
    %c0_31 = arith.constant 0 : index
    %c0_32 = arith.constant 0 : index
    %86 = vector.load %arg11[%c0_30, %c0_31, %c0_32] : memref<2x128x128xbf16, #tpu.memory_space<vmem>>, vector<1x128x128xbf16>
    %87 = vector.shape_cast %86 : vector<1x128x128xbf16> to vector<128x128xbf16>
    %cst_33 = arith.constant dense<0.000000e+00> : vector<8x128xf32>
    %88 = tpu.matmul %85, %87, %cst_33 {dimension_numbers = #tpu.dot_dimension_numbers<[1], [0], [0], [1], [0, 0, 1, 1], [], []>} : vector<8x128xbf16>, vector<128x128xbf16>, vector<8x128xf32> -> vector<8x128xf32>
    %89 = arith.truncf %88 : vector<8x128xf32> to vector<8x128xbf16>
    %90 = arith.addf %0, %89 : vector<8x128xbf16>
    %c0_34 = arith.constant 0 : index
    %c0_35 = arith.constant 0 : index
    %c0_36 = arith.constant 0 : index
    %91 = vector.load %arg12[%c0_34, %c0_35, %c0_36] : memref<2x1x128xbf16, #tpu.memory_space<vmem>>, vector<1x1x128xbf16>
    %92 = vector.shape_cast %91 : vector<1x1x128xbf16> to vector<1x128xbf16>
    %93 = arith.extf %90 : vector<8x128xbf16> to vector<8x128xf32>
    %94 = arith.mulf %93, %93 : vector<8x128xf32>
    %cst_37 = arith.constant dense<0.000000e+00> : vector<8xf32>
    %95 = vector.multi_reduction <add>, %94, %cst_37 [1] : vector<8x128xf32> to vector<8xf32>
    %96 = vector.shape_cast %95 : vector<8xf32> to vector<8x1xf32>
    %cst_38 = arith.constant 1.280000e+02 : f32
    %97 = vector.broadcast %cst_38 : f32 to vector<8x1xf32>
    %98 = arith.divf %96, %97 : vector<8x1xf32>
    %cst_39 = arith.constant 9.99999997E-7 : f32
    %99 = vector.broadcast %cst_39 : f32 to vector<8x1xf32>
    %100 = arith.addf %98, %99 : vector<8x1xf32>
    %101 = math.rsqrt %100 : vector<8x1xf32>
    %102 = vector.broadcast %101 : vector<8x1xf32> to vector<8x128xf32>
    %103 = arith.mulf %93, %102 : vector<8x128xf32>
    %104 = arith.extf %92 : vector<1x128xbf16> to vector<1x128xf32>
    %105 = vector.broadcast %104 : vector<1x128xf32> to vector<8x128xf32>
    %106 = arith.mulf %103, %105 : vector<8x128xf32>
    %107 = arith.truncf %106 : vector<8x128xf32> to vector<8x128xbf16>
    %c0_40 = arith.constant 0 : index
    %c0_41 = arith.constant 0 : index
    %c0_42 = arith.constant 0 : index
    %108 = vector.load %arg13[%c0_40, %c0_41, %c0_42] : memref<2x128x2176xbf16, #tpu.memory_space<vmem>>, vector<1x128x2176xbf16>
    %109 = vector.shape_cast %108 : vector<1x128x2176xbf16> to vector<128x2176xbf16>
    %cst_43 = arith.constant dense<0.000000e+00> : vector<8x2176xf32>
    %110 = tpu.matmul %107, %109, %cst_43 {dimension_numbers = #tpu.dot_dimension_numbers<[1], [0], [0], [1], [0, 0, 1, 1], [], []>} : vector<8x128xbf16>, vector<128x2176xbf16>, vector<8x2176xf32> -> vector<8x2176xf32>
    %111 = vector.extract_strided_slice %110 {offsets = [0, 2048], sizes = [8, 128], strides = [1, 1]} : vector<8x2176xf32> to vector<8x128xf32>
    %cst_44 = arith.constant 0xFF800000 : f32
    %112 = vector.broadcast %cst_44 : f32 to vector<8x128xf32>
    %113 = arith.select %10, %111, %112 : vector<8x128xi1>, vector<8x128xf32>
    %cst_45 = arith.constant dense<0xFF800000> : vector<8xf32>
    %114 = vector.multi_reduction <maximumf>, %113, %cst_45 [1] : vector<8x128xf32> to vector<8xf32>
    %115 = vector.shape_cast %114 : vector<8xf32> to vector<8x1xf32>
    %116 = vector.broadcast %115 : vector<8x1xf32> to vector<8x128xf32>
    %117 = arith.cmpf oeq, %113, %116 : vector<8x128xf32>
    %c128_i32 = arith.constant 128 : i32
    %118 = vector.broadcast %c128_i32 : i32 to vector<8x128xi32>
    %119 = arith.select %117, %8, %118 : vector<8x128xi1>, vector<8x128xi32>
    %120 = arith.sitofp %119 : vector<8x128xi32> to vector<8x128xf32>
    %cst_46 = arith.constant dense<0x7F800000> : vector<8xf32>
    %121 = vector.multi_reduction <minimumf>, %120, %cst_46 [1] : vector<8x128xf32> to vector<8xf32>
    %122 = vector.shape_cast %121 : vector<8xf32> to vector<8x1xf32>
    %123 = arith.fptosi %122 : vector<8x1xf32> to vector<8x1xi32>
    %124 = vector.broadcast %123 : vector<8x1xi32> to vector<8x128xi32>
    %125 = arith.cmpi eq, %8, %124 : vector<8x128xi32>
    %cst_47 = arith.constant 0xFF800000 : f32
    %126 = vector.broadcast %cst_47 : f32 to vector<8x128xf32>
    %127 = arith.select %125, %126, %113 : vector<8x128xi1>, vector<8x128xf32>
    %cst_48 = arith.constant dense<0xFF800000> : vector<8xf32>
    %128 = vector.multi_reduction <maximumf>, %127, %cst_48 [1] : vector<8x128xf32> to vector<8xf32>
    %129 = vector.shape_cast %128 : vector<8xf32> to vector<8x1xf32>
    %130 = vector.broadcast %129 : vector<8x1xf32> to vector<8x128xf32>
    %131 = arith.cmpf oeq, %127, %130 : vector<8x128xf32>
    %c128_i32_49 = arith.constant 128 : i32
    %132 = vector.broadcast %c128_i32_49 : i32 to vector<8x128xi32>
    %133 = arith.select %131, %8, %132 : vector<8x128xi1>, vector<8x128xi32>
    %134 = arith.sitofp %133 : vector<8x128xi32> to vector<8x128xf32>
    %cst_50 = arith.constant dense<0x7F800000> : vector<8xf32>
    %135 = vector.multi_reduction <minimumf>, %134, %cst_50 [1] : vector<8x128xf32> to vector<8xf32>
    %136 = vector.shape_cast %135 : vector<8xf32> to vector<8x1xf32>
    %137 = arith.fptosi %136 : vector<8x1xf32> to vector<8x1xi32>
    %138 = arith.subf %129, %115 : vector<8x1xf32>
    %139 = math.exp %138 : vector<8x1xf32>
    %cst_51 = arith.constant 1.000000e+00 : f32
    %140 = vector.broadcast %cst_51 : f32 to vector<8x1xf32>
    %141 = arith.addf %140, %139 : vector<8x1xf32>
    %cst_52 = arith.constant 1.000000e+00 : f32
    %142 = vector.broadcast %cst_52 : f32 to vector<8x1xf32>
    %143 = arith.divf %142, %141 : vector<8x1xf32>
    %144 = arith.mulf %139, %143 : vector<8x1xf32>
    %145 = arith.truncf %143 : vector<8x1xf32> to vector<8x1xbf16>
    %146 = arith.extf %145 : vector<8x1xbf16> to vector<8x1xf32>
    %147 = arith.truncf %144 : vector<8x1xf32> to vector<8x1xbf16>
    %148 = arith.extf %147 : vector<8x1xbf16> to vector<8x1xf32>
    %149 = vector.extract_strided_slice %110 {offsets = [0, 0], sizes = [8, 256], strides = [1, 1]} : vector<8x2176xf32> to vector<8x256xf32>
    %150 = vector.extract_strided_slice %110 {offsets = [0, 256], sizes = [8, 256], strides = [1, 1]} : vector<8x2176xf32> to vector<8x256xf32>
    %c0_i32 = arith.constant 0 : i32
    %151 = vector.broadcast %c0_i32 : i32 to vector<8x1xi32>
    %152 = arith.cmpi eq, %123, %151 : vector<8x1xi32>
    %cst_53 = arith.constant 0.000000e+00 : f32
    %153 = vector.broadcast %cst_53 : f32 to vector<8x1xf32>
    %154 = arith.select %152, %146, %153 : vector<8x1xi1>, vector<8x1xf32>
    %c0_i32_54 = arith.constant 0 : i32
    %155 = vector.broadcast %c0_i32_54 : i32 to vector<8x1xi32>
    %156 = arith.cmpi eq, %137, %155 : vector<8x1xi32>
    %cst_55 = arith.constant 0.000000e+00 : f32
    %157 = vector.broadcast %cst_55 : f32 to vector<8x1xf32>
    %158 = arith.select %156, %148, %157 : vector<8x1xi1>, vector<8x1xf32>
    %159 = arith.addf %154, %158 : vector<8x1xf32>
    %160 = arith.negf %149 : vector<8x256xf32>
    %161 = math.exp %160 : vector<8x256xf32>
    %cst_56 = arith.constant 1.000000e+00 : f32
    %162 = vector.broadcast %cst_56 : f32 to vector<8x256xf32>
    %163 = arith.addf %162, %161 : vector<8x256xf32>
    %164 = arith.divf %162, %163 : vector<8x256xf32>
    %165 = arith.mulf %149, %164 : vector<8x256xf32>
    %166 = vector.broadcast %159 : vector<8x1xf32> to vector<8x256xf32>
    %167 = arith.mulf %166, %165 : vector<8x256xf32>
    %168 = arith.mulf %167, %150 : vector<8x256xf32>
    %169 = arith.truncf %168 : vector<8x256xf32> to vector<8x256xbf16>
    %170 = vector.extract_strided_slice %110 {offsets = [0, 512], sizes = [8, 256], strides = [1, 1]} : vector<8x2176xf32> to vector<8x256xf32>
    %171 = vector.extract_strided_slice %110 {offsets = [0, 768], sizes = [8, 256], strides = [1, 1]} : vector<8x2176xf32> to vector<8x256xf32>
    %c1_i32 = arith.constant 1 : i32
    %172 = vector.broadcast %c1_i32 : i32 to vector<8x1xi32>
    %173 = arith.cmpi eq, %123, %172 : vector<8x1xi32>
    %cst_57 = arith.constant 0.000000e+00 : f32
    %174 = vector.broadcast %cst_57 : f32 to vector<8x1xf32>
    %175 = arith.select %173, %146, %174 : vector<8x1xi1>, vector<8x1xf32>
    %c1_i32_58 = arith.constant 1 : i32
    %176 = vector.broadcast %c1_i32_58 : i32 to vector<8x1xi32>
    %177 = arith.cmpi eq, %137, %176 : vector<8x1xi32>
    %cst_59 = arith.constant 0.000000e+00 : f32
    %178 = vector.broadcast %cst_59 : f32 to vector<8x1xf32>
    %179 = arith.select %177, %148, %178 : vector<8x1xi1>, vector<8x1xf32>
    %180 = arith.addf %175, %179 : vector<8x1xf32>
    %181 = arith.negf %170 : vector<8x256xf32>
    %182 = math.exp %181 : vector<8x256xf32>
    %cst_60 = arith.constant 1.000000e+00 : f32
    %183 = vector.broadcast %cst_60 : f32 to vector<8x256xf32>
    %184 = arith.addf %183, %182 : vector<8x256xf32>
    %185 = arith.divf %183, %184 : vector<8x256xf32>
    %186 = arith.mulf %170, %185 : vector<8x256xf32>
    %187 = vector.broadcast %180 : vector<8x1xf32> to vector<8x256xf32>
    %188 = arith.mulf %187, %186 : vector<8x256xf32>
    %189 = arith.mulf %188, %171 : vector<8x256xf32>
    %190 = arith.truncf %189 : vector<8x256xf32> to vector<8x256xbf16>
    %191 = vector.extract_strided_slice %110 {offsets = [0, 1024], sizes = [8, 256], strides = [1, 1]} : vector<8x2176xf32> to vector<8x256xf32>
    %192 = vector.extract_strided_slice %110 {offsets = [0, 1280], sizes = [8, 256], strides = [1, 1]} : vector<8x2176xf32> to vector<8x256xf32>
    %c2_i32 = arith.constant 2 : i32
    %193 = vector.broadcast %c2_i32 : i32 to vector<8x1xi32>
    %194 = arith.cmpi eq, %123, %193 : vector<8x1xi32>
    %cst_61 = arith.constant 0.000000e+00 : f32
    %195 = vector.broadcast %cst_61 : f32 to vector<8x1xf32>
    %196 = arith.select %194, %146, %195 : vector<8x1xi1>, vector<8x1xf32>
    %c2_i32_62 = arith.constant 2 : i32
    %197 = vector.broadcast %c2_i32_62 : i32 to vector<8x1xi32>
    %198 = arith.cmpi eq, %137, %197 : vector<8x1xi32>
    %cst_63 = arith.constant 0.000000e+00 : f32
    %199 = vector.broadcast %cst_63 : f32 to vector<8x1xf32>
    %200 = arith.select %198, %148, %199 : vector<8x1xi1>, vector<8x1xf32>
    %201 = arith.addf %196, %200 : vector<8x1xf32>
    %202 = arith.negf %191 : vector<8x256xf32>
    %203 = math.exp %202 : vector<8x256xf32>
    %cst_64 = arith.constant 1.000000e+00 : f32
    %204 = vector.broadcast %cst_64 : f32 to vector<8x256xf32>
    %205 = arith.addf %204, %203 : vector<8x256xf32>
    %206 = arith.divf %204, %205 : vector<8x256xf32>
    %207 = arith.mulf %191, %206 : vector<8x256xf32>
    %208 = vector.broadcast %201 : vector<8x1xf32> to vector<8x256xf32>
    %209 = arith.mulf %208, %207 : vector<8x256xf32>
    %210 = arith.mulf %209, %192 : vector<8x256xf32>
    %211 = arith.truncf %210 : vector<8x256xf32> to vector<8x256xbf16>
    %212 = vector.extract_strided_slice %110 {offsets = [0, 1536], sizes = [8, 256], strides = [1, 1]} : vector<8x2176xf32> to vector<8x256xf32>
    %213 = vector.extract_strided_slice %110 {offsets = [0, 1792], sizes = [8, 256], strides = [1, 1]} : vector<8x2176xf32> to vector<8x256xf32>
    %c3_i32 = arith.constant 3 : i32
    %214 = vector.broadcast %c3_i32 : i32 to vector<8x1xi32>
    %215 = arith.cmpi eq, %123, %214 : vector<8x1xi32>
    %cst_65 = arith.constant 0.000000e+00 : f32
    %216 = vector.broadcast %cst_65 : f32 to vector<8x1xf32>
    %217 = arith.select %215, %146, %216 : vector<8x1xi1>, vector<8x1xf32>
    %c3_i32_66 = arith.constant 3 : i32
    %218 = vector.broadcast %c3_i32_66 : i32 to vector<8x1xi32>
    %219 = arith.cmpi eq, %137, %218 : vector<8x1xi32>
    %cst_67 = arith.constant 0.000000e+00 : f32
    %220 = vector.broadcast %cst_67 : f32 to vector<8x1xf32>
    %221 = arith.select %219, %148, %220 : vector<8x1xi1>, vector<8x1xf32>
    %222 = arith.addf %217, %221 : vector<8x1xf32>
    %223 = arith.negf %212 : vector<8x256xf32>
    %224 = math.exp %223 : vector<8x256xf32>
    %cst_68 = arith.constant 1.000000e+00 : f32
    %225 = vector.broadcast %cst_68 : f32 to vector<8x256xf32>
    %226 = arith.addf %225, %224 : vector<8x256xf32>
    %227 = arith.divf %225, %226 : vector<8x256xf32>
    %228 = arith.mulf %212, %227 : vector<8x256xf32>
    %229 = vector.broadcast %222 : vector<8x1xf32> to vector<8x256xf32>
    %230 = arith.mulf %229, %228 : vector<8x256xf32>
    %231 = arith.mulf %230, %213 : vector<8x256xf32>
    %232 = arith.truncf %231 : vector<8x256xf32> to vector<8x256xbf16>
    %233 = tpu.concatenate %169, %190, %211, %232 in 1 : vector<8x256xbf16>, vector<8x256xbf16>, vector<8x256xbf16>, vector<8x256xbf16> -> vector<8x1024xbf16>
    %c0_69 = arith.constant 0 : index
    %c0_70 = arith.constant 0 : index
    %c0_71 = arith.constant 0 : index
    %234 = vector.load %arg14[%c0_69, %c0_70, %c0_71] : memref<2x1024x128xbf16, #tpu.memory_space<vmem>>, vector<1x1024x128xbf16>
    %235 = vector.shape_cast %234 : vector<1x1024x128xbf16> to vector<1024x128xbf16>
    %cst_72 = arith.constant dense<0.000000e+00> : vector<8x128xf32>
    %236 = tpu.matmul %233, %235, %cst_72 {dimension_numbers = #tpu.dot_dimension_numbers<[1], [0], [0], [1], [0, 0, 1, 1], [], []>} : vector<8x1024xbf16>, vector<1024x128xbf16>, vector<8x128xf32> -> vector<8x128xf32>
    %237 = arith.truncf %236 : vector<8x128xf32> to vector<8x128xbf16>
    %238 = arith.addf %90, %237 : vector<8x128xbf16>
    %c1 = arith.constant 1 : index
    %c0_73 = arith.constant 0 : index
    %c0_74 = arith.constant 0 : index
    %239 = vector.load %arg9[%c1, %c0_73, %c0_74] : memref<2x1x128xbf16, #tpu.memory_space<vmem>>, vector<1x1x128xbf16>
    %240 = vector.shape_cast %239 : vector<1x1x128xbf16> to vector<1x128xbf16>
    %241 = arith.extf %238 : vector<8x128xbf16> to vector<8x128xf32>
    %242 = arith.mulf %241, %241 : vector<8x128xf32>
    %cst_75 = arith.constant dense<0.000000e+00> : vector<8xf32>
    %243 = vector.multi_reduction <add>, %242, %cst_75 [1] : vector<8x128xf32> to vector<8xf32>
    %244 = vector.shape_cast %243 : vector<8xf32> to vector<8x1xf32>
    %cst_76 = arith.constant 1.280000e+02 : f32
    %245 = vector.broadcast %cst_76 : f32 to vector<8x1xf32>
    %246 = arith.divf %244, %245 : vector<8x1xf32>
    %cst_77 = arith.constant 9.99999997E-7 : f32
    %247 = vector.broadcast %cst_77 : f32 to vector<8x1xf32>
    %248 = arith.addf %246, %247 : vector<8x1xf32>
    %249 = math.rsqrt %248 : vector<8x1xf32>
    %250 = vector.broadcast %249 : vector<8x1xf32> to vector<8x128xf32>
    %251 = arith.mulf %241, %250 : vector<8x128xf32>
    %252 = arith.extf %240 : vector<1x128xbf16> to vector<1x128xf32>
    %253 = vector.broadcast %252 : vector<1x128xf32> to vector<8x128xf32>
    %254 = arith.mulf %251, %253 : vector<8x128xf32>
    %255 = arith.truncf %254 : vector<8x128xf32> to vector<8x128xbf16>
    %c1_78 = arith.constant 1 : index
    %c0_79 = arith.constant 0 : index
    %c0_80 = arith.constant 0 : index
    %256 = vector.load %arg10[%c1_78, %c0_79, %c0_80] : memref<2x128x384xbf16, #tpu.memory_space<vmem>>, vector<1x128x384xbf16>
    %257 = vector.shape_cast %256 : vector<1x128x384xbf16> to vector<128x384xbf16>
    %cst_81 = arith.constant dense<0.000000e+00> : vector<8x384xf32>
    %258 = tpu.matmul %255, %257, %cst_81 {dimension_numbers = #tpu.dot_dimension_numbers<[1], [0], [0], [1], [0, 0, 1, 1], [], []>} : vector<8x128xbf16>, vector<128x384xbf16>, vector<8x384xf32> -> vector<8x384xf32>
    %259 = vector.extract_strided_slice %258 {offsets = [0, 0], sizes = [8, 128], strides = [1, 1]} : vector<8x384xf32> to vector<8x128xf32>
    %260 = arith.mulf %259, %1 : vector<8x128xf32>
    %c112_i32_82 = arith.constant 112 : i32
    %261 = tpu.dynamic_rotate %259 by %c112_i32_82 dim 1 : vector<8x128xf32>, i32 -> vector<8x128xf32>
    %262 = arith.mulf %261, %2 : vector<8x128xf32>
    %263 = arith.addf %260, %262 : vector<8x128xf32>
    %c16_i32_83 = arith.constant 16 : i32
    %264 = tpu.dynamic_rotate %259 by %c16_i32_83 dim 1 : vector<8x128xf32>, i32 -> vector<8x128xf32>
    %265 = arith.mulf %264, %3 : vector<8x128xf32>
    %266 = arith.addf %263, %265 : vector<8x128xf32>
    %267 = arith.truncf %266 : vector<8x128xf32> to vector<8x128xbf16>
    %268 = vector.extract_strided_slice %258 {offsets = [0, 128], sizes = [8, 128], strides = [1, 1]} : vector<8x384xf32> to vector<8x128xf32>
    %269 = arith.mulf %268, %4 : vector<8x128xf32>
    %c112_i32_84 = arith.constant 112 : i32
    %270 = tpu.dynamic_rotate %268 by %c112_i32_84 dim 1 : vector<8x128xf32>, i32 -> vector<8x128xf32>
    %271 = arith.mulf %270, %5 : vector<8x128xf32>
    %272 = arith.addf %269, %271 : vector<8x128xf32>
    %c16_i32_85 = arith.constant 16 : i32
    %273 = tpu.dynamic_rotate %268 by %c16_i32_85 dim 1 : vector<8x128xf32>, i32 -> vector<8x128xf32>
    %274 = arith.mulf %273, %6 : vector<8x128xf32>
    %275 = arith.addf %272, %274 : vector<8x128xf32>
    %276 = arith.truncf %275 : vector<8x128xf32> to vector<8x128xbf16>
    %277 = vector.extract_strided_slice %258 {offsets = [0, 256], sizes = [8, 128], strides = [1, 1]} : vector<8x384xf32> to vector<8x128xf32>
    %278 = arith.truncf %277 : vector<8x128xf32> to vector<8x128xbf16>
    %279 = vector.extract_strided_slice %267 {offsets = [0, 0], sizes = [8, 32], strides = [1, 1]} : vector<8x128xbf16> to vector<8x32xbf16>
    %280 = vector.extract_strided_slice %267 {offsets = [0, 32], sizes = [8, 32], strides = [1, 1]} : vector<8x128xbf16> to vector<8x32xbf16>
    %281 = vector.extract_strided_slice %267 {offsets = [0, 64], sizes = [8, 32], strides = [1, 1]} : vector<8x128xbf16> to vector<8x32xbf16>
    %282 = vector.extract_strided_slice %267 {offsets = [0, 96], sizes = [8, 32], strides = [1, 1]} : vector<8x128xbf16> to vector<8x32xbf16>
    %283 = tpu.concatenate %279, %280, %281, %282 in 0 : vector<8x32xbf16>, vector<8x32xbf16>, vector<8x32xbf16>, vector<8x32xbf16> -> vector<32x32xbf16>
    %284 = vector.extract_strided_slice %276 {offsets = [0, 0], sizes = [8, 32], strides = [1, 1]} : vector<8x128xbf16> to vector<8x32xbf16>
    %285 = vector.extract_strided_slice %276 {offsets = [0, 32], sizes = [8, 32], strides = [1, 1]} : vector<8x128xbf16> to vector<8x32xbf16>
    %286 = vector.extract_strided_slice %276 {offsets = [0, 64], sizes = [8, 32], strides = [1, 1]} : vector<8x128xbf16> to vector<8x32xbf16>
    %287 = vector.extract_strided_slice %276 {offsets = [0, 96], sizes = [8, 32], strides = [1, 1]} : vector<8x128xbf16> to vector<8x32xbf16>
    %288 = tpu.concatenate %284, %285, %286, %287 in 0 : vector<8x32xbf16>, vector<8x32xbf16>, vector<8x32xbf16>, vector<8x32xbf16> -> vector<32x32xbf16>
    %289 = vector.extract_strided_slice %278 {offsets = [0, 0], sizes = [8, 32], strides = [1, 1]} : vector<8x128xbf16> to vector<8x32xbf16>
    %290 = vector.extract_strided_slice %278 {offsets = [0, 32], sizes = [8, 32], strides = [1, 1]} : vector<8x128xbf16> to vector<8x32xbf16>
    %291 = vector.extract_strided_slice %278 {offsets = [0, 64], sizes = [8, 32], strides = [1, 1]} : vector<8x128xbf16> to vector<8x32xbf16>
    %292 = vector.extract_strided_slice %278 {offsets = [0, 96], sizes = [8, 32], strides = [1, 1]} : vector<8x128xbf16> to vector<8x32xbf16>
    %293 = tpu.concatenate %289, %290, %291, %292 in 0 : vector<8x32xbf16>, vector<8x32xbf16>, vector<8x32xbf16>, vector<8x32xbf16> -> vector<32x32xbf16>
    %cst_86 = arith.constant dense<0.000000e+00> : vector<32x32xf32>
    %294 = tpu.matmul %283, %288, %cst_86 {dimension_numbers = #tpu.dot_dimension_numbers<[1], [1], [0], [0], [0, 0, 1, 0], [], []>} : vector<32x32xbf16>, vector<32x32xbf16>, vector<32x32xf32> -> vector<32x32xf32>
    %295 = arith.addf %294, %7 : vector<32x32xf32>
    %cst_87 = arith.constant dense<0xFF800000> : vector<32xf32>
    %296 = vector.multi_reduction <maximumf>, %295, %cst_87 [1] : vector<32x32xf32> to vector<32xf32>
    %297 = vector.shape_cast %296 : vector<32xf32> to vector<32x1xf32>
    %298 = vector.broadcast %297 : vector<32x1xf32> to vector<32x32xf32>
    %299 = arith.subf %295, %298 : vector<32x32xf32>
    %300 = math.exp %299 : vector<32x32xf32>
    %cst_88 = arith.constant dense<0.000000e+00> : vector<32xf32>
    %301 = vector.multi_reduction <add>, %300, %cst_88 [1] : vector<32x32xf32> to vector<32xf32>
    %302 = vector.shape_cast %301 : vector<32xf32> to vector<32x1xf32>
    %303 = tpu.reciprocal %302 {approx = true} : vector<32x1xf32> -> vector<32x1xf32>
    %304 = vector.broadcast %303 : vector<32x1xf32> to vector<32x32xf32>
    %305 = arith.mulf %300, %304 : vector<32x32xf32>
    %306 = arith.truncf %305 : vector<32x32xf32> to vector<32x32xbf16>
    %cst_89 = arith.constant dense<0.000000e+00> : vector<32x32xf32>
    %307 = tpu.matmul %306, %293, %cst_89 {dimension_numbers = #tpu.dot_dimension_numbers<[1], [0], [0], [1], [0, 0, 1, 1], [], []>} : vector<32x32xbf16>, vector<32x32xbf16>, vector<32x32xf32> -> vector<32x32xf32>
    %308 = vector.extract_strided_slice %307 {offsets = [0, 0], sizes = [8, 32], strides = [1, 1]} : vector<32x32xf32> to vector<8x32xf32>
    %309 = vector.extract_strided_slice %307 {offsets = [8, 0], sizes = [8, 32], strides = [1, 1]} : vector<32x32xf32> to vector<8x32xf32>
    %310 = vector.extract_strided_slice %307 {offsets = [16, 0], sizes = [8, 32], strides = [1, 1]} : vector<32x32xf32> to vector<8x32xf32>
    %311 = vector.extract_strided_slice %307 {offsets = [24, 0], sizes = [8, 32], strides = [1, 1]} : vector<32x32xf32> to vector<8x32xf32>
    %312 = tpu.concatenate %308, %309, %310, %311 in 1 : vector<8x32xf32>, vector<8x32xf32>, vector<8x32xf32>, vector<8x32xf32> -> vector<8x128xf32>
    %313 = arith.truncf %312 : vector<8x128xf32> to vector<8x128xbf16>
    %c1_90 = arith.constant 1 : index
    %c0_91 = arith.constant 0 : index
    %c0_92 = arith.constant 0 : index
    %314 = vector.load %arg11[%c1_90, %c0_91, %c0_92] : memref<2x128x128xbf16, #tpu.memory_space<vmem>>, vector<1x128x128xbf16>
    %315 = vector.shape_cast %314 : vector<1x128x128xbf16> to vector<128x128xbf16>
    %cst_93 = arith.constant dense<0.000000e+00> : vector<8x128xf32>
    %316 = tpu.matmul %313, %315, %cst_93 {dimension_numbers = #tpu.dot_dimension_numbers<[1], [0], [0], [1], [0, 0, 1, 1], [], []>} : vector<8x128xbf16>, vector<128x128xbf16>, vector<8x128xf32> -> vector<8x128xf32>
    %317 = arith.truncf %316 : vector<8x128xf32> to vector<8x128xbf16>
    %318 = arith.addf %238, %317 : vector<8x128xbf16>
    %c1_94 = arith.constant 1 : index
    %c0_95 = arith.constant 0 : index
    %c0_96 = arith.constant 0 : index
    %319 = vector.load %arg12[%c1_94, %c0_95, %c0_96] : memref<2x1x128xbf16, #tpu.memory_space<vmem>>, vector<1x1x128xbf16>
    %320 = vector.shape_cast %319 : vector<1x1x128xbf16> to vector<1x128xbf16>
    %321 = arith.extf %318 : vector<8x128xbf16> to vector<8x128xf32>
    %322 = arith.mulf %321, %321 : vector<8x128xf32>
    %cst_97 = arith.constant dense<0.000000e+00> : vector<8xf32>
    %323 = vector.multi_reduction <add>, %322, %cst_97 [1] : vector<8x128xf32> to vector<8xf32>
    %324 = vector.shape_cast %323 : vector<8xf32> to vector<8x1xf32>
    %cst_98 = arith.constant 1.280000e+02 : f32
    %325 = vector.broadcast %cst_98 : f32 to vector<8x1xf32>
    %326 = arith.divf %324, %325 : vector<8x1xf32>
    %cst_99 = arith.constant 9.99999997E-7 : f32
    %327 = vector.broadcast %cst_99 : f32 to vector<8x1xf32>
    %328 = arith.addf %326, %327 : vector<8x1xf32>
    %329 = math.rsqrt %328 : vector<8x1xf32>
    %330 = vector.broadcast %329 : vector<8x1xf32> to vector<8x128xf32>
    %331 = arith.mulf %321, %330 : vector<8x128xf32>
    %332 = arith.extf %320 : vector<1x128xbf16> to vector<1x128xf32>
    %333 = vector.broadcast %332 : vector<1x128xf32> to vector<8x128xf32>
    %334 = arith.mulf %331, %333 : vector<8x128xf32>
    %335 = arith.truncf %334 : vector<8x128xf32> to vector<8x128xbf16>
    %c1_100 = arith.constant 1 : index
    %c0_101 = arith.constant 0 : index
    %c0_102 = arith.constant 0 : index
    %336 = vector.load %arg13[%c1_100, %c0_101, %c0_102] : memref<2x128x2176xbf16, #tpu.memory_space<vmem>>, vector<1x128x2176xbf16>
    %337 = vector.shape_cast %336 : vector<1x128x2176xbf16> to vector<128x2176xbf16>
    %cst_103 = arith.constant dense<0.000000e+00> : vector<8x2176xf32>
    %338 = tpu.matmul %335, %337, %cst_103 {dimension_numbers = #tpu.dot_dimension_numbers<[1], [0], [0], [1], [0, 0, 1, 1], [], []>} : vector<8x128xbf16>, vector<128x2176xbf16>, vector<8x2176xf32> -> vector<8x2176xf32>
    %339 = vector.extract_strided_slice %338 {offsets = [0, 2048], sizes = [8, 128], strides = [1, 1]} : vector<8x2176xf32> to vector<8x128xf32>
    %cst_104 = arith.constant 0xFF800000 : f32
    %340 = vector.broadcast %cst_104 : f32 to vector<8x128xf32>
    %341 = arith.select %10, %339, %340 : vector<8x128xi1>, vector<8x128xf32>
    %cst_105 = arith.constant dense<0xFF800000> : vector<8xf32>
    %342 = vector.multi_reduction <maximumf>, %341, %cst_105 [1] : vector<8x128xf32> to vector<8xf32>
    %343 = vector.shape_cast %342 : vector<8xf32> to vector<8x1xf32>
    %344 = vector.broadcast %343 : vector<8x1xf32> to vector<8x128xf32>
    %345 = arith.cmpf oeq, %341, %344 : vector<8x128xf32>
    %c128_i32_106 = arith.constant 128 : i32
    %346 = vector.broadcast %c128_i32_106 : i32 to vector<8x128xi32>
    %347 = arith.select %345, %8, %346 : vector<8x128xi1>, vector<8x128xi32>
    %348 = arith.sitofp %347 : vector<8x128xi32> to vector<8x128xf32>
    %cst_107 = arith.constant dense<0x7F800000> : vector<8xf32>
    %349 = vector.multi_reduction <minimumf>, %348, %cst_107 [1] : vector<8x128xf32> to vector<8xf32>
    %350 = vector.shape_cast %349 : vector<8xf32> to vector<8x1xf32>
    %351 = arith.fptosi %350 : vector<8x1xf32> to vector<8x1xi32>
    %352 = vector.broadcast %351 : vector<8x1xi32> to vector<8x128xi32>
    %353 = arith.cmpi eq, %8, %352 : vector<8x128xi32>
    %cst_108 = arith.constant 0xFF800000 : f32
    %354 = vector.broadcast %cst_108 : f32 to vector<8x128xf32>
    %355 = arith.select %353, %354, %341 : vector<8x128xi1>, vector<8x128xf32>
    %cst_109 = arith.constant dense<0xFF800000> : vector<8xf32>
    %356 = vector.multi_reduction <maximumf>, %355, %cst_109 [1] : vector<8x128xf32> to vector<8xf32>
    %357 = vector.shape_cast %356 : vector<8xf32> to vector<8x1xf32>
    %358 = vector.broadcast %357 : vector<8x1xf32> to vector<8x128xf32>
    %359 = arith.cmpf oeq, %355, %358 : vector<8x128xf32>
    %c128_i32_110 = arith.constant 128 : i32
    %360 = vector.broadcast %c128_i32_110 : i32 to vector<8x128xi32>
    %361 = arith.select %359, %8, %360 : vector<8x128xi1>, vector<8x128xi32>
    %362 = arith.sitofp %361 : vector<8x128xi32> to vector<8x128xf32>
    %cst_111 = arith.constant dense<0x7F800000> : vector<8xf32>
    %363 = vector.multi_reduction <minimumf>, %362, %cst_111 [1] : vector<8x128xf32> to vector<8xf32>
    %364 = vector.shape_cast %363 : vector<8xf32> to vector<8x1xf32>
    %365 = arith.fptosi %364 : vector<8x1xf32> to vector<8x1xi32>
    %366 = arith.subf %357, %343 : vector<8x1xf32>
    %367 = math.exp %366 : vector<8x1xf32>
    %cst_112 = arith.constant 1.000000e+00 : f32
    %368 = vector.broadcast %cst_112 : f32 to vector<8x1xf32>
    %369 = arith.addf %368, %367 : vector<8x1xf32>
    %cst_113 = arith.constant 1.000000e+00 : f32
    %370 = vector.broadcast %cst_113 : f32 to vector<8x1xf32>
    %371 = arith.divf %370, %369 : vector<8x1xf32>
    %372 = arith.mulf %367, %371 : vector<8x1xf32>
    %373 = arith.truncf %371 : vector<8x1xf32> to vector<8x1xbf16>
    %374 = arith.extf %373 : vector<8x1xbf16> to vector<8x1xf32>
    %375 = arith.truncf %372 : vector<8x1xf32> to vector<8x1xbf16>
    %376 = arith.extf %375 : vector<8x1xbf16> to vector<8x1xf32>
    %377 = vector.extract_strided_slice %338 {offsets = [0, 0], sizes = [8, 256], strides = [1, 1]} : vector<8x2176xf32> to vector<8x256xf32>
    %378 = vector.extract_strided_slice %338 {offsets = [0, 256], sizes = [8, 256], strides = [1, 1]} : vector<8x2176xf32> to vector<8x256xf32>
    %c0_i32_114 = arith.constant 0 : i32
    %379 = vector.broadcast %c0_i32_114 : i32 to vector<8x1xi32>
    %380 = arith.cmpi eq, %351, %379 : vector<8x1xi32>
    %cst_115 = arith.constant 0.000000e+00 : f32
    %381 = vector.broadcast %cst_115 : f32 to vector<8x1xf32>
    %382 = arith.select %380, %374, %381 : vector<8x1xi1>, vector<8x1xf32>
    %c0_i32_116 = arith.constant 0 : i32
    %383 = vector.broadcast %c0_i32_116 : i32 to vector<8x1xi32>
    %384 = arith.cmpi eq, %365, %383 : vector<8x1xi32>
    %cst_117 = arith.constant 0.000000e+00 : f32
    %385 = vector.broadcast %cst_117 : f32 to vector<8x1xf32>
    %386 = arith.select %384, %376, %385 : vector<8x1xi1>, vector<8x1xf32>
    %387 = arith.addf %382, %386 : vector<8x1xf32>
    %388 = arith.negf %377 : vector<8x256xf32>
    %389 = math.exp %388 : vector<8x256xf32>
    %cst_118 = arith.constant 1.000000e+00 : f32
    %390 = vector.broadcast %cst_118 : f32 to vector<8x256xf32>
    %391 = arith.addf %390, %389 : vector<8x256xf32>
    %392 = arith.divf %390, %391 : vector<8x256xf32>
    %393 = arith.mulf %377, %392 : vector<8x256xf32>
    %394 = vector.broadcast %387 : vector<8x1xf32> to vector<8x256xf32>
    %395 = arith.mulf %394, %393 : vector<8x256xf32>
    %396 = arith.mulf %395, %378 : vector<8x256xf32>
    %397 = arith.truncf %396 : vector<8x256xf32> to vector<8x256xbf16>
    %398 = vector.extract_strided_slice %338 {offsets = [0, 512], sizes = [8, 256], strides = [1, 1]} : vector<8x2176xf32> to vector<8x256xf32>
    %399 = vector.extract_strided_slice %338 {offsets = [0, 768], sizes = [8, 256], strides = [1, 1]} : vector<8x2176xf32> to vector<8x256xf32>
    %c1_i32_119 = arith.constant 1 : i32
    %400 = vector.broadcast %c1_i32_119 : i32 to vector<8x1xi32>
    %401 = arith.cmpi eq, %351, %400 : vector<8x1xi32>
    %cst_120 = arith.constant 0.000000e+00 : f32
    %402 = vector.broadcast %cst_120 : f32 to vector<8x1xf32>
    %403 = arith.select %401, %374, %402 : vector<8x1xi1>, vector<8x1xf32>
    %c1_i32_121 = arith.constant 1 : i32
    %404 = vector.broadcast %c1_i32_121 : i32 to vector<8x1xi32>
    %405 = arith.cmpi eq, %365, %404 : vector<8x1xi32>
    %cst_122 = arith.constant 0.000000e+00 : f32
    %406 = vector.broadcast %cst_122 : f32 to vector<8x1xf32>
    %407 = arith.select %405, %376, %406 : vector<8x1xi1>, vector<8x1xf32>
    %408 = arith.addf %403, %407 : vector<8x1xf32>
    %409 = arith.negf %398 : vector<8x256xf32>
    %410 = math.exp %409 : vector<8x256xf32>
    %cst_123 = arith.constant 1.000000e+00 : f32
    %411 = vector.broadcast %cst_123 : f32 to vector<8x256xf32>
    %412 = arith.addf %411, %410 : vector<8x256xf32>
    %413 = arith.divf %411, %412 : vector<8x256xf32>
    %414 = arith.mulf %398, %413 : vector<8x256xf32>
    %415 = vector.broadcast %408 : vector<8x1xf32> to vector<8x256xf32>
    %416 = arith.mulf %415, %414 : vector<8x256xf32>
    %417 = arith.mulf %416, %399 : vector<8x256xf32>
    %418 = arith.truncf %417 : vector<8x256xf32> to vector<8x256xbf16>
    %419 = vector.extract_strided_slice %338 {offsets = [0, 1024], sizes = [8, 256], strides = [1, 1]} : vector<8x2176xf32> to vector<8x256xf32>
    %420 = vector.extract_strided_slice %338 {offsets = [0, 1280], sizes = [8, 256], strides = [1, 1]} : vector<8x2176xf32> to vector<8x256xf32>
    %c2_i32_124 = arith.constant 2 : i32
    %421 = vector.broadcast %c2_i32_124 : i32 to vector<8x1xi32>
    %422 = arith.cmpi eq, %351, %421 : vector<8x1xi32>
    %cst_125 = arith.constant 0.000000e+00 : f32
    %423 = vector.broadcast %cst_125 : f32 to vector<8x1xf32>
    %424 = arith.select %422, %374, %423 : vector<8x1xi1>, vector<8x1xf32>
    %c2_i32_126 = arith.constant 2 : i32
    %425 = vector.broadcast %c2_i32_126 : i32 to vector<8x1xi32>
    %426 = arith.cmpi eq, %365, %425 : vector<8x1xi32>
    %cst_127 = arith.constant 0.000000e+00 : f32
    %427 = vector.broadcast %cst_127 : f32 to vector<8x1xf32>
    %428 = arith.select %426, %376, %427 : vector<8x1xi1>, vector<8x1xf32>
    %429 = arith.addf %424, %428 : vector<8x1xf32>
    %430 = arith.negf %419 : vector<8x256xf32>
    %431 = math.exp %430 : vector<8x256xf32>
    %cst_128 = arith.constant 1.000000e+00 : f32
    %432 = vector.broadcast %cst_128 : f32 to vector<8x256xf32>
    %433 = arith.addf %432, %431 : vector<8x256xf32>
    %434 = arith.divf %432, %433 : vector<8x256xf32>
    %435 = arith.mulf %419, %434 : vector<8x256xf32>
    %436 = vector.broadcast %429 : vector<8x1xf32> to vector<8x256xf32>
    %437 = arith.mulf %436, %435 : vector<8x256xf32>
    %438 = arith.mulf %437, %420 : vector<8x256xf32>
    %439 = arith.truncf %438 : vector<8x256xf32> to vector<8x256xbf16>
    %440 = vector.extract_strided_slice %338 {offsets = [0, 1536], sizes = [8, 256], strides = [1, 1]} : vector<8x2176xf32> to vector<8x256xf32>
    %441 = vector.extract_strided_slice %338 {offsets = [0, 1792], sizes = [8, 256], strides = [1, 1]} : vector<8x2176xf32> to vector<8x256xf32>
    %c3_i32_129 = arith.constant 3 : i32
    %442 = vector.broadcast %c3_i32_129 : i32 to vector<8x1xi32>
    %443 = arith.cmpi eq, %351, %442 : vector<8x1xi32>
    %cst_130 = arith.constant 0.000000e+00 : f32
    %444 = vector.broadcast %cst_130 : f32 to vector<8x1xf32>
    %445 = arith.select %443, %374, %444 : vector<8x1xi1>, vector<8x1xf32>
    %c3_i32_131 = arith.constant 3 : i32
    %446 = vector.broadcast %c3_i32_131 : i32 to vector<8x1xi32>
    %447 = arith.cmpi eq, %365, %446 : vector<8x1xi32>
    %cst_132 = arith.constant 0.000000e+00 : f32
    %448 = vector.broadcast %cst_132 : f32 to vector<8x1xf32>
    %449 = arith.select %447, %376, %448 : vector<8x1xi1>, vector<8x1xf32>
    %450 = arith.addf %445, %449 : vector<8x1xf32>
    %451 = arith.negf %440 : vector<8x256xf32>
    %452 = math.exp %451 : vector<8x256xf32>
    %cst_133 = arith.constant 1.000000e+00 : f32
    %453 = vector.broadcast %cst_133 : f32 to vector<8x256xf32>
    %454 = arith.addf %453, %452 : vector<8x256xf32>
    %455 = arith.divf %453, %454 : vector<8x256xf32>
    %456 = arith.mulf %440, %455 : vector<8x256xf32>
    %457 = vector.broadcast %450 : vector<8x1xf32> to vector<8x256xf32>
    %458 = arith.mulf %457, %456 : vector<8x256xf32>
    %459 = arith.mulf %458, %441 : vector<8x256xf32>
    %460 = arith.truncf %459 : vector<8x256xf32> to vector<8x256xbf16>
    %461 = tpu.concatenate %397, %418, %439, %460 in 1 : vector<8x256xbf16>, vector<8x256xbf16>, vector<8x256xbf16>, vector<8x256xbf16> -> vector<8x1024xbf16>
    %c1_134 = arith.constant 1 : index
    %c0_135 = arith.constant 0 : index
    %c0_136 = arith.constant 0 : index
    %462 = vector.load %arg14[%c1_134, %c0_135, %c0_136] : memref<2x1024x128xbf16, #tpu.memory_space<vmem>>, vector<1x1024x128xbf16>
    %463 = vector.shape_cast %462 : vector<1x1024x128xbf16> to vector<1024x128xbf16>
    %cst_137 = arith.constant dense<0.000000e+00> : vector<8x128xf32>
    %464 = tpu.matmul %461, %463, %cst_137 {dimension_numbers = #tpu.dot_dimension_numbers<[1], [0], [0], [1], [0, 0, 1, 1], [], []>} : vector<8x1024xbf16>, vector<1024x128xbf16>, vector<8x128xf32> -> vector<8x128xf32>
    %465 = arith.truncf %464 : vector<8x128xf32> to vector<8x128xbf16>
    %466 = arith.addf %318, %465 : vector<8x128xbf16>
    %c0_138 = arith.constant 0 : index
    %c0_139 = arith.constant 0 : index
    %467 = vector.load %arg15[%c0_138, %c0_139] : memref<1x128xbf16, #tpu.memory_space<vmem>>, vector<1x128xbf16>
    %468 = arith.extf %466 : vector<8x128xbf16> to vector<8x128xf32>
    %469 = arith.mulf %468, %468 : vector<8x128xf32>
    %cst_140 = arith.constant dense<0.000000e+00> : vector<8xf32>
    %470 = vector.multi_reduction <add>, %469, %cst_140 [1] : vector<8x128xf32> to vector<8xf32>
    %471 = vector.shape_cast %470 : vector<8xf32> to vector<8x1xf32>
    %cst_141 = arith.constant 1.280000e+02 : f32
    %472 = vector.broadcast %cst_141 : f32 to vector<8x1xf32>
    %473 = arith.divf %471, %472 : vector<8x1xf32>
    %cst_142 = arith.constant 9.99999997E-7 : f32
    %474 = vector.broadcast %cst_142 : f32 to vector<8x1xf32>
    %475 = arith.addf %473, %474 : vector<8x1xf32>
    %476 = math.rsqrt %475 : vector<8x1xf32>
    %477 = vector.broadcast %476 : vector<8x1xf32> to vector<8x128xf32>
    %478 = arith.mulf %468, %477 : vector<8x128xf32>
    %479 = arith.extf %467 : vector<1x128xbf16> to vector<1x128xf32>
    %480 = vector.broadcast %479 : vector<1x128xf32> to vector<8x128xf32>
    %481 = arith.mulf %478, %480 : vector<8x128xf32>
    %482 = arith.truncf %481 : vector<8x128xf32> to vector<8x128xbf16>
    %c0_143 = arith.constant 0 : index
    %c0_144 = arith.constant 0 : index
    %483 = vector.load %arg16[%c0_143, %c0_144] : memref<128x256xbf16, #tpu.memory_space<vmem>>, vector<128x256xbf16>
    %cst_145 = arith.constant dense<0.000000e+00> : vector<8x256xf32>
    %484 = tpu.matmul %482, %483, %cst_145 {dimension_numbers = #tpu.dot_dimension_numbers<[1], [0], [0], [1], [0, 0, 1, 1], [], []>} : vector<8x128xbf16>, vector<128x256xbf16>, vector<8x256xf32> -> vector<8x256xf32>
    %c0_146 = arith.constant 0 : index
    %c0_147 = arith.constant 0 : index
    %485 = vector.load %arg17[%c0_146, %c0_147] : memref<8x256xf32, #tpu.memory_space<vmem>>, vector<8x256xf32>
    tpu.vector_store %arg17[%c0_146, %c0_147], %484 {strides = array<i32>} : memref<8x256xf32, #tpu.memory_space<vmem>>, vector<8x256xf32>,
    return
  }
  func.func @transform_0(%arg0: i32) -> (i32, i32) {
    %c0_i32 = arith.constant 0 : i32
    %c0_i32_0 = arith.constant 0 : i32
    return %arg0, %c0_i32 : i32, i32
  }
  func.func @transform_1(%arg0: i32) -> (i32, i32) {
    %c0_i32 = arith.constant 0 : i32
    %c0_i32_0 = arith.constant 0 : i32
    %c0_i32_1 = arith.constant 0 : i32
    return %c0_i32, %c0_i32_0 : i32, i32
  }
  func.func @transform_2(%arg0: i32) -> (i32, i32) {
    %c0_i32 = arith.constant 0 : i32
    %c0_i32_0 = arith.constant 0 : i32
    %c0_i32_1 = arith.constant 0 : i32
    return %c0_i32, %c0_i32_0 : i32, i32
  }
  func.func @transform_3(%arg0: i32) -> (i32, i32) {
    %c0_i32 = arith.constant 0 : i32
    %c0_i32_0 = arith.constant 0 : i32
    %c0_i32_1 = arith.constant 0 : i32
    return %c0_i32, %c0_i32_0 : i32, i32
  }
  func.func @transform_4(%arg0: i32) -> (i32, i32) {
    %c0_i32 = arith.constant 0 : i32
    %c0_i32_0 = arith.constant 0 : i32
    %c0_i32_1 = arith.constant 0 : i32
    return %c0_i32, %c0_i32_0 : i32, i32
  }
  func.func @transform_5(%arg0: i32) -> (i32, i32) {
    %c0_i32 = arith.constant 0 : i32
    %c0_i32_0 = arith.constant 0 : i32
    %c0_i32_1 = arith.constant 0 : i32
    return %c0_i32, %c0_i32_0 : i32, i32
  }
  func.func @transform_6(%arg0: i32) -> (i32, i32) {
    %c0_i32 = arith.constant 0 : i32
    %c0_i32_0 = arith.constant 0 : i32
    %c0_i32_1 = arith.constant 0 : i32
    return %c0_i32, %c0_i32_0 : i32, i32
  }
  func.func @transform_7(%arg0: i32) -> (i32, i32) {
    %c0_i32 = arith.constant 0 : i32
    %c0_i32_0 = arith.constant 0 : i32
    %c0_i32_1 = arith.constant 0 : i32
    return %c0_i32, %c0_i32_0 : i32, i32
  }
  func.func @transform_8(%arg0: i32) -> (i32, i32, i32) {
    %c0_i32 = arith.constant 0 : i32
    %c0_i32_0 = arith.constant 0 : i32
    %c0_i32_1 = arith.constant 0 : i32
    %c0_i32_2 = arith.constant 0 : i32
    return %c0_i32, %c0_i32_0, %c0_i32_1 : i32, i32, i32
  }
  func.func @transform_9(%arg0: i32) -> (i32, i32, i32) {
    %c0_i32 = arith.constant 0 : i32
    %c0_i32_0 = arith.constant 0 : i32
    %c0_i32_1 = arith.constant 0 : i32
    %c0_i32_2 = arith.constant 0 : i32
    return %c0_i32, %c0_i32_0, %c0_i32_1 : i32, i32, i32
  }
  func.func @transform_10(%arg0: i32) -> (i32, i32, i32) {
    %c0_i32 = arith.constant 0 : i32
    %c0_i32_0 = arith.constant 0 : i32
    %c0_i32_1 = arith.constant 0 : i32
    %c0_i32_2 = arith.constant 0 : i32
    return %c0_i32, %c0_i32_0, %c0_i32_1 : i32, i32, i32
  }
  func.func @transform_11(%arg0: i32) -> (i32, i32, i32) {
    %c0_i32 = arith.constant 0 : i32
    %c0_i32_0 = arith.constant 0 : i32
    %c0_i32_1 = arith.constant 0 : i32
    %c0_i32_2 = arith.constant 0 : i32
    return %c0_i32, %c0_i32_0, %c0_i32_1 : i32, i32, i32
  }
  func.func @transform_12(%arg0: i32) -> (i32, i32, i32) {
    %c0_i32 = arith.constant 0 : i32
    %c0_i32_0 = arith.constant 0 : i32
    %c0_i32_1 = arith.constant 0 : i32
    %c0_i32_2 = arith.constant 0 : i32
    return %c0_i32, %c0_i32_0, %c0_i32_1 : i32, i32, i32
  }
  func.func @transform_13(%arg0: i32) -> (i32, i32, i32) {
    %c0_i32 = arith.constant 0 : i32
    %c0_i32_0 = arith.constant 0 : i32
    %c0_i32_1 = arith.constant 0 : i32
    %c0_i32_2 = arith.constant 0 : i32
    return %c0_i32, %c0_i32_0, %c0_i32_1 : i32, i32, i32
  }
  func.func @transform_14(%arg0: i32) -> (i32, i32) {
    %c0_i32 = arith.constant 0 : i32
    %c0_i32_0 = arith.constant 0 : i32
    %c0_i32_1 = arith.constant 0 : i32
    return %c0_i32, %c0_i32_0 : i32, i32
  }
  func.func @transform_15(%arg0: i32) -> (i32, i32) {
    %c0_i32 = arith.constant 0 : i32
    %c0_i32_0 = arith.constant 0 : i32
    %c0_i32_1 = arith.constant 0 : i32
    return %c0_i32, %c0_i32_0 : i32, i32
  }
  func.func @transform_16(%arg0: i32) -> (i32, i32) {
    %c0_i32 = arith.constant 0 : i32
    %c0_i32_0 = arith.constant 0 : i32
    return %arg0, %c0_i32 : i32, i32
  }
}

</mosaic_0001>

<bundles_post_ra>
// kernel: tile.24
= control target key start
LH: loop header
LB: loop body
LE: loop exit
PB: predicated region body
PF: predicated region fallthrough
CT: control target
= control target key end

     0   :  { %vm36_vm0 = vcmask 1047556   ;;  %s81_s22 = smov 32   ;;  %s82_s23 = smov 64   ;;  %vm38_vm1 = vcmask 261120   ;;  %vm48_vm2 = vcmask 1048320   ;;  %vm58_vm3 = vcmask 785920   ;;  %s133_s0 = inlined_call_operand.vmem [shape: f32[8,4,32], index: 0, kind: input, shape index: {}]   ;;  %s134_s1 = inlined_call_operand.vmem [shape: f32[8,128], index: 1, kind: output, shape index: {}]  }
   0x1   :  { %v70_v0 = vld [vmem:[%s133_s0 + $0x1c] sm:$0xf]  ;;  %v71_v1 = vld [vmem:[%s133_s0 + $0x18] sm:$0xf]  ;;  %v72_v2 = vld [vmem:[%s133_s0 + $0x14] sm:$0xf] }
   0x2   :  { %7 = vst [vmem:[#allocation0 + $0x38] sm:$0xf] %v70_v0  ;;  %v73_v3 = vld [vmem:[%s133_s0 + $0x10] sm:$0xf]  ;;  %v74_v4 = vld [vmem:[%s133_s0 + $0xc] sm:$0xf] }
   0x3   :  { %11 = vst [vmem:[#allocation0 + $0x30] sm:$0xf] %v71_v1  ;;  %v75_v5 = vld [vmem:[%s133_s0 + $0x8] sm:$0xf]  ;;  %v76_v6 = vld [vmem:[%s133_s0 + $0x4] sm:$0xf] }
   0x4   :  { %15 = vst [vmem:[#allocation0 + $0x28] sm:$0xf] %v72_v2  ;;  %v32_v7 = vld [vmem:[%s133_s0] sm:$0xf]  ;;  %s80_s0 = smov 96   ;;  %vm68_vm4 = vcmask 523520  }
   0x5   :  { %19 = vst [vmem:[#allocation0 + $0x20] sm:$0xf] %v73_v3 }
   0x6   :  { %23 = vst [vmem:[#allocation0 + $0x18] sm:$0xf] %v74_v4 }
   0x7   :  { %27 = vst [vmem:[#allocation0 + $0x10] sm:$0xf] %v75_v5 }
   0x8   :  { %31 = vst [vmem:[#allocation0 + $0x8] sm:$0xf] %v76_v6 }
   0x9   :  { %33 = vst [vmem:[#allocation0] sm:$0xf] %v32_v7 }
   0xc   :  { %v43_v8 = vld [vmem:[#allocation0 + $0x3] ss:$8 sm:$0xf0]   ;;  %v63_v9 = vld [vmem:[#allocation0 + $0x1] ss:$8 sm:$0xf0]  }
   0xd   :  { %v53_v15 = vld [vmem:[#allocation0 + $0x2] ss:$8 sm:$0xf0]   ;;  %v35_v18 = vld [vmem:[#allocation0] ss:$8 sm:$0xf0]  }
  0x10   :  { %v41_v10 = vld [vmem:[#allocation0 + $0x3] ss:$8 sm:$0xf]   ;;  %v61_v12 = vld [vmem:[#allocation0 + $0x1] ss:$8 sm:$0xf]  }
  0x11   :  { %v45_v11 = vsel %vm36_vm0, %v43_v8, %v41_v10  ;;  %v65_v13 = vsel %vm36_vm0, %v63_v9, %v61_v12  ;;  %v51_v14 = vld [vmem:[#allocation0 + $0x2] ss:$8 sm:$0xf]   ;;  %v34_v17 = vld [vmem:[#allocation0] ss:$8 sm:$0xf]  }
  0x12   :  { %46 = vrot.lane.b32.xlu0 %v45_v11, %s80_s0  ;;  %66 = vrot.lane.b32.xlu1 %v65_v13, %s81_s22  ;;  %v55_v16 = vsel %vm36_vm0, %v53_v15, %v51_v14  ;;  %v37_v19 = vsel %vm36_vm0, %v35_v18, %v34_v17 }
  0x13   :  { %39 = vst.msk [vmem:[%s134_s1] sm:$0xff] %vm38_vm1, %v37_v19  }
  0x1a   :  { %56 = vrot.lane.b32.xlu0 %v55_v16, %s82_s23 }
  0x84   :  { %v47_v20 = vpop.permute.xlu0 %46   ;;  %v67_v21 = vpop.permute.xlu1 %66  }
  0x85   :  { %49 = vst.msk [vmem:[%s134_s1] sm:$0xff] %vm48_vm2, %v47_v20  }
  0x8c   :  { %v57_v22 = vpop.permute.xlu0 %56  }
  0x8d   :  { %59 = vst.msk [vmem:[%s134_s1] sm:$0xff] %vm58_vm3, %v57_v22  }
  0x8e   :  { %69 = vst.msk [vmem:[%s134_s1] sm:$0xff] %vm68_vm4, %v67_v21  }

// kernel: mixtral_forward.1
= control target key start
LH: loop header
LB: loop body
LE: loop exit
PB: predicated region body
PF: predicated region fallthrough
CT: control target
= control target key end

     0   :  { %s9935_s0 = inlined_call_operand.vmem [shape: bf16[16,128], index: 0, kind: input, shape index: {}]   ;;  %s9936_s1 = inlined_call_operand.vmem [shape: f32[8,128], index: 1, kind: input, shape index: {}]   ;;  %s9937_s2 = inlined_call_operand.vmem [shape: f32[8,128], index: 2, kind: input, shape index: {}]   ;;  %s9938_s3 = inlined_call_operand.vmem [shape: f32[8,128], index: 3, kind: input, shape index: {}]   ;;  %s9939_s4 = inlined_call_operand.vmem [shape: f32[8,128], index: 4, kind: input, shape index: {}]   ;;  %s9940_s5 = inlined_call_operand.vmem [shape: f32[8,128], index: 5, kind: input, shape index: {}]   ;;  %s9941_s6 = inlined_call_operand.vmem [shape: f32[8,128], index: 6, kind: input, shape index: {}]   ;;  %s9942_s7 = inlined_call_operand.vmem [shape: f32[32,32], index: 7, kind: input, shape index: {}]   ;;  %s9943_s8 = inlined_call_operand.vmem [shape: bf16[2,1,128], index: 8, kind: input, shape index: {}]   ;;  %s9944_s9 = inlined_call_operand.hbm [shape: bf16[2,128,384], index: 9, kind: input, shape index: {}]   ;;  %s9945_s10 = inlined_call_operand.hbm [shape: bf16[2,128,128], index: 10, kind: input, shape index: {}]   ;;  %s9946_s11 = inlined_call_operand.vmem [shape: bf16[2,1,128], index: 11, kind: input, shape index: {}]   ;;  %s9947_s12 = inlined_call_operand.hbm [shape: bf16[2,128,2176], index: 12, kind: input, shape index: {}]   ;;  %s9948_s13 = inlined_call_operand.hbm [shape: bf16[2,1024,128], index: 13, kind: input, shape index: {}]   ;;  %s9949_s14 = inlined_call_operand.hbm [shape: bf16[1,128], index: 14, kind: input, shape index: {}]   ;;  %s9950_s15 = inlined_call_operand.hbm [shape: bf16[128,256], index: 15, kind: input, shape index: {}]   ;;  %s9951_s16 = inlined_call_operand.hbm [shape: f32[16,256], index: 16, kind: output, shape index: {}]  }
   0x1   :  { %9963 = sst [smem:[#allocation27_spill]] %s9935_s0 }
   0x2   :  { %9964 = sst [smem:[#allocation28_spill]] %s9945_s10 }
   0x3   :  { %9965 = sst [smem:[#allocation29_spill]] %s9946_s11 }
   0x4   :  { %9966 = sst [smem:[#allocation30_spill]] %s9948_s13 }
   0x5   :  { %9967 = sst [smem:[#allocation31_spill]] %s9951_s16 }
   0x6   :  { %21 = vsyncpa [#allocation3], 0 }
   0x7   :  { %22 = vsyncpa [#allocation6], 0 }
   0x8   :  { %23 = vsyncpa [#allocation9], 0 }
   0x9   :  { %24 = vsyncpa [#allocation12], 0 }
   0xa   :  { %25 = vsyncpa [#allocation4], 0 }
   0xb   :  { %27 = vsyncpa [#allocation4 + $0x1], 0  ;;  %s8904_s21 = smov 0   ;;  %s8906_s22 = smov 0  }
   0xc   :  { %s8908_s23 = smov 0   ;;  %s8910_s24 = smov 0  }
   0xd LB: > { %9968 = sst [smem:[#allocation19_spill]] %s8785_s21  ;;  %s8925_s25 = sadd.s32 4294967295, %s8797_s24   ;;  %s8797_s24 = sphi %s8910_s24, %s10046_s24   ;;  %s8793_s23 = sphi %s8908_s23, %s10049_s23   ;;  %s8789_s22 = sphi %s8906_s22, %s10048_s22   ;;  %s8785_s21 = sphi %s8904_s21, %s10047_s21  }
   0xe   : > { %9969 = sst [smem:[#allocation20_spill]] %s8789_s22  ;;  %s5829_s26 = sadd.s32 4294967294, %s8797_s24  }
   0xf   : > { %9970 = sst [smem:[#allocation21_spill]] %s8793_s23  ;;  %s8929_s27 = sadd.s32 1, %s8797_s24  }
  0x10   : > { %9971 = sst [smem:[#allocation22_spill]] %s8797_s24  ;;  %s381_s28 = sadd.s32 1, %s8793_s23 }
  0x11   : > { %9972 = sst [smem:[#allocation23_spill]] %s8929_s27  ;;  %s378_s29 = ssub.s32 %s8797_s24, %s8929_s27 }
  0x12   : > { %p391_p0 = scmp.ne.s32.totalorder %s8793_s23, %s8789_s22  ;;  %p379_p1 = scmp.eq.s32.totalorder %s378_s29, 0 }
  0x13   : > { %p392_p2 = scmp.eq.s32.totalorder %s8925_s25, 1  ;;  %p397_p3 = scmp.ne.s32.totalorder %s8789_s22, %s8785_s21 }
  0x14   : > { %p398_p4 = scmp.eq.s32.totalorder %s5829_s26, 1  ;;  %p5830_p7 = scmp.ge.s32.totalorder %s8797_s24, 1 }
  0x15   : > { %s8940_s30 = scalar_select %p379_p1, %s8793_s23, %s381_s28  }
  0x16   : > { %p8942_p5 = por %p392_p2, %p391_p0  ;;  %p8946_p6 = por %p398_p4, %p397_p3 }
  0x17   : > { %9973 = sst [smem:[#allocation24_spill]] %s8940_s30  ;;  %p405_p8 = scmp.lt.s32.totalorder %s8797_s24, 3 }
  0x18   : > { %s9974_s0 = scalar_select %p8942_p5, 1, 0 }
  0x19   : > { %s9976_s17 = scalar_select %p8946_p6, 1, 0 }
  0x1a   : > { %9975 = sst [smem:[#allocation25_spill]] %s9974_s0  ;;  %p8348_p9 = scmp.eq.s32.totalorder %s8925_s25, 0 }
  0x1b   : > { %9977 = sst [smem:[#allocation26_spill]] %s9976_s17  ;;  %p8953_p10 = pnand %p5830_p7, %p405_p8 }
  0x1c   : > { %s9979_s10 = sld [smem:[#allocation28_spill]]  ;;  %s8799_s28 = smov [#allocation5]  }
  0x1d   : > { %p8325_p11 = pneg %p8953_p10  ;;  %s456_s29 = sshll.u32 %s8799_s28, 4  ;;  %s457_s29 = int_to_ptr.vmem [resolvable:$true] %s456_s29 }
  0x1e   : > { %s9981_s13 = sld [smem:[#allocation30_spill]]  ;;  %s8800_s19 = smov 64  }
  0x1f   : > { %p8964_p12 = pnand %p8348_p9, %p8325_p11  ;;  %s8801_s20 = smov 4  }
  0x20   : > { %s440_s0 = sshll.u32 %s9944_s9, 4  ;;  %s8803_s23 = smov [#allocation2]   ;;  %s441_s0 = int_to_ptr.hbm [resolvable:$true] %s440_s0 }
  0x21   : > { %s442_s27 = sshll.u32 %s8803_s23, 4  ;;  %s471_s22 = sshll.u32 %s9947_s12, 4  ;;  %s443_s27 = int_to_ptr.vmem [resolvable:$true] %s442_s27  ;;  %s472_s22 = int_to_ptr.hbm [resolvable:$true] %s471_s22 }
  0x22   : > { %s454_s26 = sshll.u32 %s9979_s10, 4  ;;  %s8802_s10 = smov [#allocation8]   ;;  %s455_s26 = int_to_ptr.hbm [resolvable:$true] %s454_s26 }
  0x23   : > { %8331 = dma.hbm_to_vmem [thread:$0]  (!%p8964_p12), %s455_s26, 2048, %s457_s29, [#allocation6], %s8800_s19, %s8800_s19, %s8801_s20  }
  0x24   : > { %s485_s17 = sshll.u32 %s9981_s13, 4  ;;  %s487_s28 = sshll.u32 %s8802_s10, 4  ;;  %s486_s17 = int_to_ptr.hbm [resolvable:$true] %s485_s17  ;;  %s488_s28 = int_to_ptr.vmem [resolvable:$true] %s487_s28 }
  0x25   : > { %8337 = dma.hbm_to_vmem [thread:$0]  (!%p8964_p12), %s486_s17, 16384, %s488_s28, [#allocation9], %s8800_s19, %s8800_s19, %s8801_s20  }
  0x26   : > { %s8804_s11 = smov 192   ;;  %s8805_s26 = smov 12  }
  0x27   : > { %8328 = dma.hbm_to_vmem [thread:$0]  (!%p8964_p12), %s441_s0, 6144, %s443_s27, [#allocation3], %s8804_s11, %s8804_s11, %s8805_s26  }
  0x28   : > { %s8806_s10 = smov [#allocation7]   ;;  %s8807_s24 = smov 1088  }
  0x29   : > { %s473_s21 = sshll.u32 %s8806_s10, 4  ;;  %s8808_s29 = smov 68   ;;  %s474_s21 = int_to_ptr.vmem [resolvable:$true] %s473_s21 }
  0x2a   : > { %8334 = dma.hbm_to_vmem [thread:$0]  (!%p8964_p12), %s472_s22, 34816, %s474_s21, [#allocation6], %s8807_s24, %s8807_s24, %s8808_s29  }
  0x2b   : > { %s500_s20 = sshll.u32 %s9949_s14, 4  ;;  %s8809_s13 = smov [#allocation10]   ;;  %s501_s20 = int_to_ptr.hbm [resolvable:$true] %s500_s20 }
  0x2c   : > { %s502_s16 = sshll.u32 %s8809_s13, 4  ;;  %s511_s11 = sshll.u32 %s9950_s15, 4  ;;  %s503_s16 = int_to_ptr.vmem [resolvable:$true] %s502_s16  ;;  %s512_s11 = int_to_ptr.hbm [resolvable:$true] %s511_s11 }
  0x2d   : > { %8340 = dma.hbm_to_vmem [thread:$0]  (!%p8964_p12), %s501_s20, 16, %s503_s16, [#allocation9]  }
  0x2e   : > { %s8810_s0 = smov [#allocation11]   ;;  %s8811_s26 = smov 128  }
  0x2f   : > { %s513_s27 = sshll.u32 %s8810_s0, 4  ;;  %s8812_s22 = smov 8   ;;  %s514_s27 = int_to_ptr.vmem [resolvable:$true] %s513_s27 }
  0x30   : > { %8343 = dma.hbm_to_vmem [thread:$0]  (!%p8964_p12), %s512_s11, 2048, %s514_s27, [#allocation12], %s8811_s26, %s8811_s26, %s8812_s22  }
  0x31   : > { %536 = sbr.rel (%p8953_p10) target bundleno = 5184 (0x1440), region = 84 }
  0x36   : > { %8764 = dma.done.wait (%p8348_p9), [#allocation3], 6144  }
  0x37   : > { %8766 = vsyncadd (%p8348_p9), [#allocation3], 4294961152 }
  0x38   : > { %8768 = dma.done.wait (%p8348_p9), [#allocation6], 36864  }
  0x39   : > { %8770 = vsyncadd (%p8348_p9), [#allocation6], 4294930432 }
  0x3a   : > { %8772 = dma.done.wait (%p8348_p9), [#allocation9], 16400  }
  0x3b   : > { %8774 = vsyncadd (%p8348_p9), [#allocation9], 4294950896 }
  0x3c   : > { %8776 = dma.done.wait (%p8348_p9), [#allocation12], 2048  }
  0x3d   : > { %8778 = vsyncadd (%p8348_p9), [#allocation12], 4294965248  ;;  %p611_p13 = scmp.lt.s32.totalorder %s8925_s25, 1  ;;  %s9982_s24 = sld [smem:[#allocation27_spill]]  ;;  %v5933_v1 = vld [vmem:[#allocation2 + $0xa8] sm:$0xf] }
  0x3e   : > { %v7820_v2 = vld [vmem:[#allocation2 + $0xb0] sm:$0xf0]  ;;  %v7819_v5 = vld [vmem:[#allocation2 + $0xac] sm:$0xf]  ;;  %v5935_v6 = vld [vmem:[#allocation2 + $0xb4] sm:$0xf0] }
  0x3f   : > { %s612_s30 = scalar_select %p611_p13, %s8925_s25, 1  ;;  %v5934_v4 = vor.u32 %v7820_v2, %v5933_v1  ;;  %v5941_v7 = vld [vmem:[#allocation2 + $0xb0] sm:$0xf]  ;;  %v5938_v8 = vor.u32 %v7819_v5, %v5935_v6  ;;  %v7821_v9 = vld [vmem:[#allocation2 + $0xb8] sm:$0xf0]  ;;  %v8813_v28 = vmov 128.0  }
  0x40   : > { %v5942_v11 = vor.u32 %v7821_v9, %v5941_v7  ;;  %v5921_v12 = vld [vmem:[#allocation2 + $0x90] sm:$0xf]  ;;  %v7817_v13 = vld [vmem:[#allocation2 + $0x98] sm:$0xf0]  ;;  %v7816_v14 = vld [vmem:[#allocation2 + $0x94] sm:$0xf]  ;;  %8413 = vrcp.f32 %v8813_v28 }
  0x41   : > { %s5846_s18 = sshll.u32 %s612_s30, 2  ;;  %819 = vmatpush.bf16.msra.mxu0 %v5934_v4  ;;  %832 = vmatpush.bf16.msra.mxu1 %v5938_v8  ;;  %v5922_v15 = vor.u32 %v7817_v13, %v5921_v12  ;;  %v5923_v16 = vld [vmem:[#allocation2 + $0x9c] sm:$0xf0]  ;;  %v5929_v17 = vld [vmem:[#allocation2 + $0x98] sm:$0xf]  ;;  %s8814_s20 = smov 16  }
  0x42   : > { %845 = vmatpush.bf16.msra.mxu2 %v5942_v11  ;;  %v7818_v18 = vld [vmem:[#allocation2 + $0xa0] sm:$0xf0]  ;;  %v5926_v19 = vor.u32 %v7816_v14, %v5923_v16  ;;  %v5909_v21 = vld [vmem:[#allocation2 + $0x78] sm:$0xf]  ;;  %v7813_v23 = vld [vmem:[#allocation2 + $0x7c] sm:$0xf] }
  0x43   : > { %s614_s29 = scalar_lea.vmem %s9982_s24, %s5846_s18  ;;  %v5930_v20 = vor.u32 %v7818_v18, %v5929_v17  ;;  %v7814_v22 = vld [vmem:[#allocation2 + $0x80] sm:$0xf0]  ;;  %v5911_v25 = vld [vmem:[#allocation2 + $0x84] sm:$0xf0]  ;;  %v5917_v26 = vld [vmem:[#allocation2 + $0x80] sm:$0xf] }
  0x44   : > { %v616_v0 = vld [vmem:[%s614_s29] sm:$0xf]  ;;  %v5910_v24 = vor.u32 %v7814_v22, %v5909_v21  ;;  %v7815_v27 = vld [vmem:[#allocation2 + $0x88] sm:$0xf0]  ;;  %v5914_v29 = vor.u32 %v7813_v23, %v5911_v25  ;;  %v7810_v33 = vld [vmem:[#allocation2 + $0x64] sm:$0xf] }
  0x45   : > { %v9018_v3 = vunpack.c.l.bf16 %v616_v0  ;;  %820 = vmatpush.bf16.msra.mxu0 %v5922_v15  ;;  %833 = vmatpush.bf16.msra.mxu1 %v5926_v19  ;;  %v5918_v30 = vor.u32 %v7815_v27, %v5917_v26  ;;  %v5897_v31 = vld [vmem:[#allocation2 + $0x60] sm:$0xf]  ;;  %v7811_v32 = vld [vmem:[#allocation2 + $0x68] sm:$0xf0]  ;;  %v5899_v35 = vld [vmem:[#allocation2 + $0x6c] sm:$0xf0] }
  0x46   : > { %846 = vmatpush.bf16.msra.mxu2 %v5930_v20  ;;  %v5898_v34 = vor.u32 %v7811_v32, %v5897_v31  ;;  %v5905_v36 = vld [vmem:[#allocation2 + $0x68] sm:$0xf]  ;;  %v7812_v37 = vld [vmem:[#allocation2 + $0x70] sm:$0xf0]  ;;  %v5902_v38 = vor.u32 %v7810_v33, %v5899_v35  ;;  %v8414_v40 = vpop.eup %8413  ;;  %v7807_v43 = vld [vmem:[#allocation2 + $0x4c] sm:$0xf] }
  0x47   : > { %v632_v10 = vmul.f32 %v9018_v3, %v9018_v3  ;;  %v5906_v39 = vor.u32 %v7812_v37, %v5905_v36  ;;  %v5885_v41 = vld [vmem:[#allocation2 + $0x48] sm:$0xf]  ;;  %v7808_v42 = vld [vmem:[#allocation2 + $0x50] sm:$0xf0]  ;;  %v5887_v45 = vld [vmem:[#allocation2 + $0x54] sm:$0xf0]  ;;  %vm640_vm0 = vweird.f32 %v8414_v40 }
  0x48   : > { %v5886_v44 = vor.u32 %v7808_v42, %v5885_v41  ;;  %v5893_v46 = vld [vmem:[#allocation2 + $0x50] sm:$0xf]  ;;  %v7809_v47 = vld [vmem:[#allocation2 + $0x58] sm:$0xf0]  ;;  %v5890_v48 = vor.u32 %v7807_v43, %v5887_v45  ;;  %v636_v50 = vmul.f32 128.0, %v8414_v40  ;;  %s8815_s13 = smov 112  }
  0x49   : > { %633 = vadd.xlane.f32.xlu0 %v632_v10  ;;  %821 = vmatpush.bf16.msra.mxu0 %v5910_v24  ;;  %v5894_v49 = vor.u32 %v7809_v47, %v5893_v46  ;;  %v5873_v51 = vld [vmem:[#allocation2 + $0x30] sm:$0xf]  ;;  %v7805_v52 = vld [vmem:[#allocation2 + $0x38] sm:$0xf0]  ;;  %v7804_v53 = vld [vmem:[#allocation2 + $0x34] sm:$0xf] }
  0x4a   : > { %834 = vmatpush.bf16.msra.mxu1 %v5914_v29  ;;  %847 = vmatpush.bf16.msra.mxu2 %v5918_v30  ;;  %v5874_v54 = vor.u32 %v7805_v52, %v5873_v51  ;;  %v5875_v55 = vld [vmem:[#allocation2 + $0x3c] sm:$0xf0]  ;;  %v5881_v56 = vld [vmem:[#allocation2 + $0x38] sm:$0xf]  ;;  %v7806_v57 = vld [vmem:[#allocation2 + $0x40] sm:$0xf0] }
  0x4b   : > { %v5878_v58 = vor.u32 %v7804_v53, %v5875_v55  ;;  %v5882_v59 = vor.u32 %v7806_v57, %v5881_v56  ;;  %v637_v60 = vsub.f32 1.0, %v636_v50  ;;  %v5861_v61 = vld [vmem:[#allocation2 + $0x18] sm:$0xf]  ;;  %v7802_v62 = vld [vmem:[#allocation2 + $0x20] sm:$0xf0]  ;;  %s8816_s24 = smov 64  }
  0x4c   : > { %v7801_v63 = vld [vmem:[#allocation2 + $0x1c] sm:$0xf]  ;;  %v5862_v0 = vor.u32 %v7802_v62, %v5861_v61  ;;  %v5863_v1 = vld [vmem:[#allocation2 + $0x24] sm:$0xf0]  ;;  %v5869_v2 = vld [vmem:[#allocation2 + $0x20] sm:$0xf] }
  0x4d   : > { %822 = vmatpush.bf16.msra.mxu0 %v5898_v34  ;;  %v7803_v4 = vld [vmem:[#allocation2 + $0x28] sm:$0xf0]  ;;  %v5866_v5 = vor.u32 %v7801_v63, %v5863_v1  ;;  %v5849_v7 = vld [vmem:[#allocation2] sm:$0xf]  ;;  %v7798_v9 = vld [vmem:[#allocation2 + $0x4] sm:$0xf]  ;;  %v638_v10 = vmul.f32 %v8414_v40, %v637_v60 }
  0x4e   : > { %835 = vmatpush.bf16.msra.mxu1 %v5902_v38  ;;  %848 = vmatpush.bf16.msra.mxu2 %v5906_v39  ;;  %v5870_v6 = vor.u32 %v7803_v4, %v5869_v2  ;;  %v7799_v8 = vld [vmem:[#allocation2 + $0x8] sm:$0xf0]  ;;  %v5851_v12 = vld [vmem:[#allocation2 + $0xc] sm:$0xf0]  ;;  %v5857_v13 = vld [vmem:[#allocation2 + $0x8] sm:$0xf] }
  0x4f   : > { %v5850_v11 = vor.u32 %v7799_v8, %v5849_v7  ;;  %v7800_v14 = vld [vmem:[#allocation2 + $0x10] sm:$0xf0]  ;;  %v5854_v15 = vor.u32 %v7798_v9, %v5851_v12  ;;  %v639_v17 = vadd.f32 %v8414_v40, %v638_v10  ;;  %v630_v25 = vld [vmem:[%s9943_s8] sm:$0x1]  ;;  %s8817_s29 = smov 32   ;;  %s8818_s17 = smov 96  }
  0x50   : > { %v5858_v16 = vor.u32 %v7800_v14, %v5857_v13  ;;  %v655_v27 = vunpack.c.l.bf16 %v630_v25  ;;  %v620_v41 = vld [vmem:[%s9939_s4] sm:$0xff]  ;;  %vm888_vm4 = vcmask 1043456   ;;  %vm927_vm5 = vcmask 261120   ;;  %v625_v25 = vld [vmem:[%s9942_s7 + $0x10] sm:$0xff]  ;;  %s9983_s18 = sld [smem:[#allocation29_spill]] }
  0x51   : > { %823 = vmatpush.bf16.msra.mxu0 %v5886_v44  ;;  %v9022_v18 = vsel %vm640_vm0, %v8414_v40, %v639_v17  ;;  %v621_v42 = vld [vmem:[%s9940_s5] sm:$0xff]  ;;  %vm1039_vm6 = vcmask 523264   ;;  %vm1041_vm7 = vcmask 785408   ;;  %s10041_s30 = sld [smem:[#allocation31_spill]] }
  0x52   : > { %836 = vmatpush.bf16.msra.mxu1 %v5890_v48  ;;  %849 = vmatpush.bf16.msra.mxu2 %v5894_v49  ;;  %v656_v30 = vperm.slane %v655_v27, 0  ;;  %v622_v43 = vld [vmem:[%s9941_s6] sm:$0xff] }
  0x53   : > { %v617_v51 = vld [vmem:[%s9936_s1] sm:$0xff] }
  0x54   : > { %v618_v52 = vld [vmem:[%s9937_s2] sm:$0xff] }
  0x55   : > { %824 = vmatpush.bf16.msra.mxu0 %v5874_v54  ;;  %v619_v54 = vld [vmem:[%s9938_s3] sm:$0xff] }
  0x56   : > { %837 = vmatpush.bf16.msra.mxu1 %v5878_v58  ;;  %850 = vmatpush.bf16.msra.mxu2 %v5882_v59 }
  0x59   : > { %825 = vmatpush.bf16.msra.mxu0 %v5862_v0 }
  0x5a   : > { %838 = vmatpush.bf16.msra.mxu1 %v5866_v5  ;;  %851 = vmatpush.bf16.msra.mxu2 %v5870_v6 }
  0x5d   : > { %826 = vmatpush.bf16.msra.mxu0 %v5850_v11 }
  0x5e   : > { %839 = vmatpush.bf16.msra.mxu1 %v5854_v15  ;;  %852 = vmatpush.bf16.msra.mxu2 %v5858_v16  ;;  %v623_v16 = vld [vmem:[%s9942_s7] sm:$0xff] }
  0xbc   : > { %v634_v19 = vpop.xlane.xlu0 %633 }
  0xbd   : > { %v642_v20 = vmul.f32 %v9022_v18, %v634_v19 }
  0xbf   : > { %v643_v21 = vadd.f32 1e-06, %v642_v20 }
  0xc1   : > { %8415 = vrsqrt.f32 %v643_v21  ;;  %vm650_vm2 = vweird.f32 %v643_v21 }
  0xc7   : > { %v8416_v22 = vpop.eup %8415 }
  0xc8   : > { %v645_v23 = vmul.f32 %v8416_v22, %v643_v21  ;;  %vm651_vm1 = vweird.f32 %v8416_v22  ;;  %v624_v21 = vld [vmem:[%s9942_s7 + $0x8] sm:$0xff] }
  0xc9   : > { %vm652_vm3 = vmor %vm650_vm2, %vm651_vm1 }
  0xca   : > { %v646_v24 = vmul.f32 %v8416_v22, %v645_v23 }
  0xcc   : > { %v647_v26 = vmul.f32 0.5, %v646_v24 }
  0xce   : > { %v648_v28 = vsub.f32 1.5, %v647_v26 }
  0xd0   : > { %v649_v29 = vmul.f32 %v8416_v22, %v648_v28 }
  0xd2   : > { %v653_v31 = vsel %vm652_vm3, %v8416_v22, %v649_v29  ;;  %v626_v29 = vld [vmem:[%s9942_s7 + $0x18] sm:$0xff] }
  0xd3   : > { %v654_v32 = vmul.f32 %v653_v31, %v9018_v3 }
  0xd5   : > { %v657_v33 = vmul.f32 %v656_v30, %v654_v32 }
  0xd7   : > { %v658_v34 = vpack.c.bf16 %v657_v33, %v657_v33 }
  0xd9   : > { %827 = vmatmul.bf16.vlgmr.msra.gmra.mxu0 %v658_v34  ;;  %840 = vmatmul.bf16.vlgmr.msra.gmra.mxu1 %v658_v34 }
  0xda   : > { %853 = vmatmul.bf16.vlgmr.msra.gmra.mxu2 %v658_v34 }
 0x156   : > { %v828_v35 = vpop.f32.mrf.mxu0  ;;  %v841_v36 = vpop.f32.mrf.mxu1 }
 0x157   : > { %873 = vrot.lane.b32.xlu1 %v841_v36, %s8814_s20  ;;  %869 = vrot.lane.b32.xlu0 %v841_v36, %s8815_s13  ;;  %v868_v46 = vmul.f32 %v841_v36, %v620_v41  ;;  %v858_v57 = vmul.f32 %v828_v35, %v617_v51 }
 0x158   : > { %863 = vrot.lane.b32.xlu2 %v828_v35, %s8814_s20 }
 0x15d   : > { %v9032_v37 = vpop.f32.mrf.mxu2 }
 0x15e   : > { %v830_v38 = vpop.f32.mrf.mxu0  ;;  %v843_v39 = vpop.f32.mrf.mxu1  ;;  %v878_v33 = vpack.c.bf16 %v9032_v37, %v9032_v37 }
 0x15f   : > { %859 = vrot.lane.b32.xlu1 %v828_v35, %s8815_s13 }
 0x160   : > { %v911_v34 = vunpack.c.l.b16 %v878_v33 }
 0x162   : > { %v912_v35 = vpack.c.b16 %v911_v34, %v911_v34  ;;  %v7949_v34 = vld [vmem:[#allocation7 + $0x3bc] sm:$0xf] }
 0x165   : > { %v856_v40 = vpop.f32.mrf.mxu2 }
 0x1b2   : > { %v864_v55 = vpop.permute.xlu2 %863 }
 0x1b3   : > { %v865_v60 = vmul.f32 %v864_v55, %v619_v54 }
 0x1c9   : > { %v874_v44 = vpop.permute.xlu1 %873  ;;  %v870_v45 = vpop.permute.xlu0 %869 }
 0x1ca   : > { %v871_v47 = vmul.f32 %v870_v45, %v621_v42  ;;  %v875_v48 = vmul.f32 %v874_v44, %v622_v43 }
 0x1cc   : > { %v872_v49 = vadd.f32 %v871_v47, %v868_v46 }
 0x1ce   : > { %v876_v50 = vadd.f32 %v875_v48, %v872_v49 }
 0x1d0   : > { %v877_v53 = vpack.c.bf16 %v876_v50, %v876_v50 }
 0x1d1   : > { %v860_v56 = vpop.permute.xlu1 %859 }
 0x1d2   : > { %v861_v58 = vmul.f32 %v860_v56, %v618_v52  ;;  %v896_v59 = vunpack.c.l.b16 %v877_v53 }
 0x1d4   : > { %v862_v61 = vadd.f32 %v861_v58, %v858_v57  ;;  %v897_v62 = vpack.c.b16 %v896_v59, %v896_v59 }
 0x1d6   : > { %v866_v63 = vadd.f32 %v865_v60, %v862_v61  ;;  %900 = vrot.lane.b32.xlu2 %v897_v62, %s8816_s24  ;;  %902 = vrot.lane.b32.xlu1 %v897_v62, %s8817_s29 }
 0x1d8   : > { %v867_v0 = vpack.c.bf16 %v866_v63, %v866_v63 }
 0x1da   : > { %v880_v1 = vunpack.c.l.b16 %v867_v0 }
 0x1dc   : > { %v881_v2 = vpack.c.b16 %v880_v1, %v880_v1 }
 0x1de   : > { %898 = vrot.lane.b32.xlu2 %v897_v62, %s8818_s17  ;;  %886 = vrot.lane.b32.xlu0 %v881_v2, %s8817_s29 }
 0x1df   : > { %882 = vrot.lane.b32.xlu1 %v881_v2, %s8818_s17 }
 0x1e6   : > { %884 = vrot.lane.b32.xlu2 %v881_v2, %s8816_s24 }
 0x230   : > { %v901_v4 = vpop.permute.xlu2 %900 }
 0x238   : > { %v899_v8 = vpop.permute.xlu2 %898 }
 0x239   : > { %v906_v9 = vsel %vm888_vm4, %v877_v53, %v899_v8 }
 0x23a   : > { %v932_v10 = vsel %vm927_vm5, %v906_v9, 0 }
 0x240   : > { %v885_v14 = vpop.permute.xlu2 %884 }
 0x248   : > { %v903_v5 = vpop.permute.xlu1 %902 }
 0x249   : > { %v909_v6 = vsel %vm888_vm4, %v901_v4, %v903_v5 }
 0x24a   : > { %v934_v7 = vsel %vm927_vm5, %v909_v6, 0 }
 0x24b   : > { %942 = vmatpush.bf16.xpose.msra.mxu3 %v934_v7 }
 0x250   : > { %v887_v13 = vpop.permute.xlu0 %886 }
 0x251   : > { %v883_v11 = vpop.permute.xlu1 %882  ;;  %v894_v15 = vsel %vm888_vm4, %v885_v14, %v887_v13 }
 0x252   : > { %v891_v12 = vsel %vm888_vm4, %v867_v0, %v883_v11 }
 0x253   : > { %943 = vmatpush.bf16.xpose.msra.mxu3 %v932_v10 }
 0x25a   : > { %5943 = vmatmul.msk.bf16.vlgmr.msra.gmra.mxu3 %vm927_vm5, %v891_v12 }
 0x26a   : > { %5944 = vmatmul.msk.bf16.gmra.mxu3 %vm927_vm5, %v894_v15 }
 0x2dd   : > { %v945_v17 = vpop.f32.mrf.mxu3 }
 0x2de   : > { %v946_v19 = vadd.f32 %v945_v17, %v623_v16  ;;  %v7829_v16 = vld [vmem:[#allocation5 + $0x38] sm:$0xff]  ;;  %v7828_v17 = vld [vmem:[#allocation5 + $0x30] sm:$0xff] }
 0x2df   : > { %1108 = vmatpush.bf16.msrb.mxu3 %v7829_v16  ;;  %v6185_v16 = vld [vmem:[#allocation7 + $0x198] sm:$0xf] }
 0x2e0   : > { %v955_v20 = vsel %vm927_vm5, %v946_v19, -inf }
 0x2e1   : > { %956 = vmax.xlane.f32.xlu1 %v955_v20  ;;  %v7826_v20 = vld [vmem:[#allocation5 + $0x20] sm:$0xff] }
 0x2e3   : > { %1109 = vmatpush.bf16.msrb.mxu3 %v7828_v17  ;;  %v7889_v17 = vld [vmem:[#allocation7 + $0x1d8] sm:$0xf0] }
 0x2e5   : > { %v947_v22 = vpop.f32.mrf.mxu3 }
 0x2e6   : > { %v948_v23 = vadd.f32 %v947_v22, %v624_v21  ;;  %v7825_v21 = vld [vmem:[#allocation5 + $0x18] sm:$0xff]  ;;  %v7824_v22 = vld [vmem:[#allocation5 + $0x10] sm:$0xff] }
 0x2e8   : > { %v958_v24 = vsel %vm927_vm5, %v948_v23, -inf }
 0x2e9   : > { %959 = vmax.xlane.f32.xlu2 %v958_v24  ;;  %v7822_v24 = vld [vmem:[#allocation5] sm:$0xff] }
 0x2ed   : > { %v950_v26 = vpop.f32.mrf.mxu3 }
 0x2ee   : > { %v951_v27 = vadd.f32 %v950_v26, %v625_v25 }
 0x2f0   : > { %v961_v28 = vsel %vm927_vm5, %v951_v27, -inf }
 0x2f1   : > { %962 = vmax.xlane.f32.xlu0 %v961_v28 }
 0x2f5   : > { %v952_v30 = vpop.f32.mrf.mxu3 }
 0x2f6   : > { %v953_v31 = vadd.f32 %v952_v30, %v626_v29 }
 0x2f8   : > { %v964_v32 = vsel %vm927_vm5, %v953_v31, -inf }
 0x2f9   : > { %965 = vmax.xlane.f32.xlu2 %v964_v32  ;;  %v6457_v32 = vld [vmem:[#allocation7 + $0x3b8] sm:$0xf] }
 0x311   : > { %915 = vrot.lane.b32.xlu2 %v912_v35, %s8816_s24 }
 0x354   : > { %v957_v36 = vpop.xlane.xlu1 %956 }
 0x355   : > { %v967_v38 = vsub.f32 %v946_v19, %v957_v36  ;;  %v7827_v19 = vld [vmem:[#allocation5 + $0x28] sm:$0xff]  ;;  %v6459_v36 = vld [vmem:[#allocation7 + $0x3fc] sm:$0xf0] }
 0x356   : > { %1110 = vmatpush.bf16.msrb.mxu3 %v7827_v19  ;;  %v7881_v19 = vld [vmem:[#allocation7 + $0x19c] sm:$0xf] }
 0x357   : > { %v971_v39 = vmul.f32 1.442695, %v967_v38  ;;  %v6465_v38 = vld [vmem:[#allocation7 + $0x3c0] sm:$0xf] }
 0x359   : > { %8417 = vpow2.f32 %v971_v39  ;;  %v7958_v39 = vld [vmem:[#allocation7 + $0x400] sm:$0xf0] }
 0x35a   : > { %1111 = vmatpush.bf16.msrb.mxu3 %v7826_v20 }
 0x35c   : > { %v960_v40 = vpop.xlane.xlu2 %959 }
 0x35d   : > { %v968_v41 = vsub.f32 %v948_v23, %v960_v40  ;;  %v7823_v23 = vld [vmem:[#allocation5 + $0x8] sm:$0xff]  ;;  %v6462_v40 = vor.u32 %v7949_v34, %v6459_v36  ;;  %v6125_v34 = vld [vmem:[#allocation7 + $0x118] sm:$0xf]  ;;  %v7865_v36 = vld [vmem:[#allocation7 + $0x11c] sm:$0xf] }
 0x35e   : > { %1112 = vmatpush.bf16.msrb.mxu3 %v7825_v21  ;;  %v6187_v21 = vld [vmem:[#allocation7 + $0x1dc] sm:$0xf0] }
 0x35f   : > { %v8418_v42 = vpop.eup %8417  ;;  %v973_v43 = vmul.f32 1.442695, %v968_v41  ;;  %v6466_v41 = vor.u32 %v7958_v39, %v6465_v38  ;;  %1992 = vmatpush.bf16.msrb.mxu2 %v6462_v40  ;;  %v6127_v38 = vld [vmem:[#allocation7 + $0x15c] sm:$0xf0] }
 0x360   : > { %v979_v44 = vsel %vm927_vm5, %v8418_v42, 0.0 }
 0x361   : > { %8419 = vpow2.f32 %v973_v43  ;;  %980 = vadd.xlane.f32.xlu1 %v979_v44  ;;  %v6467_v43 = vld [vmem:[#allocation7 + $0x404] sm:$0xf0]  ;;  %v6389_v44 = vld [vmem:[#allocation7 + $0x330] sm:$0xf] }
 0x362   : > { %1113 = vmatpush.bf16.msrb.mxu3 %v7824_v22  ;;  %v6193_v22 = vld [vmem:[#allocation7 + $0x1a0] sm:$0xf] }
 0x364   : > { %v963_v45 = vpop.xlane.xlu0 %962 }
 0x365   : > { %v969_v46 = vsub.f32 %v951_v27, %v963_v45 }
 0x366   : > { %1114 = vmatpush.bf16.msrb.mxu3 %v7823_v23  ;;  %v7890_v23 = vld [vmem:[#allocation7 + $0x1e0] sm:$0xf0] }
 0x367   : > { %v8420_v47 = vpop.eup %8419  ;;  %v975_v37 = vmul.f32 1.442695, %v969_v46  ;;  %v7940_v46 = vld [vmem:[#allocation7 + $0x370] sm:$0xf0] }
 0x368   : > { %v982_v48 = vsel %vm927_vm5, %v8420_v47, 0.0 }
 0x369   : > { %8421 = vpow2.f32 %v975_v37  ;;  %983 = vadd.xlane.f32.xlu0 %v982_v48  ;;  %v6391_v37 = vld [vmem:[#allocation7 + $0x374] sm:$0xf0]  ;;  %v6390_v48 = vor.u32 %v7940_v46, %v6389_v44  ;;  %v6049_v44 = vld [vmem:[#allocation7 + $0x88] sm:$0xf]  ;;  %v7847_v46 = vld [vmem:[#allocation7 + $0x8c] sm:$0xf] }
 0x36a   : > { %1115 = vmatpush.bf16.msrb.mxu3 %v7822_v24  ;;  %v7882_v24 = vld [vmem:[#allocation7 + $0x1a4] sm:$0xf] }
 0x36c   : > { %v966_v51 = vpop.xlane.xlu2 %965 }
 0x36d   : > { %v970_v52 = vsub.f32 %v953_v31, %v966_v51  ;;  %v7941_v51 = vld [vmem:[#allocation7 + $0x378] sm:$0xf0] }
 0x36f   : > { %v8422_v49 = vpop.eup %8421  ;;  %v977_v53 = vmul.f32 1.442695, %v970_v52  ;;  %v7933_v52 = vld [vmem:[#allocation7 + $0x33c] sm:$0xf] }
 0x370   : > { %v985_v50 = vsel %vm927_vm5, %v8422_v49, 0.0 }
 0x371   : > { %986 = vadd.xlane.f32.xlu2 %v985_v50  ;;  %8423 = vpow2.f32 %v977_v53  ;;  %v6397_v50 = vld [vmem:[#allocation7 + $0x338] sm:$0xf] }
 0x372   : > { %v6398_v53 = vor.u32 %v7941_v51, %v6397_v50  ;;  %v7848_v51 = vld [vmem:[#allocation7 + $0x94] sm:$0xf] }
 0x374   : > { %v916_v59 = vpop.permute.xlu2 %915 }
 0x377   : > { %v8424_v54 = vpop.eup %8423 }
 0x378   : > { %v988_v55 = vsel %vm927_vm5, %v8424_v54, 0.0 }
 0x37a   : > { %917 = vrot.lane.b32.xlu1 %v912_v35, %s8817_s29 }
 0x37d   : > { %913 = vrot.lane.b32.xlu0 %v912_v35, %s8818_s17 }
 0x3a7   : > { %989 = vadd.xlane.f32.xlu0 %v988_v55  ;;  %v6321_v55 = vld [vmem:[#allocation7 + $0x2a8] sm:$0xf] }
 0x3d4   : > { %v981_v57 = vpop.xlane.xlu1 %980 }
 0x3dc   : > { %v984_v56 = vpop.xlane.xlu0 %983 }
 0x3dd   : > { %8425 = vrcp.f32 %v984_v56  ;;  %v7923_v56 = vld [vmem:[#allocation7 + $0x2e8] sm:$0xf0] }
 0x3de   : > { %8427 = vrcp.f32 %v981_v57 }
 0x3e3   : > { %v8426_v58 = vpop.eup %8425 }
 0x3e4   : > { %v8428_v62 = vpop.eup %8427  ;;  %v996_v63 = vmul.f32 %v8426_v58, %v8420_v47  ;;  %v987_v5 = vpop.xlane.xlu2 %986  ;;  %v7932_v47 = vld [vmem:[#allocation7 + $0x334] sm:$0xf]  ;;  %v7915_v58 = vld [vmem:[#allocation7 + $0x2ac] sm:$0xf] }
 0x3e5   : > { %v995_v2 = vmul.f32 %v8428_v62, %v8418_v42  ;;  %8429 = vrcp.f32 %v987_v5  ;;  %v7950_v42 = vld [vmem:[#allocation7 + $0x3c4] sm:$0xf]  ;;  %v7924_v62 = vld [vmem:[#allocation7 + $0x2f0] sm:$0xf0] }
 0x3e6   : > { %v6470_v45 = vor.u32 %v7950_v42, %v6467_v43  ;;  %v7906_v5 = vld [vmem:[#allocation7 + $0x260] sm:$0xf0] }
 0x3e7   : > { %v999_v4 = vpack.c.bf16 %v996_v63, %v995_v2  ;;  %v7916_v63 = vld [vmem:[#allocation7 + $0x2b4] sm:$0xf] }
 0x3e8   : > { %2018 = vmatpush.bf16.msra.mxu3 %v6470_v45  ;;  %v7855_v45 = vld [vmem:[#allocation7 + $0xc8] sm:$0xf0] }
 0x3eb   : > { %v8430_v7 = vpop.eup %8429 }
 0x3ec   : > { %v918_v60 = vpop.permute.xlu1 %917  ;;  %v997_v9 = vmul.f32 %v8430_v7, %v8422_v49  ;;  %v6394_v49 = vor.u32 %v7932_v47, %v6391_v37  ;;  %v6130_v47 = vor.u32 %v7865_v36, %v6127_v38  ;;  %v6051_v37 = vld [vmem:[#allocation7 + $0xcc] sm:$0xf0]  ;;  %v7925_v36 = vld [vmem:[#allocation7 + $0x2f8] sm:$0xf0] }
 0x3ed   : > { %v925_v61 = vsel %vm888_vm4, %v916_v59, %v918_v60  ;;  %v6323_v59 = vld [vmem:[#allocation7 + $0x2ec] sm:$0xf0]  ;;  %v7917_v38 = vld [vmem:[#allocation7 + $0x2bc] sm:$0xf] }
 0x3ee   : > { %1013 = vmatpush.bf16.msrb.mxu0 %v925_v61  ;;  %v6329_v60 = vld [vmem:[#allocation7 + $0x2b0] sm:$0xf]  ;;  %v6322_v61 = vor.u32 %v7923_v56, %v6321_v55  ;;  %1993 = vmatpush.bf16.msrb.mxu2 %v6394_v49  ;;  %v7856_v49 = vld [vmem:[#allocation7 + $0xd0] sm:$0xf0]  ;;  %v6054_v56 = vor.u32 %v7847_v46, %v6051_v37  ;;  %v6347_v46 = vld [vmem:[#allocation7 + $0x304] sm:$0xf0] }
 0x3ef   : > { %v914_v0 = vpop.permute.xlu0 %913  ;;  %v6330_v2 = vor.u32 %v7924_v62, %v6329_v60  ;;  %v5983_v60 = vld [vmem:[#allocation7 + $0x44] sm:$0xf0]  ;;  %v6269_v37 = vld [vmem:[#allocation7 + $0x230] sm:$0xf] }
 0x3f0   : > { %v921_v1 = vsel %vm888_vm4, %v878_v33, %v914_v0  ;;  %v7957_v33 = vld [vmem:[#allocation7 + $0x3f8] sm:$0xf0]  ;;  %v6331_v0 = vld [vmem:[#allocation7 + $0x2f4] sm:$0xf0]  ;;  %v5989_v62 = vld [vmem:[#allocation7 + $0x8] sm:$0xf] }
 0x3f1   : > { %v6458_v35 = vor.u32 %v7957_v33, %v6457_v32  ;;  %v6334_v7 = vor.u32 %v7916_v63, %v6331_v0  ;;  %v6119_v33 = vld [vmem:[#allocation7 + $0x154] sm:$0xf0]  ;;  %v7839_v63 = vld [vmem:[#allocation7 + $0x48] sm:$0xf0] }
 0x3f2   : > { %1014 = vmatpush.bf16.msrb.mxu0 %v921_v1  ;;  %v6326_v1 = vor.u32 %v7915_v58, %v6323_v59  ;;  %v7838_v58 = vld [vmem:[#allocation7 + $0x40] sm:$0xf0]  ;;  %v7831_v0 = vld [vmem:[#allocation7 + $0xc] sm:$0xf] }
 0x3f3   : > { %1979 = vmatpush.bf16.msrb.mxu1 %v6458_v35  ;;  %v7873_v35 = vld [vmem:[#allocation7 + $0x158] sm:$0xf0]  ;;  %v7830_v59 = vld [vmem:[#allocation7 + $0x4] sm:$0xf] }
 0x3f4   : > { %1994 = vmatpush.bf16.msrb.mxu2 %v6326_v1  ;;  %v6126_v43 = vor.u32 %v7873_v35, %v6125_v34  ;;  %v6337_v35 = vld [vmem:[#allocation7 + $0x2b8] sm:$0xf] }
 0x3f5   : > { %5945 = vmatmul.msk.bf16.vlgmr.msrb.gmra.mxu0 %vm927_vm5, %v999_v4  ;;  %v6253_v4 = vld [vmem:[#allocation7 + $0x220] sm:$0xf] }
 0x3f6   : > { %2005 = vmatpush.bf16.msra.mxu0 %v6466_v41 }
 0x3f7   : > { %1980 = vmatpush.bf16.msrb.mxu1 %v6390_v48  ;;  %v6057_v48 = vld [vmem:[#allocation7 + $0x90] sm:$0xf] }
 0x3fa   : > { %2006 = vmatpush.bf16.msra.mxu0 %v6398_v53  ;;  %v6050_v53 = vor.u32 %v7855_v45, %v6049_v44  ;;  %v7918_v45 = vld [vmem:[#allocation7 + $0x2c4] sm:$0xf] }
 0x3fb   : > { %1981 = vmatpush.bf16.msrb.mxu1 %v6322_v61 }
 0x3fe   : > { %2007 = vmatpush.bf16.msra.mxu0 %v6330_v2  ;;  %v5991_v2 = vld [vmem:[#allocation7 + $0x4c] sm:$0xf0] }
 0x41a   : > { %v990_v6 = vpop.xlane.xlu0 %989 }
 0x41b   : > { %8431 = vrcp.f32 %v990_v6  ;;  %v7898_v6 = vld [vmem:[#allocation7 + $0x224] sm:$0xf] }
 0x421   : > { %v8432_v8 = vpop.eup %8431 }
 0x422   : > { %v998_v10 = vmul.f32 %v8432_v8, %v8424_v54  ;;  %v6399_v54 = vld [vmem:[#allocation7 + $0x37c] sm:$0xf0]  ;;  %v6255_v8 = vld [vmem:[#allocation7 + $0x264] sm:$0xf0] }
 0x423   : > { %v6402_v57 = vor.u32 %v7933_v52, %v6399_v54  ;;  %v6059_v52 = vld [vmem:[#allocation7 + $0xd4] sm:$0xf0]  ;;  %v5981_v54 = vld [vmem:[#allocation7] sm:$0xf] }
 0x424   : > { %v1000_v11 = vpack.c.bf16 %v998_v10, %v997_v9  ;;  %v6261_v9 = vld [vmem:[#allocation7 + $0x228] sm:$0xf]  ;;  %v7907_v10 = vld [vmem:[#allocation7 + $0x268] sm:$0xf0]  ;;  %v6062_v61 = vor.u32 %v7848_v51, %v6059_v52  ;;  %v6271_v51 = vld [vmem:[#allocation7 + $0x274] sm:$0xf0] }
 0x425   : > { %2019 = vmatpush.bf16.msra.mxu3 %v6402_v57  ;;  %v6058_v57 = vor.u32 %v7856_v49, %v6057_v48  ;;  %v7908_v48 = vld [vmem:[#allocation7 + $0x270] sm:$0xf0]  ;;  %v6277_v52 = vld [vmem:[#allocation7 + $0x238] sm:$0xf] }
 0x426   : > { %5946 = vmatmul.msk.bf16.gmra.mxu0 %vm927_vm5, %v1000_v11  ;;  %v7899_v11 = vld [vmem:[#allocation7 + $0x22c] sm:$0xf]  ;;  %v7900_v49 = vld [vmem:[#allocation7 + $0x234] sm:$0xf] }
 0x429   : > { %2020 = vmatpush.bf16.msra.mxu3 %v6334_v7  ;;  %v5982_v7 = vor.u32 %v7838_v58, %v5981_v54  ;;  %v6274_v54 = vor.u32 %v7900_v49, %v6271_v51 }
 0x472   : > { %v1016_v12 = vpop.f32.mrf.mxu0 }
 0x47a   : > { %v1018_v13 = vpop.f32.mrf.mxu0 }
 0x47b   : > { %1027 = vrot.lane.b32.xlu1 %v1018_v13, %s8817_s29  ;;  %v6254_v13 = vor.u32 %v7906_v5, %v6253_v4  ;;  %v6473_v4 = vld [vmem:[#allocation7 + $0x3c8] sm:$0xf]  ;;  %v7959_v5 = vld [vmem:[#allocation7 + $0x408] sm:$0xf0] }
 0x47d   : > { %1982 = vmatpush.bf16.msrb.mxu1 %v6254_v13  ;;  %v7952_v13 = vld [vmem:[#allocation7 + $0x3d4] sm:$0xf] }
 0x4a3   : > { %v1021_v14 = vpop.f32.mrf.mxu0 }
 0x4a4   : > { %1031 = vrot.lane.b32.xlu1 %v1021_v14, %s8816_s24  ;;  %v6258_v14 = vor.u32 %v7898_v6, %v6255_v8  ;;  %v6475_v8 = vld [vmem:[#allocation7 + $0x40c] sm:$0xf0] }
 0x4a6   : > { %1995 = vmatpush.bf16.msrb.mxu2 %v6258_v14  ;;  %v6483_v14 = vld [vmem:[#allocation7 + $0x414] sm:$0xf0] }
 0x4ab   : > { %v1023_v15 = vpop.f32.mrf.mxu0 }
 0x4ac   : > { %1035 = vrot.lane.b32.xlu1 %v1023_v15, %s8818_s17  ;;  %v6262_v15 = vor.u32 %v7907_v10, %v6261_v9  ;;  %v6481_v9 = vld [vmem:[#allocation7 + $0x3d0] sm:$0xf] }
 0x4ae   : > { %2008 = vmatpush.bf16.msra.mxu0 %v6262_v15  ;;  %v5990_v15 = vor.u32 %v7839_v63, %v5989_v62  ;;  %v6203_v63 = vld [vmem:[#allocation7 + $0x1ec] sm:$0xf0] }
 0x4ed   : > { %v1028_v25 = vpop.permute.xlu1 %1027 }
 0x4ee   : > { %v1038_v27 = vsel %vm927_vm5, %v1016_v12, %v1028_v25  ;;  %v6263_v12 = vld [vmem:[#allocation7 + $0x26c] sm:$0xf0]  ;;  %v6195_v25 = vld [vmem:[#allocation7 + $0x1e4] sm:$0xf0] }
 0x4ef   : > { %v6266_v20 = vor.u32 %v7899_v11, %v6263_v12  ;;  %v6198_v32 = vor.u32 %v7882_v24, %v6195_v25  ;;  %v5986_v11 = vor.u32 %v7830_v59, %v5983_v60  ;;  %v7960_v12 = vld [vmem:[#allocation7 + $0x410] sm:$0xf0]  ;;  %v7942_v24 = vld [vmem:[#allocation7 + $0x380] sm:$0xf0]  ;;  %v6201_v59 = vld [vmem:[#allocation7 + $0x1a8] sm:$0xf] }
 0x4f0   : > { %v7934_v25 = vld [vmem:[#allocation7 + $0x344] sm:$0xf]  ;;  %v7891_v60 = vld [vmem:[#allocation7 + $0x1e8] sm:$0xf0] }
 0x4f1   : > { %2021 = vmatpush.bf16.msra.mxu3 %v6266_v20  ;;  %v6202_v62 = vor.u32 %v7891_v60, %v6201_v59  ;;  %v6489_v59 = vld [vmem:[#allocation7 + $0x3d8] sm:$0xf]  ;;  %v7961_v60 = vld [vmem:[#allocation7 + $0x418] sm:$0xf0] }
 0x4f5   : > { %2022 = vmatpush.bf16.msra.mxu3 %v6198_v32  ;;  %v7935_v32 = vld [vmem:[#allocation7 + $0x34c] sm:$0xf] }
 0x4f9   : > { %2023 = vmatpush.bf16.msra.mxu3 %v6130_v47  ;;  %v6350_v47 = vor.u32 %v7918_v45, %v6347_v46 }
 0x4fd   : > { %2024 = vmatpush.bf16.msra.mxu3 %v6062_v61  ;;  %v7883_v61 = vld [vmem:[#allocation7 + $0x1ac] sm:$0xf] }
 0x516   : > { %v1032_v26 = vpop.permute.xlu1 %1031 }
 0x517   : > { %v1040_v28 = vsel %vm1039_vm6, %v1038_v27, %v1032_v26  ;;  %v6186_v26 = vor.u32 %v7889_v17, %v6185_v16  ;;  %v6190_v27 = vor.u32 %v7881_v19, %v6187_v21  ;;  %v5994_v16 = vor.u32 %v7831_v0, %v5991_v2  ;;  %v6209_v0 = vld [vmem:[#allocation7 + $0x1b0] sm:$0xf] }
 0x518   : > { %v6474_v19 = vor.u32 %v7959_v5, %v6473_v4  ;;  %v6482_v21 = vor.u32 %v7960_v12, %v6481_v9  ;;  %v6206_v2 = vor.u32 %v7883_v61, %v6203_v63  ;;  %v7884_v5 = vld [vmem:[#allocation7 + $0x1b4] sm:$0xf]  ;;  %v7866_v9 = vld [vmem:[#allocation7 + $0x124] sm:$0xf]  ;;  %v6135_v12 = vld [vmem:[#allocation7 + $0x164] sm:$0xf0] }
 0x519   : > { %1983 = vmatpush.bf16.msrb.mxu1 %v6186_v26  ;;  %1996 = vmatpush.bf16.msrb.mxu2 %v6190_v27  ;;  %v6407_v27 = vld [vmem:[#allocation7 + $0x384] sm:$0xf0]  ;;  %v7953_v61 = vld [vmem:[#allocation7 + $0x3dc] sm:$0xf]  ;;  %v6497_v63 = vld [vmem:[#allocation7 + $0x3e0] sm:$0xf] }
 0x51a   : > { %2025 = vmatpush.bf16.msra.mxu3 %v5994_v16 }
 0x51e   : > { %v1036_v29 = vpop.permute.xlu1 %1035 }
 0x51f   : > { %v1042_v30 = vsel %vm1041_vm7, %v1040_v28, %v1036_v29  ;;  %v6194_v28 = vor.u32 %v7890_v23, %v6193_v22  ;;  %v6117_v29 = vld [vmem:[#allocation7 + $0x110] sm:$0xf]  ;;  %v6486_v22 = vor.u32 %v7952_v13, %v6483_v14  ;;  %v6405_v23 = vld [vmem:[#allocation7 + $0x340] sm:$0xf]  ;;  %v6141_v13 = vld [vmem:[#allocation7 + $0x128] sm:$0xf] }
 0x520   : > { %v1043_v31 = vpack.c.bf16 %v1042_v30, %v1042_v30  ;;  %v7872_v30 = vld [vmem:[#allocation7 + $0x150] sm:$0xf0]  ;;  %v6406_v26 = vor.u32 %v7942_v24, %v6405_v23  ;;  %v7875_v14 = vld [vmem:[#allocation7 + $0x168] sm:$0xf0]  ;;  %v7849_v23 = vld [vmem:[#allocation7 + $0x9c] sm:$0xf] }
 0x521   : > { %v6118_v40 = vor.u32 %v7872_v30, %v6117_v29  ;;  %2009 = vmatpush.bf16.msra.mxu0 %v6194_v28  ;;  %v6413_v28 = vld [vmem:[#allocation7 + $0x348] sm:$0xf]  ;;  %v7943_v29 = vld [vmem:[#allocation7 + $0x388] sm:$0xf0]  ;;  %v6410_v30 = vor.u32 %v7934_v25, %v6407_v27  ;;  %v6142_v16 = vor.u32 %v7875_v14, %v6141_v13  ;;  %v6067_v25 = vld [vmem:[#allocation7 + $0xdc] sm:$0xf0] }
 0x522   : > { %1116 = vmatmul.bf16.vlgmr.msrb.gmra.mxu3 %v1043_v31  ;;  %v7864_v31 = vld [vmem:[#allocation7 + $0x114] sm:$0xf]  ;;  %v7858_v27 = vld [vmem:[#allocation7 + $0xe0] sm:$0xf0]  ;;  %v6423_v13 = vld [vmem:[#allocation7 + $0x394] sm:$0xf0] }
 0x523   : > { %v6122_v42 = vor.u32 %v7864_v31, %v6119_v33  ;;  %1984 = vmatpush.bf16.msrb.mxu1 %v6118_v40  ;;  %2070 = vmatpush.bf16.msrb.mxu3 %v6486_v22  ;;  %v6414_v31 = vor.u32 %v7943_v29, %v6413_v28  ;;  %v6415_v33 = vld [vmem:[#allocation7 + $0x38c] sm:$0xf0]  ;;  %v6339_v40 = vld [vmem:[#allocation7 + $0x2fc] sm:$0xf0]  ;;  %v7857_v22 = vld [vmem:[#allocation7 + $0xd8] sm:$0xf0]  ;;  %v6070_v28 = vor.u32 %v7849_v23, %v6067_v25 }
 0x524   : > { %v6418_v34 = vor.u32 %v7935_v32, %v6415_v33  ;;  %v5997_v33 = vld [vmem:[#allocation7 + $0x10] sm:$0xf]  ;;  %v6429_v14 = vld [vmem:[#allocation7 + $0x358] sm:$0xf]  ;;  %v7919_v25 = vld [vmem:[#allocation7 + $0x2cc] sm:$0xf] }
 0x525   : > { %1997 = vmatpush.bf16.msrb.mxu2 %v6122_v42  ;;  %2010 = vmatpush.bf16.msra.mxu0 %v6126_v43  ;;  %v7926_v42 = vld [vmem:[#allocation7 + $0x300] sm:$0xf0]  ;;  %v6342_v43 = vor.u32 %v7917_v38, %v6339_v40  ;;  %v5999_v38 = vld [vmem:[#allocation7 + $0x54] sm:$0xf0]  ;;  %v7841_v40 = vld [vmem:[#allocation7 + $0x58] sm:$0xf0] }
 0x527   : > { %1985 = vmatpush.bf16.msrb.mxu1 %v6050_v53  ;;  %2071 = vmatpush.bf16.msrb.mxu3 %v6418_v34  ;;  %v7909_v53 = vld [vmem:[#allocation7 + $0x278] sm:$0xf0]  ;;  %v7840_v34 = vld [vmem:[#allocation7 + $0x50] sm:$0xf0] }
 0x529   : > { %1998 = vmatpush.bf16.msrb.mxu2 %v6054_v56  ;;  %2011 = vmatpush.bf16.msra.mxu0 %v6058_v57  ;;  %v7901_v56 = vld [vmem:[#allocation7 + $0x23c] sm:$0xf]  ;;  %v6279_v57 = vld [vmem:[#allocation7 + $0x27c] sm:$0xf0] }
 0x52a   : > { %v6282_v58 = vor.u32 %v7901_v56, %v6279_v57 }
 0x52b   : > { %1986 = vmatpush.bf16.msrb.mxu1 %v5982_v7  ;;  %2072 = vmatpush.bf16.msrb.mxu3 %v6350_v47 }
 0x52d   : > { %1999 = vmatpush.bf16.msrb.mxu2 %v5986_v11  ;;  %2012 = vmatpush.bf16.msra.mxu0 %v5990_v15  ;;  %v6138_v15 = vor.u32 %v7866_v9, %v6135_v12  ;;  %v7936_v12 = vld [vmem:[#allocation7 + $0x354] sm:$0xf] }
 0x52f   : > { %2031 = vmatpush.bf16.msra.mxu1 %v6474_v19  ;;  %2073 = vmatpush.bf16.msrb.mxu3 %v6282_v58  ;;  %v6143_v19 = vld [vmem:[#allocation7 + $0x16c] sm:$0xf0] }
 0x531   : > { %2057 = vmatpush.bf16.msrb.mxu0 %v6482_v21  ;;  %v6065_v21 = vld [vmem:[#allocation7 + $0x98] sm:$0xf] }
 0x532   : > { %v6066_v24 = vor.u32 %v7857_v22, %v6065_v21  ;;  %v6353_v21 = vld [vmem:[#allocation7 + $0x2c8] sm:$0xf]  ;;  %v7927_v22 = vld [vmem:[#allocation7 + $0x308] sm:$0xf0] }
 0x533   : > { %2032 = vmatpush.bf16.msra.mxu1 %v6406_v26  ;;  %v6073_v26 = vld [vmem:[#allocation7 + $0xa0] sm:$0xf] }
 0x534   : > { %v6074_v29 = vor.u32 %v7858_v27, %v6073_v26  ;;  %v6355_v26 = vld [vmem:[#allocation7 + $0x30c] sm:$0xf0] }
 0x535   : > { %2058 = vmatpush.bf16.msrb.mxu0 %v6414_v31  ;;  %v6075_v31 = vld [vmem:[#allocation7 + $0xe4] sm:$0xf0]  ;;  %v6361_v27 = vld [vmem:[#allocation7 + $0x2d0] sm:$0xf] }
 0x5a5   : > { %v1117_v39 = vpop.f32.mrf.mxu3 }
 0x5a6   : > { %v1121_v41 = vpack.c.bf16 %v1117_v39, %v1117_v39  ;;  %v6338_v39 = vor.u32 %v7925_v36, %v6337_v35  ;;  %v7832_v35 = vld [vmem:[#allocation7 + $0x14] sm:$0xf]  ;;  %v5998_v36 = vor.u32 %v7840_v34, %v5997_v33  ;;  %v6285_v33 = vld [vmem:[#allocation7 + $0x240] sm:$0xf]  ;;  %v7910_v34 = vld [vmem:[#allocation7 + $0x280] sm:$0xf0] }
 0x5a8   : > { %v1122_v50 = vunpack.c.l.bf16 %v1121_v41  ;;  %v6345_v41 = vld [vmem:[#allocation7 + $0x2c0] sm:$0xf]  ;;  %2033 = vmatpush.bf16.msra.mxu1 %v6338_v39  ;;  %v6005_v39 = vld [vmem:[#allocation7 + $0x18] sm:$0xf] }
 0x5a9   : > { %v6346_v44 = vor.u32 %v7926_v42, %v6345_v41  ;;  %v6002_v41 = vor.u32 %v7832_v35, %v5999_v38  ;;  %v6006_v42 = vor.u32 %v7841_v40, %v6005_v39  ;;  %v7902_v38 = vld [vmem:[#allocation7 + $0x244] sm:$0xf]  ;;  %v6287_v39 = vld [vmem:[#allocation7 + $0x284] sm:$0xf0] }
 0x5aa   : > { %v1123_v55 = vadd.f32 %v1122_v50, %v9018_v3  ;;  %v7951_v3 = vld [vmem:[#allocation7 + $0x3cc] sm:$0xf]  ;;  %v6270_v50 = vor.u32 %v7908_v48, %v6269_v37  ;;  %v6293_v40 = vld [vmem:[#allocation7 + $0x248] sm:$0xf] }
 0x5ab   : > { %v6478_v20 = vor.u32 %v7951_v3, %v6475_v8  ;;  %2059 = vmatpush.bf16.msrb.mxu0 %v6346_v44  ;;  %v6133_v3 = vld [vmem:[#allocation7 + $0x120] sm:$0xf]  ;;  %v7874_v8 = vld [vmem:[#allocation7 + $0x160] sm:$0xf0] }
 0x5ac   : > { %v1124_v1 = vpack.c.bf16 %v1123_v55, %v1123_v55  ;;  %v6278_v55 = vor.u32 %v7909_v53, %v6277_v52  ;;  %2034 = vmatpush.bf16.msra.mxu1 %v6270_v50  ;;  %v6134_v11 = vor.u32 %v7874_v8, %v6133_v3  ;;  %v6007_v44 = vld [vmem:[#allocation7 + $0x5c] sm:$0xf0]  ;;  %v6421_v3 = vld [vmem:[#allocation7 + $0x350] sm:$0xf]  ;;  %v7944_v8 = vld [vmem:[#allocation7 + $0x390] sm:$0xf0] }
 0x5ad   : > { %v1119_v6 = vpop.f32.mrf.mxu3  ;;  %2044 = vmatpush.bf16.msra.mxu2 %v6478_v20  ;;  %v1125_v50 = vld [vmem:[%s9983_s18] sm:$0x1] }
 0x5ae   : > { %v9103_v10 = vunpack.c.l.bf16 %v1124_v1  ;;  %v7892_v1 = vld [vmem:[#allocation7 + $0x1f0] sm:$0xf0]  ;;  %v6211_v6 = vld [vmem:[#allocation7 + $0x1f4] sm:$0xf0]  ;;  %v1143_v53 = vunpack.c.l.bf16 %v1125_v50  ;;  %v6219_v50 = vld [vmem:[#allocation7 + $0x1fc] sm:$0xf0] }
 0x5af   : > { %2060 = vmatpush.bf16.msrb.mxu0 %v6278_v55  ;;  %v6210_v4 = vor.u32 %v7892_v1, %v6209_v0  ;;  %v6214_v7 = vor.u32 %v7884_v5, %v6211_v6  ;;  %v7962_v1 = vld [vmem:[#allocation7 + $0x420] sm:$0xf0]  ;;  %v6490_v6 = vor.u32 %v7961_v60, %v6489_v59 }
 0x5b0   : > { %v1127_v17 = vmul.f32 %v9103_v10, %v9103_v10  ;;  %2035 = vmatpush.bf16.msra.mxu1 %v6202_v62  ;;  %v1144_v56 = vperm.slane %v1143_v53, 0  ;;  %v6491_v62 = vld [vmem:[#allocation7 + $0x41c] sm:$0xf0]  ;;  %v6498_v9 = vor.u32 %v7962_v1, %v6497_v63  ;;  %v7886_v53 = vld [vmem:[#allocation7 + $0x1c4] sm:$0xf] }
 0x5b1   : > { %2045 = vmatpush.bf16.msra.mxu2 %v6410_v30  ;;  %2074 = vmatpush.bf16.msrb.mxu3 %v6214_v7  ;;  %v7850_v30 = vld [vmem:[#allocation7 + $0xa4] sm:$0xf]  ;;  %v6494_v7 = vor.u32 %v7953_v61, %v6491_v62  ;;  %v7868_v61 = vld [vmem:[#allocation7 + $0x134] sm:$0xf]  ;;  %v6151_v62 = vld [vmem:[#allocation7 + $0x174] sm:$0xf0] }
 0x5b2   : > { %1128 = vadd.xlane.f32.xlu1 %v1127_v17  ;;  %v7867_v17 = vld [vmem:[#allocation7 + $0x12c] sm:$0xf]  ;;  %v6078_v32 = vor.u32 %v7850_v30, %v6075_v31  ;;  %v6363_v30 = vld [vmem:[#allocation7 + $0x314] sm:$0xf0]  ;;  %v6354_v31 = vor.u32 %v7927_v22, %v6353_v21  ;;  %v7869_v1 = vld [vmem:[#allocation7 + $0x13c] sm:$0xf] }
 0x5b3   : > { %2061 = vmatpush.bf16.msrb.mxu0 %v6210_v4  ;;  %v6146_v20 = vor.u32 %v7867_v17, %v6143_v19  ;;  %v6499_v4 = vld [vmem:[#allocation7 + $0x424] sm:$0xf0]  ;;  %v6431_v17 = vld [vmem:[#allocation7 + $0x39c] sm:$0xf0]  ;;  %v6422_v19 = vor.u32 %v7944_v8, %v6421_v3  ;;  %v6157_v63 = vld [vmem:[#allocation7 + $0x138] sm:$0xf] }
 0x5b4   : > { %2036 = vmatpush.bf16.msra.mxu1 %v6134_v11  ;;  %v7859_v3 = vld [vmem:[#allocation7 + $0xe8] sm:$0xf0]  ;;  %v7842_v21 = vld [vmem:[#allocation7 + $0x60] sm:$0xf0] }
 0x5b5   : > { %2046 = vmatpush.bf16.msra.mxu2 %v6342_v43  ;;  %2075 = vmatpush.bf16.msrb.mxu3 %v6146_v20  ;;  %v7833_v43 = vld [vmem:[#allocation7 + $0x1c] sm:$0xf]  ;;  %v6426_v20 = vor.u32 %v7936_v12, %v6423_v13  ;;  %v6083_v12 = vld [vmem:[#allocation7 + $0xec] sm:$0xf0]  ;;  %v7834_v22 = vld [vmem:[#allocation7 + $0x24] sm:$0xf] }
 0x5b6   : > { %v6010_v45 = vor.u32 %v7833_v43, %v6007_v44  ;;  %v6295_v43 = vld [vmem:[#allocation7 + $0x28c] sm:$0xf0]  ;;  %v6286_v44 = vor.u32 %v7910_v34, %v6285_v33 }
 0x5b7   : > { %2062 = vmatpush.bf16.msrb.mxu0 %v6142_v16  ;;  %v7937_v16 = vld [vmem:[#allocation7 + $0x35c] sm:$0xf]  ;;  %v6089_v13 = vld [vmem:[#allocation7 + $0xb0] sm:$0xf] }
 0x5b8   : > { %2037 = vmatpush.bf16.msra.mxu1 %v6066_v24  ;;  %v6434_v24 = vor.u32 %v7937_v16, %v6431_v17  ;;  %v6091_v16 = vld [vmem:[#allocation7 + $0xf4] sm:$0xf0]  ;;  %v6013_v17 = vld [vmem:[#allocation7 + $0x20] sm:$0xf]  ;;  %v6507_v33 = vld [vmem:[#allocation7 + $0x42c] sm:$0xf0] }
 0x5b9   : > { %2047 = vmatpush.bf16.msra.mxu2 %v6274_v54  ;;  %2076 = vmatpush.bf16.msrb.mxu3 %v6078_v32  ;;  %v6358_v32 = vor.u32 %v7919_v25, %v6355_v26  ;;  %v6021_v26 = vld [vmem:[#allocation7 + $0x28] sm:$0xf]  ;;  %v6513_v34 = vld [vmem:[#allocation7 + $0x3f0] sm:$0xf] }
 0x5bb   : > { %2063 = vmatpush.bf16.msrb.mxu0 %v6074_v29  ;;  %v7920_v29 = vld [vmem:[#allocation7 + $0x2d4] sm:$0xf] }
 0x5bc   : > { %2038 = vmatpush.bf16.msra.mxu1 %v5998_v36  ;;  %v6366_v36 = vor.u32 %v7920_v29, %v6363_v30  ;;  %v6023_v29 = vld [vmem:[#allocation7 + $0x6c] sm:$0xf0]  ;;  %v6505_v30 = vld [vmem:[#allocation7 + $0x3e8] sm:$0xf] }
 0x5bd   : > { %2048 = vmatpush.bf16.msra.mxu2 %v6206_v2  ;;  %2077 = vmatpush.bf16.msrb.mxu3 %v6010_v45  ;;  %v7954_v2 = vld [vmem:[#allocation7 + $0x3e4] sm:$0xf]  ;;  %v6290_v45 = vor.u32 %v7902_v38, %v6287_v39  ;;  %v7964_v38 = vld [vmem:[#allocation7 + $0x430] sm:$0xf0] }
 0x5be   : > { %v6502_v11 = vor.u32 %v7954_v2, %v6499_v4  ;;  %v6159_v2 = vld [vmem:[#allocation7 + $0x17c] sm:$0xf0]  ;;  %v7956_v39 = vld [vmem:[#allocation7 + $0x3f4] sm:$0xf] }
 0x5bf   : > { %2064 = vmatpush.bf16.msrb.mxu0 %v6006_v42  ;;  %v7903_v42 = vld [vmem:[#allocation7 + $0x24c] sm:$0xf] }
 0x5c1   : > { %2049 = vmatpush.bf16.msra.mxu2 %v6138_v15  ;;  %v7945_v15 = vld [vmem:[#allocation7 + $0x398] sm:$0xf0] }
 0x5c2   : > { %v6430_v23 = vor.u32 %v7945_v15, %v6429_v14  ;;  %v7860_v14 = vld [vmem:[#allocation7 + $0xf0] sm:$0xf0] }
 0x5c3   : > { %v7852_v15 = vld [vmem:[#allocation7 + $0xb4] sm:$0xf] }
 0x5c4   : > { %v6094_v25 = vor.u32 %v7852_v15, %v6091_v16  ;;  %v6311_v15 = vld [vmem:[#allocation7 + $0x29c] sm:$0xf0] }
 0x5c5   : > { %2050 = vmatpush.bf16.msra.mxu2 %v6070_v28  ;;  %v7928_v28 = vld [vmem:[#allocation7 + $0x310] sm:$0xf0] }
 0x5c6   : > { %v6362_v35 = vor.u32 %v7928_v28, %v6361_v27  ;;  %v7843_v27 = vld [vmem:[#allocation7 + $0x68] sm:$0xf0] }
 0x5c7   : > { %v7835_v28 = vld [vmem:[#allocation7 + $0x2c] sm:$0xf] }
 0x5c9   : > { %2051 = vmatpush.bf16.msra.mxu2 %v6002_v41  ;;  %v7911_v41 = vld [vmem:[#allocation7 + $0x288] sm:$0xf0] }
 0x625   : > { %v1129_v46 = vpop.xlane.xlu1 %1128 }
 0x626   : > { %v1130_v47 = vmul.f32 %v1129_v46, %v9022_v18  ;;  %v6217_v46 = vld [vmem:[#allocation7 + $0x1b8] sm:$0xf] }
 0x628   : > { %v1131_v37 = vadd.f32 1e-06, %v1130_v47  ;;  %v7893_v47 = vld [vmem:[#allocation7 + $0x1f8] sm:$0xf0] }
 0x62a   : > { %8433 = vrsqrt.f32 %v1131_v37  ;;  %vm1138_vm9 = vweird.f32 %v1131_v37 }
 0x630   : > { %v8434_v48 = vpop.eup %8433 }
 0x631   : > { %v1133_v49 = vmul.f32 %v8434_v48, %v1131_v37  ;;  %vm1139_vm8 = vweird.f32 %v8434_v48  ;;  %v6294_v37 = vor.u32 %v7911_v41, %v6293_v40  ;;  %v6515_v40 = vld [vmem:[#allocation7 + $0x434] sm:$0xf0]  ;;  %v6022_v41 = vor.u32 %v7843_v27, %v6021_v26  ;;  %v7896_v26 = vld [vmem:[#allocation7 + $0x210] sm:$0xf0] }
 0x632   : > { %vm1140_vm10 = vmor %vm1138_vm9, %vm1139_vm8  ;;  %v7888_v27 = vld [vmem:[#allocation7 + $0x1d4] sm:$0xf] }
 0x633   : > { %v1134_v51 = vmul.f32 %v8434_v48, %v1133_v49  ;;  %v7885_v49 = vld [vmem:[#allocation7 + $0x1bc] sm:$0xf] }
 0x635   : > { %v1135_v52 = vmul.f32 0.5, %v1134_v51  ;;  %v6225_v51 = vld [vmem:[#allocation7 + $0x1c0] sm:$0xf] }
 0x637   : > { %v1136_v54 = vsub.f32 1.5, %v1135_v52  ;;  %v7894_v52 = vld [vmem:[#allocation7 + $0x200] sm:$0xf0] }
 0x638   : > { %v6226_v59 = vor.u32 %v7894_v52, %v6225_v51  ;;  %v7947_v51 = vld [vmem:[#allocation7 + $0x3a8] sm:$0xf0] }
 0x639   : > { %v1137_v55 = vmul.f32 %v8434_v48, %v1136_v54  ;;  %v6227_v54 = vld [vmem:[#allocation7 + $0x204] sm:$0xf0]  ;;  %v7939_v52 = vld [vmem:[#allocation7 + $0x36c] sm:$0xf] }
 0x63a   : > { %v6230_v60 = vor.u32 %v7886_v53, %v6227_v54  ;;  %v6447_v53 = vld [vmem:[#allocation7 + $0x3ac] sm:$0xf0] }
 0x63b   : > { %v1141_v57 = vsel %vm1140_vm10, %v8434_v48, %v1137_v55  ;;  %v6298_v48 = vor.u32 %v7903_v42, %v6295_v43  ;;  %v6218_v55 = vor.u32 %v7893_v47, %v6217_v46  ;;  %v6026_v42 = vor.u32 %v7835_v28, %v6023_v29  ;;  %v7946_v46 = vld [vmem:[#allocation7 + $0x3a0] sm:$0xf0]  ;;  %v6243_v28 = vld [vmem:[#allocation7 + $0x214] sm:$0xf0] }
 0x63c   : > { %v1142_v58 = vmul.f32 %v1141_v57, %v9103_v10  ;;  %v6149_v57 = vld [vmem:[#allocation7 + $0x130] sm:$0xf]  ;;  %v6514_v47 = vor.u32 %v7964_v38, %v6513_v34  ;;  %v6246_v34 = vor.u32 %v7888_v27, %v6243_v28  ;;  %v6173_v38 = vld [vmem:[#allocation7 + $0x148] sm:$0xf]  ;;  %v7863_v27 = vld [vmem:[#allocation7 + $0x108] sm:$0xf0] }
 0x63e   : > { %v1145_v0 = vmul.f32 %v1144_v56, %v1142_v58  ;;  %v6222_v56 = vor.u32 %v7885_v49, %v6219_v50  ;;  %v7876_v58 = vld [vmem:[#allocation7 + $0x170] sm:$0xf0]  ;;  %v6439_v49 = vld [vmem:[#allocation7 + $0x3a4] sm:$0xf0] }
 0x63f   : > { %v6150_v4 = vor.u32 %v7876_v58, %v6149_v57  ;;  %v6445_v50 = vld [vmem:[#allocation7 + $0x368] sm:$0xf]  ;;  %v7929_v57 = vld [vmem:[#allocation7 + $0x318] sm:$0xf0] }
 0x640   : > { %v9112_v5 = vpack.c.bf16 %v1145_v0, %v1145_v0  ;;  %v7877_v0 = vld [vmem:[#allocation7 + $0x178] sm:$0xf0]  ;;  %v6446_v58 = vor.u32 %v7947_v51, %v6445_v50  ;;  %v7862_v50 = vld [vmem:[#allocation7 + $0x100] sm:$0xf0] }
 0x641   : > { %v6158_v8 = vor.u32 %v7877_v0, %v6157_v63  ;;  %v7930_v63 = vld [vmem:[#allocation7 + $0x320] sm:$0xf0] }
 0x642   : > { %1987 = vmatmul.bf16.vlgmr.msrb.gmra.mxu1 %v9112_v5  ;;  %2000 = vmatmul.bf16.vlgmr.msrb.gmra.mxu2 %v9112_v5  ;;  %v7922_v0 = vld [vmem:[#allocation7 + $0x2e4] sm:$0xf] }
 0x643   : > { %2013 = vmatmul.bf16.vlgmr.msra.gmra.mxu0 %v9112_v5  ;;  %2026 = vmatmul.bf16.vlgmr.msra.gmra.mxu3 %v9112_v5  ;;  %v7854_v51 = vld [vmem:[#allocation7 + $0xc4] sm:$0xf] }
 0x644   : > { %2083 = vmatpush.bf16.msrb.mxu1 %v6490_v6  ;;  %2096 = vmatpush.bf16.msrb.mxu2 %v6494_v7  ;;  %v6154_v6 = vor.u32 %v7868_v61, %v6151_v62  ;;  %v6081_v7 = vld [vmem:[#allocation7 + $0xa8] sm:$0xf]  ;;  %v6371_v61 = vld [vmem:[#allocation7 + $0x31c] sm:$0xf0] }
 0x645   : > { %2109 = vmatpush.bf16.msra.mxu0 %v6498_v9  ;;  %2122 = vmatpush.bf16.msra.mxu3 %v6502_v11  ;;  %v6162_v9 = vor.u32 %v7869_v1, %v6159_v2  ;;  %v7851_v11 = vld [vmem:[#allocation7 + $0xac] sm:$0xf]  ;;  %v6377_v62 = vld [vmem:[#allocation7 + $0x2e0] sm:$0xf]  ;;  %v6379_v1 = vld [vmem:[#allocation7 + $0x324] sm:$0xf0] }
 0x648   : > { %2084 = vmatpush.bf16.msrb.mxu1 %v6422_v19  ;;  %2097 = vmatpush.bf16.msrb.mxu2 %v6426_v20  ;;  %v6082_v19 = vor.u32 %v7859_v3, %v6081_v7  ;;  %v6086_v20 = vor.u32 %v7851_v11, %v6083_v12  ;;  %v7912_v7 = vld [vmem:[#allocation7 + $0x290] sm:$0xf0]  ;;  %v6378_v3 = vor.u32 %v7930_v63, %v6377_v62  ;;  %v6303_v11 = vld [vmem:[#allocation7 + $0x294] sm:$0xf0]  ;;  %v7845_v62 = vld [vmem:[#allocation7 + $0x78] sm:$0xf0] }
 0x649   : > { %2110 = vmatpush.bf16.msra.mxu0 %v6430_v23  ;;  %2123 = vmatpush.bf16.msra.mxu3 %v6434_v24  ;;  %v6015_v23 = vld [vmem:[#allocation7 + $0x64] sm:$0xf0]  ;;  %v6090_v24 = vor.u32 %v7860_v14, %v6089_v13  ;;  %v6309_v12 = vld [vmem:[#allocation7 + $0x258] sm:$0xf]  ;;  %v7913_v13 = vld [vmem:[#allocation7 + $0x298] sm:$0xf0] }
 0x64a   : > { %v7905_v14 = vld [vmem:[#allocation7 + $0x25c] sm:$0xf] }
 0x64b   : > { %v7837_v63 = vld [vmem:[#allocation7 + $0x3c] sm:$0xf] }
 0x64c   : > { %2085 = vmatpush.bf16.msrb.mxu1 %v6354_v31  ;;  %2098 = vmatpush.bf16.msrb.mxu2 %v6358_v32  ;;  %v7963_v31 = vld [vmem:[#allocation7 + $0x428] sm:$0xf0] }
 0x64d   : > { %2111 = vmatpush.bf16.msra.mxu0 %v6362_v35  ;;  %2124 = vmatpush.bf16.msra.mxu3 %v6366_v36  ;;  %v7955_v32 = vld [vmem:[#allocation7 + $0x3ec] sm:$0xf]  ;;  %v6014_v35 = vor.u32 %v7842_v21, %v6013_v17  ;;  %v6018_v36 = vor.u32 %v7834_v22, %v6015_v23  ;;  %v6506_v43 = vor.u32 %v7963_v31, %v6505_v30  ;;  %v6165_v31 = vld [vmem:[#allocation7 + $0x140] sm:$0xf] }
 0x64e   : > { %v6310_v21 = vor.u32 %v7913_v13, %v6309_v12  ;;  %v6314_v22 = vor.u32 %v7905_v14, %v6311_v15  ;;  %v7887_v23 = vld [vmem:[#allocation7 + $0x1cc] sm:$0xf]  ;;  %v6385_v13 = vld [vmem:[#allocation7 + $0x2e8] sm:$0xf] }
 0x64f   : > { %v7931_v14 = vld [vmem:[#allocation7 + $0x328] sm:$0xf0] }
 0x650   : > { %2086 = vmatpush.bf16.msrb.mxu1 %v6286_v44  ;;  %2099 = vmatpush.bf16.msrb.mxu2 %v6290_v45  ;;  %v6510_v44 = vor.u32 %v7955_v32, %v6507_v33  ;;  %v6437_v45 = vld [vmem:[#allocation7 + $0x360] sm:$0xf]  ;;  %v7878_v32 = vld [vmem:[#allocation7 + $0x180] sm:$0xf0]  ;;  %v6386_v15 = vor.u32 %v7931_v14, %v6385_v13 }
 0x651   : > { %2112 = vmatpush.bf16.msra.mxu0 %v6294_v37  ;;  %2125 = vmatpush.bf16.msra.mxu3 %v6298_v48  ;;  %v6518_v37 = vor.u32 %v7956_v39, %v6515_v40  ;;  %v7938_v48 = vld [vmem:[#allocation7 + $0x364] sm:$0xf]  ;;  %v6438_v54 = vor.u32 %v7946_v46, %v6437_v45  ;;  %v7879_v39 = vld [vmem:[#allocation7 + $0x188] sm:$0xf0]  ;;  %v7861_v45 = vld [vmem:[#allocation7 + $0xf8] sm:$0xf0] }
 0x652   : > { %2039 = vmatmul.bf16.vlgmr.msra.gmra.mxu1 %v9112_v5  ;;  %2052 = vmatmul.bf16.vlgmr.msra.gmra.mxu2 %v9112_v5  ;;  %v7871_v40 = vld [vmem:[#allocation7 + $0x14c] sm:$0xf]  ;;  %v6174_v46 = vor.u32 %v7879_v39, %v6173_v38 }
 0x653   : > { %2065 = vmatmul.bf16.vlgmr.msrb.gmra.mxu0 %v9112_v5  ;;  %2078 = vmatmul.bf16.vlgmr.msrb.gmra.mxu3 %v9112_v5 }
 0x654   : > { %2087 = vmatpush.bf16.msrb.mxu1 %v6218_v55  ;;  %2100 = vmatpush.bf16.msrb.mxu2 %v6222_v56  ;;  %v6442_v55 = vor.u32 %v7938_v48, %v6439_v49  ;;  %v6369_v56 = vld [vmem:[#allocation7 + $0x2d8] sm:$0xf]  ;;  %v6099_v48 = vld [vmem:[#allocation7 + $0xfc] sm:$0xf0] }
 0x655   : > { %2113 = vmatpush.bf16.msra.mxu0 %v6226_v59  ;;  %2126 = vmatpush.bf16.msra.mxu3 %v6230_v60  ;;  %v6450_v59 = vor.u32 %v7939_v52, %v6447_v53  ;;  %v7921_v60 = vld [vmem:[#allocation7 + $0x2dc] sm:$0xf]  ;;  %v6370_v2 = vor.u32 %v7929_v57, %v6369_v56  ;;  %v6105_v49 = vld [vmem:[#allocation7 + $0xc0] sm:$0xf]  ;;  %v6107_v52 = vld [vmem:[#allocation7 + $0x104] sm:$0xf0] }
 0x656   : > { %v7844_v56 = vld [vmem:[#allocation7 + $0x70] sm:$0xf0]  ;;  %v6106_v57 = vor.u32 %v7862_v50, %v6105_v49 }
 0x658   : > { %2088 = vmatpush.bf16.msrb.mxu1 %v6150_v4  ;;  %2101 = vmatpush.bf16.msrb.mxu2 %v6154_v6  ;;  %v6374_v4 = vor.u32 %v7921_v60, %v6371_v61  ;;  %v6301_v6 = vld [vmem:[#allocation7 + $0x250] sm:$0xf]  ;;  %v6031_v60 = vld [vmem:[#allocation7 + $0x74] sm:$0xf0] }
 0x659   : > { %2114 = vmatpush.bf16.msra.mxu0 %v6158_v8  ;;  %2127 = vmatpush.bf16.msra.mxu3 %v6162_v9  ;;  %v6382_v8 = vor.u32 %v7922_v0, %v6379_v1  ;;  %v7904_v9 = vld [vmem:[#allocation7 + $0x254] sm:$0xf]  ;;  %v6302_v16 = vor.u32 %v7912_v7, %v6301_v6  ;;  %v6037_v61 = vld [vmem:[#allocation7 + $0x38] sm:$0xf]  ;;  %v6039_v0 = vld [vmem:[#allocation7 + $0x7c] sm:$0xf0] }
 0x65a   : > { %v6306_v17 = vor.u32 %v7904_v9, %v6303_v11  ;;  %v6521_v1 = vld [vmem:[#allocation7 + $0x3f8] sm:$0xf]  ;;  %v6038_v7 = vor.u32 %v7845_v62, %v6037_v61  ;;  %v6453_v9 = vld [vmem:[#allocation7 + $0x370] sm:$0xf]  ;;  %v7948_v11 = vld [vmem:[#allocation7 + $0x3b0] sm:$0xf0] }
 0x65b   : > { %v6454_v12 = vor.u32 %v7948_v11, %v6453_v9 }
 0x65c   : > { %2089 = vmatpush.bf16.msrb.mxu1 %v6082_v19  ;;  %2102 = vmatpush.bf16.msrb.mxu2 %v6086_v20  ;;  %v6233_v19 = vld [vmem:[#allocation7 + $0x1c8] sm:$0xf]  ;;  %v7895_v20 = vld [vmem:[#allocation7 + $0x208] sm:$0xf0] }
 0x65d   : > { %2115 = vmatpush.bf16.msra.mxu0 %v6090_v24  ;;  %2128 = vmatpush.bf16.msra.mxu3 %v6094_v25  ;;  %v6235_v24 = vld [vmem:[#allocation7 + $0x20c] sm:$0xf0]  ;;  %v6234_v29 = vor.u32 %v7895_v20, %v6233_v19  ;;  %v6249_v20 = vld [vmem:[#allocation7 + $0x1d8] sm:$0xf] }
 0x65e   : > { %v6241_v25 = vld [vmem:[#allocation7 + $0x1d0] sm:$0xf]  ;;  %v6238_v30 = vor.u32 %v7887_v23, %v6235_v24  ;;  %v7880_v24 = vld [vmem:[#allocation7 + $0x190] sm:$0xf0] }
 0x65f   : > { %v6242_v33 = vor.u32 %v7896_v26, %v6241_v25  ;;  %v6181_v23 = vld [vmem:[#allocation7 + $0x150] sm:$0xf]  ;;  %v6113_v26 = vld [vmem:[#allocation7 + $0xc8] sm:$0xf] }
 0x660   : > { %2090 = vmatpush.bf16.msrb.mxu1 %v6014_v35  ;;  %2103 = vmatpush.bf16.msrb.mxu2 %v6018_v36  ;;  %v7870_v35 = vld [vmem:[#allocation7 + $0x144] sm:$0xf]  ;;  %v6167_v36 = vld [vmem:[#allocation7 + $0x184] sm:$0xf0]  ;;  %v6182_v25 = vor.u32 %v7880_v24, %v6181_v23  ;;  %v6114_v28 = vor.u32 %v7863_v27, %v6113_v26  ;;  %v7972_v23 = vld [vmem:[#allocation8 + $0x30] sm:$0xff] }
 0x661   : > { %2116 = vmatpush.bf16.msra.mxu0 %v6022_v41  ;;  %2129 = vmatpush.bf16.msra.mxu3 %v6026_v42  ;;  %v6175_v41 = vld [vmem:[#allocation7 + $0x18c] sm:$0xf0]  ;;  %v6166_v42 = vor.u32 %v7878_v32, %v6165_v31  ;;  %v7971_v27 = vld [vmem:[#allocation8 + $0x28] sm:$0xff] }
 0x662   : > { %v7980_v24 = vld [vmem:[#allocation8 + $0x70] sm:$0xff] }
 0x663   : > { %2091 = vmatmul.bf16.vlgmr.msrb.gmra.mxu1 %v9112_v5  ;;  %2104 = vmatmul.bf16.vlgmr.msrb.gmra.mxu2 %v9112_v5  ;;  %v7996_v26 = vld [vmem:[#allocation8 + $0xf0] sm:$0xff] }
 0x664   : > { %2135 = vmatpush.bf16.msra.mxu1 %v6506_v43  ;;  %2148 = vmatpush.bf16.msra.mxu2 %v6510_v44  ;;  %v6170_v43 = vor.u32 %v7870_v35, %v6167_v36  ;;  %v6097_v44 = vld [vmem:[#allocation7 + $0xb8] sm:$0xf] }
 0x665   : > { %2161 = vmatpush.bf16.msrb.mxu0 %v6514_v47  ;;  %2174 = vmatpush.bf16.msrb.mxu3 %v6518_v37  ;;  %v6178_v47 = vor.u32 %v7871_v40, %v6175_v41  ;;  %v7853_v37 = vld [vmem:[#allocation7 + $0xbc] sm:$0xf]  ;;  %v6098_v53 = vor.u32 %v7861_v45, %v6097_v44 }
 0x666   : > { %2117 = vmatmul.bf16.vlgmr.msra.gmra.mxu0 %v9112_v5  ;;  %2130 = vmatmul.bf16.vlgmr.msra.gmra.mxu3 %v9112_v5 }
 0x668   : > { %2136 = vmatpush.bf16.msra.mxu1 %v6438_v54  ;;  %2149 = vmatpush.bf16.msra.mxu2 %v6442_v55  ;;  %v6102_v54 = vor.u32 %v7853_v37, %v6099_v48  ;;  %v6029_v55 = vld [vmem:[#allocation7 + $0x30] sm:$0xf] }
 0x669   : > { %2162 = vmatpush.bf16.msrb.mxu0 %v6446_v58  ;;  %2175 = vmatpush.bf16.msrb.mxu3 %v6450_v59  ;;  %v6110_v58 = vor.u32 %v7854_v51, %v6107_v52  ;;  %v7836_v59 = vld [vmem:[#allocation7 + $0x34] sm:$0xf] }
 0x66a   : > { %v6034_v6 = vor.u32 %v7836_v59, %v6031_v60 }
 0x66c   : > { %2137 = vmatpush.bf16.msra.mxu1 %v6370_v2  ;;  %2150 = vmatpush.bf16.msra.mxu2 %v6374_v4  ;;  %v7965_v2 = vld [vmem:[#allocation7 + $0x438] sm:$0xf0]  ;;  %v6030_v4 = vor.u32 %v7844_v56, %v6029_v55 }
 0x66d   : > { %2163 = vmatpush.bf16.msrb.mxu0 %v6378_v3  ;;  %2176 = vmatpush.bf16.msrb.mxu3 %v6382_v8  ;;  %v6042_v3 = vor.u32 %v7837_v63, %v6039_v0  ;;  %v6522_v8 = vor.u32 %v7965_v2, %v6521_v1  ;;  %v627_v63 = vlaneseq }
 0x66f   : > { %v9163_v0 = vand.u32 127, %v627_v63 }
 0x670   : > { %2138 = vmatpush.bf16.msra.mxu1 %v6302_v16  ;;  %2151 = vmatpush.bf16.msra.mxu2 %v6306_v17  ;;  %v6317_v16 = vld [vmem:[#allocation7 + $0x260] sm:$0xf]  ;;  %v7914_v17 = vld [vmem:[#allocation7 + $0x2a0] sm:$0xf0] }
 0x671   : > { %2164 = vmatpush.bf16.msrb.mxu0 %v6310_v21  ;;  %2177 = vmatpush.bf16.msrb.mxu3 %v6314_v22  ;;  %v6318_v19 = vor.u32 %v7914_v17, %v6317_v16  ;;  %v7897_v21 = vld [vmem:[#allocation7 + $0x218] sm:$0xf0]  ;;  %vm629_vm11 = vcmp.lt.s32.totalorder %v9163_v0, 4 }
 0x672   : > { %v6250_v22 = vor.u32 %v7897_v21, %v6249_v20  ;;  %v7981_v20 = vld [vmem:[#allocation8 + $0x78] sm:$0xff] }
 0x673   : > { %v7989_v21 = vld [vmem:[#allocation8 + $0xb8] sm:$0xff] }
 0x674   : > { %2139 = vmatpush.bf16.msra.mxu1 %v6234_v29  ;;  %2152 = vmatpush.bf16.msra.mxu2 %v6238_v30  ;;  %v6045_v29 = vld [vmem:[#allocation7 + $0x40] sm:$0xf]  ;;  %v7846_v30 = vld [vmem:[#allocation7 + $0x80] sm:$0xf0] }
 0x675   : > { %2165 = vmatpush.bf16.msrb.mxu0 %v6242_v33  ;;  %2178 = vmatpush.bf16.msrb.mxu3 %v6246_v34  ;;  %v6046_v31 = vor.u32 %v7846_v30, %v6045_v29  ;;  %v7987_v29 = vld [vmem:[#allocation8 + $0xa8] sm:$0xff] }
 0x676   : > { %v7995_v30 = vld [vmem:[#allocation8 + $0xe8] sm:$0xff] }
 0x678   : > { %2140 = vmatpush.bf16.msra.mxu1 %v6166_v42  ;;  %2153 = vmatpush.bf16.msra.mxu2 %v6170_v43 }
 0x679   : > { %2166 = vmatpush.bf16.msrb.mxu0 %v6174_v46  ;;  %2179 = vmatpush.bf16.msrb.mxu3 %v6178_v47 }
 0x67c   : > { %2141 = vmatpush.bf16.msra.mxu1 %v6098_v53  ;;  %2154 = vmatpush.bf16.msra.mxu2 %v6102_v54 }
 0x67d   : > { %2167 = vmatpush.bf16.msrb.mxu0 %v6106_v57  ;;  %2180 = vmatpush.bf16.msrb.mxu3 %v6110_v58 }
 0x680   : > { %2142 = vmatpush.bf16.msra.mxu1 %v6030_v4  ;;  %2155 = vmatpush.bf16.msra.mxu2 %v6034_v6 }
 0x681   : > { %2168 = vmatpush.bf16.msrb.mxu0 %v6038_v7  ;;  %2181 = vmatpush.bf16.msrb.mxu3 %v6042_v3 }
 0x683   : > { %2143 = vmatmul.bf16.vlgmr.msra.gmra.mxu1 %v9112_v5  ;;  %2156 = vmatmul.bf16.vlgmr.msra.gmra.mxu2 %v9112_v5 }
 0x684   : > { %2187 = vmatpush.bf16.msrb.mxu1 %v6522_v8  ;;  %2169 = vmatmul.bf16.vlgmr.msrb.gmra.mxu0 %v9112_v5 }
 0x685   : > { %2182 = vmatmul.bf16.vlgmr.msrb.gmra.mxu3 %v9112_v5  ;;  %2996 = vmatpush.bf16.msra.mxu0 %v7981_v20 }
 0x686   : > { %3009 = vmatpush.bf16.msra.mxu3 %v7989_v21 }
 0x688   : > { %2188 = vmatpush.bf16.msrb.mxu1 %v6454_v12 }
 0x689   : > { %2997 = vmatpush.bf16.msra.mxu0 %v7980_v24 }
 0x68c   : > { %2189 = vmatpush.bf16.msrb.mxu1 %v6386_v15 }
 0x690   : > { %2190 = vmatpush.bf16.msrb.mxu1 %v6318_v19  ;;  %v7973_v19 = vld [vmem:[#allocation8 + $0x38] sm:$0xff] }
 0x691   : > { %2983 = vmatpush.bf16.msrb.mxu2 %v7973_v19 }
 0x694   : > { %2191 = vmatpush.bf16.msrb.mxu1 %v6250_v22  ;;  %v7997_v22 = vld [vmem:[#allocation8 + $0xf8] sm:$0xff] }
 0x695   : > { %2984 = vmatpush.bf16.msrb.mxu2 %v7972_v23 }
 0x698   : > { %2192 = vmatpush.bf16.msrb.mxu1 %v6182_v25  ;;  %v7988_v25 = vld [vmem:[#allocation8 + $0xb0] sm:$0xff] }
 0x699   : > { %3010 = vmatpush.bf16.msra.mxu3 %v7988_v25  ;;  %2985 = vmatpush.bf16.msrb.mxu2 %v7971_v27 }
 0x69c   : > { %2193 = vmatpush.bf16.msrb.mxu1 %v6114_v28  ;;  %v7979_v28 = vld [vmem:[#allocation8 + $0x68] sm:$0xff] }
 0x69d   : > { %2998 = vmatpush.bf16.msra.mxu0 %v7979_v28  ;;  %3011 = vmatpush.bf16.msra.mxu3 %v7987_v29 }
 0x6a0   : > { %2194 = vmatpush.bf16.msrb.mxu1 %v6046_v31  ;;  %v7970_v31 = vld [vmem:[#allocation8 + $0x20] sm:$0xff] }
 0x6a1   : > { %2986 = vmatpush.bf16.msrb.mxu2 %v7970_v31 }
 0x6a3   : > { %2195 = vmatmul.bf16.vlgmr.msrb.gmra.mxu1 %v9112_v5 }
 0x6a4   : > { %3022 = vmatpush.bf16.msra.mxu1 %v7997_v22 }
 0x6a8   : > { %3023 = vmatpush.bf16.msra.mxu1 %v7996_v26 }
 0x6ac   : > { %3024 = vmatpush.bf16.msra.mxu1 %v7995_v30 }
 0x6bf   : > { %v9131_v32 = vpop.f32.mrf.mxu1 }
 0x6c0   : > { %v9133_v33 = vpop.f32.mrf.mxu0 }
 0x6c5   : > { %v9135_v34 = vpop.f32.mrf.mxu2 }
 0x6c6   : > { %v9137_v35 = vpop.f32.mrf.mxu3  ;;  %v6524_v63 = vmul.f32 -1.442695, %v9135_v34 }
 0x6c7   : > { %v1990_v36 = vpop.f32.mrf.mxu1 }
 0x6c8   : > { %v2016_v38 = vpop.f32.mrf.mxu0  ;;  %v7978_v36 = vld [vmem:[#allocation8 + $0x60] sm:$0xff] }
 0x6c9   : > { %v7986_v38 = vld [vmem:[#allocation8 + $0xa0] sm:$0xff]  ;;  %2999 = vmatpush.bf16.msra.mxu0 %v7978_v36 }
 0x6ca   : > { %3012 = vmatpush.bf16.msra.mxu3 %v7986_v38 }
 0x6cd   : > { %v2003_v39 = vpop.f32.mrf.mxu2 }
 0x6ce   : > { %v2029_v40 = vpop.f32.mrf.mxu3  ;;  %v7994_v39 = vld [vmem:[#allocation8 + $0xe0] sm:$0xff] }
 0x6cf   : > { %v9139_v41 = vpop.f32.mrf.mxu1  ;;  %v7969_v40 = vld [vmem:[#allocation8 + $0x18] sm:$0xff]  ;;  %3025 = vmatpush.bf16.msra.mxu1 %v7994_v39 }
 0x6d0   : > { %v9141_v42 = vpop.f32.mrf.mxu0  ;;  %2987 = vmatpush.bf16.msrb.mxu2 %v7969_v40 }
 0x6d5   : > { %v9143_v43 = vpop.f32.mrf.mxu2 }
 0x6d6   : > { %v9145_v44 = vpop.f32.mrf.mxu3 }
 0x6d7   : > { %v2042_v5 = vpop.f32.mrf.mxu1 }
 0x6d8   : > { %v2068_v45 = vpop.f32.mrf.mxu0  ;;  %v7977_v5 = vld [vmem:[#allocation8 + $0x58] sm:$0xff] }
 0x6d9   : > { %v7985_v45 = vld [vmem:[#allocation8 + $0x98] sm:$0xff]  ;;  %3000 = vmatpush.bf16.msra.mxu0 %v7977_v5 }
 0x6da   : > { %3013 = vmatpush.bf16.msra.mxu3 %v7985_v45 }
 0x6dd   : > { %v2055_v46 = vpop.f32.mrf.mxu2 }
 0x6de   : > { %v2081_v47 = vpop.f32.mrf.mxu3  ;;  %v7993_v46 = vld [vmem:[#allocation8 + $0xd8] sm:$0xff] }
 0x6df   : > { %v7968_v47 = vld [vmem:[#allocation8 + $0x10] sm:$0xff]  ;;  %3026 = vmatpush.bf16.msra.mxu1 %v7993_v46 }
 0x6e0   : > { %v9147_v37 = vpop.f32.mrf.mxu1  ;;  %2988 = vmatpush.bf16.msrb.mxu2 %v7968_v47 }
 0x6e3   : > { %v9149_v48 = vpop.f32.mrf.mxu0 }
 0x6e6   : > { %v9151_v49 = vpop.f32.mrf.mxu2 }
 0x6e8   : > { %v2094_v51 = vpop.f32.mrf.mxu1 }
 0x6e9   : > { %v9153_v50 = vpop.f32.mrf.mxu3  ;;  %v7976_v51 = vld [vmem:[#allocation8 + $0x50] sm:$0xff] }
 0x6ea   : > { %3001 = vmatpush.bf16.msra.mxu0 %v7976_v51  ;;  %v7966_v51 = vld [vmem:[#allocation8] sm:$0xff] }
 0x6eb   : > { %v2120_v52 = vpop.f32.mrf.mxu0 }
 0x6ec   : > { %v7984_v52 = vld [vmem:[#allocation8 + $0x90] sm:$0xff] }
 0x6ed   : > { %3014 = vmatpush.bf16.msra.mxu3 %v7984_v52  ;;  %v7974_v52 = vld [vmem:[#allocation8 + $0x40] sm:$0xff] }
 0x6ee   : > { %v2107_v53 = vpop.f32.mrf.mxu2 }
 0x6ef   : > { %v7992_v53 = vld [vmem:[#allocation8 + $0xd0] sm:$0xff] }
 0x6f0   : > { %3027 = vmatpush.bf16.msra.mxu1 %v7992_v53  ;;  %v7982_v53 = vld [vmem:[#allocation8 + $0x80] sm:$0xff] }
 0x6f1   : > { %v2133_v54 = vpop.f32.mrf.mxu3 }
 0x6f2   : > { %v7967_v54 = vld [vmem:[#allocation8 + $0x8] sm:$0xff] }
 0x6f3   : > { %2989 = vmatpush.bf16.msrb.mxu2 %v7967_v54 }
 0x6f7   : > { %2990 = vmatpush.bf16.msrb.mxu2 %v7966_v51  ;;  %v8011_v51 = vld [vmem:[#allocation8 + $0x168] sm:$0xff] }
 0x700   : > { %v9155_v55 = vpop.f32.mrf.mxu1 }
 0x701   : > { %v9157_v56 = vpop.f32.mrf.mxu0  ;;  %v6529_v19 = vmul.f32 -1.442695, %v9155_v55 }
 0x706   : > { %v9159_v57 = vpop.f32.mrf.mxu2 }
 0x707   : > { %v6530_v21 = vmul.f32 -1.442695, %v9159_v57 }
 0x708   : > { %v9161_v58 = vpop.f32.mrf.mxu3  ;;  %v2146_v59 = vpop.f32.mrf.mxu1 }
 0x709   : > { %v2172_v60 = vpop.f32.mrf.mxu0  ;;  %v7975_v59 = vld [vmem:[#allocation8 + $0x48] sm:$0xff] }
 0x70a   : > { %v7983_v60 = vld [vmem:[#allocation8 + $0x88] sm:$0xff]  ;;  %3002 = vmatpush.bf16.msra.mxu0 %v7975_v59 }
 0x70b   : > { %3015 = vmatpush.bf16.msra.mxu3 %v7983_v60  ;;  %v7990_v60 = vld [vmem:[#allocation8 + $0xc0] sm:$0xff] }
 0x70e   : > { %v2159_v61 = vpop.f32.mrf.mxu2  ;;  %3003 = vmatpush.bf16.msra.mxu0 %v7974_v52 }
 0x70f   : > { %v7991_v61 = vld [vmem:[#allocation8 + $0xc8] sm:$0xff]  ;;  %3016 = vmatpush.bf16.msra.mxu3 %v7982_v53 }
 0x710   : > { %v2185_v62 = vpop.f32.mrf.mxu3  ;;  %3028 = vmatpush.bf16.msra.mxu1 %v7991_v61  ;;  %v8005_v61 = vld [vmem:[#allocation8 + $0x138] sm:$0xff]  ;;  %v8019_v53 = vld [vmem:[#allocation8 + $0x1a8] sm:$0xff] }
 0x711   : > { %v6523_v62 = vmul.f32 -1.442695, %v9131_v32  ;;  %3035 = vmatpush.bf16.msra.mxu2 %v8005_v61 }
 0x713   : > { %8435 = vpow2.f32 %v6523_v62  ;;  %v8013_v62 = vld [vmem:[#allocation8 + $0x178] sm:$0xff] }
 0x714   : > { %8437 = vpow2.f32 %v6524_v63  ;;  %3029 = vmatpush.bf16.msra.mxu1 %v7990_v60  ;;  %3048 = vmatpush.bf16.msrb.mxu0 %v8013_v62  ;;  %v8027_v60 = vld [vmem:[#allocation8 + $0x1e8] sm:$0xff] }
 0x720   : > { %v2196_v1 = vpop.f32.mrf.mxu1 }
 0x721   : > { %v2200_v2 = vsel %vm629_vm11, %v2196_v1, -inf  ;;  %v6525_v1 = vmul.f32 -1.442695, %v9139_v41 }
 0x722   : > { %2201 = vmax.xlane.f32.xlu2 %v2200_v2 }
 0x723   : > { %8439 = vpow2.f32 %v6525_v1  ;;  %v8021_v1 = vld [vmem:[#allocation8 + $0x1b8] sm:$0xff] }
 0x724   : > { %3061 = vmatpush.bf16.msrb.mxu3 %v8021_v1 }
 0x728   : > { %v2198_v4 = vpop.f32.mrf.mxu1 }
 0x795   : > { %v9168_v6 = vpop.xlane.xlu2 %2201 }
 0x796   : > { %vm2203_vm12 = vcmp.eq.f32.partialorder %v2200_v2, %v9168_v6 }
 0x797   : > { %v2204_v7 = vsel %vm2203_vm12, %v9163_v0, 128 }
 0x798   : > { %v2205_v3 = vcvt.s32.f32 %v2204_v7 }
 0x79a   : > { %2206 = vmin.xlane.f32.xlu0 %v2205_v3  ;;  %v6526_v3 = vmul.f32 -1.442695, %v9143_v43 }
 0x80d   : > { %v2207_v8 = vpop.xlane.xlu0 %2206 }
 0x80e   : > { %vm8279_vm13 = vcmp.lt.s32.totalorder %v2207_v8, 0  ;;  %v8280_v9 = vceil.f32 %v2207_v8  ;;  %v8281_v11 = vfloor.f32 %v2207_v8 }
 0x810   : > { %v8282_v12 = vsel %vm8279_vm13, %v8280_v9, %v8281_v11 }
 0x811   : > { %v9172_v13 = vcvt.f32.s32 %v8282_v12 }
 0x813   : > { %vm2209_vm14 = vcmp.eq.s32.totalorder %v9163_v0, %v9172_v13 }
 0x814   : > { %v2210_v14 = vsel %vm2209_vm14, -inf, %v2200_v2  ;;  %v8436_v2 = vpop.eup %8435 }
 0x815   : > { %2211 = vmax.xlane.f32.xlu2 %v2210_v14  ;;  %v9185_v7 = vadd.f32 1.0, %v8436_v2  ;;  %v8438_v9 = vpop.eup %8437  ;;  %v8029_v2 = vld [vmem:[#allocation8 + $0x1f8] sm:$0xff] }
 0x816   : > { %v8440_v11 = vpop.eup %8439  ;;  %v9189_v12 = vadd.f32 1.0, %v8438_v9  ;;  %3074 = vmatpush.bf16.msrb.mxu1 %v8029_v2 }
 0x817   : > { %8441 = vrcp.f32 %v9185_v7  ;;  %v2267_v9 = vand.u32 2147483648, %v9185_v7  ;;  %vm2261_vm1 = vweird.f32 %v9185_v7 }
 0x818   : > { %8443 = vpow2.f32 %v6526_v3  ;;  %vm2276_vm9 = vweird.f32 %v9189_v12 }
 0x888   : > { %v9176_v15 = vpop.xlane.xlu2 %2211 }
 0x889   : > { %vm2213_vm15 = vcmp.eq.f32.partialorder %v2210_v14, %v9176_v15  ;;  %v2219_v4 = vsub.f32 %v9176_v15, %v9168_v6  ;;  %v9191_v14 = vadd.f32 1.0, %v8440_v11  ;;  %v6528_v6 = vmul.f32 -1.442695, %v9151_v49 }
 0x88a   : > { %v2214_v16 = vsel %vm2213_vm15, %v9163_v0, 128 }
 0x88b   : > { %v2215_v17 = vcvt.s32.f32 %v2214_v16  ;;  %v2220_v8 = vmul.f32 1.442695, %v2219_v4  ;;  %v6527_v16 = vmul.f32 -1.442695, %v9147_v37  ;;  %vm2311_vm14 = vweird.f32 %v9191_v14 }
 0x88d   : > { %2216 = vmin.xlane.f32.xlu0 %v2215_v17  ;;  %8445 = vpow2.f32 %v2220_v8  ;;  %v9194_v17 = vpop.eup %8441 }
 0x88e   : > { %8447 = vrcp.f32 %v9189_v12  ;;  %v8444_v15 = vpop.eup %8443  ;;  %v2257_v22 = vmul.f32 %v9194_v17, %v9185_v7  ;;  %vm2262_vm0 = vweird.f32 %v9194_v17 }
 0x88f   : > { %8449 = vrcp.f32 %v9191_v14  ;;  %v9205_v23 = vadd.f32 1.0, %v8444_v15  ;;  %v8012_v15 = vld [vmem:[#allocation8 + $0x170] sm:$0xff]  ;;  %vm9249_vm2 = vmor %vm2261_vm1, %vm2262_vm0 }
 0x890   : > { %8451 = vpow2.f32 %v6527_v16  ;;  %v2258_v27 = vsub.f32 1.0, %v2257_v22  ;;  %v2265_v16 = vand.u32 2147483647, %v9185_v7  ;;  %v2280_v22 = vand.u32 2147483647, %v9189_v12  ;;  %3049 = vmatpush.bf16.msrb.mxu0 %v8012_v15  ;;  %v8010_v15 = vld [vmem:[#allocation8 + $0x160] sm:$0xff] }
 0x891   : > { %8453 = vpow2.f32 %v6528_v6  ;;  %v8004_v6 = vld [vmem:[#allocation8 + $0x130] sm:$0xff]  ;;  %vm2326_vm0 = vweird.f32 %v9205_v23 }
 0x892   : > { %8455 = vpow2.f32 %v6529_v19  ;;  %v2259_v38 = vmul.f32 %v9194_v17, %v2258_v27  ;;  %v8020_v19 = vld [vmem:[#allocation8 + $0x1b0] sm:$0xff]  ;;  %3036 = vmatpush.bf16.msra.mxu2 %v8004_v6  ;;  %vm2266_vm8 = vcmp.eq.f32.partialorder %v2265_v16, 8.507059e+37  ;;  %vm9275_vm12 = vcmp.eq.f32.partialorder %v2280_v22, 8.507059e+37  ;;  %v8002_v6 = vld [vmem:[#allocation8 + $0x120] sm:$0xff] }
 0x893   : > { %v9199_v20 = vpop.eup %8445  ;;  %8457 = vpow2.f32 %v6530_v21  ;;  %v8028_v27 = vld [vmem:[#allocation8 + $0x1f0] sm:$0xff]  ;;  %3062 = vmatpush.bf16.msrb.mxu3 %v8020_v19  ;;  %v8018_v22 = vld [vmem:[#allocation8 + $0x1a0] sm:$0xff] }
 0x894   : > { %v9208_v24 = vadd.f32 1.0, %v9199_v20  ;;  %v9210_v25 = vpop.eup %8447  ;;  %8459 = vrcp.f32 %v9205_v23  ;;  %v2260_v63 = vadd.f32 %v9194_v17, %v2259_v38  ;;  %v2282_v38 = vand.u32 2147483648, %v9189_v12  ;;  %3075 = vmatpush.bf16.msrb.mxu1 %v8028_v27  ;;  %3050 = vmatpush.bf16.msrb.mxu0 %v8011_v51  ;;  %v8026_v27 = vld [vmem:[#allocation8 + $0x1e0] sm:$0xff] }
 0x895   : > { %v9212_v26 = vpop.eup %8449  ;;  %v2272_v29 = vmul.f32 %v9210_v25, %v9189_v12  ;;  %vm2277_vm3 = vweird.f32 %v9210_v25 }
 0x896   : > { %v8452_v28 = vpop.eup %8451  ;;  %8461 = vrcp.f32 %v9208_v24  ;;  %v2307_v5 = vmul.f32 %v9212_v26, %v9191_v14  ;;  %v2264_v7 = vsel %vm9249_vm2, %v9194_v17, %v2260_v63  ;;  %v2317_v17 = vand.u32 2147483648, %v9191_v14  ;;  %vm9271_vm10 = vmor %vm2276_vm9, %vm2277_vm3 }
 0x897   : > { %v8454_v30 = vpop.eup %8453  ;;  %v9219_v39 = vadd.f32 1.0, %v8452_v28  ;;  %v2273_v40 = vsub.f32 1.0, %v2272_v29  ;;  %vm2312_vm13 = vweird.f32 %v9212_v26  ;;  %3063 = vmatpush.bf16.msrb.mxu3 %v8019_v53  ;;  %vm2228_vm9 = vweird.f32 %v9208_v24 }
 0x898   : > { %v8456_v31 = vpop.eup %8455  ;;  %v9223_v45 = vadd.f32 1.0, %v8454_v30  ;;  %v2308_v3 = vsub.f32 1.0, %v2307_v5  ;;  %v8003_v5 = vld [vmem:[#allocation8 + $0x128] sm:$0xff]  ;;  %v2318_v19 = vor.u32 1.1754944e-38, %v2317_v17  ;;  %3076 = vmatpush.bf16.msrb.mxu1 %v8027_v60  ;;  %vm9300_vm15 = vmor %vm2311_vm14, %vm2312_vm13  ;;  %3051 = vmatpush.bf16.msrb.mxu0 %v8010_v15  ;;  %v2234_v60 = vand.u32 2147483648, %v9208_v24  ;;  %v8000_v15 = vld [vmem:[#allocation8 + $0x110] sm:$0xff] }
 0x899   : > { %v8458_v36 = vpop.eup %8457  ;;  %v9227_v47 = vadd.f32 1.0, %v8456_v31  ;;  %8463 = vrcp.f32 %v9219_v39  ;;  %v2274_v4 = vmul.f32 %v9210_v25, %v2273_v40  ;;  %3037 = vmatpush.bf16.msra.mxu2 %v8003_v5  ;;  %vm2361_vm13 = vweird.f32 %v9219_v39 }
 0x89a   : > { %v9225_v46 = vpop.eup %8459  ;;  %v9231_v59 = vadd.f32 1.0, %v8458_v36  ;;  %8465 = vrcp.f32 %v9223_v45  ;;  %v2309_v29 = vmul.f32 %v9212_v26, %v2308_v3  ;;  %v2268_v36 = vor.u32 1.1754944e-38, %v2267_v9 }
 0x89b   : > { %v2322_v8 = vmul.f32 %v9225_v46, %v9205_v23  ;;  %8467 = vrcp.f32 %v9227_v47  ;;  %v2275_v28 = vadd.f32 %v9210_v25, %v2274_v4  ;;  %vm2327_vm1 = vweird.f32 %v9225_v46  ;;  %3064 = vmatpush.bf16.msrb.mxu3 %v8018_v22 }
 0x89c   : > { %v9229_v54 = vpop.eup %8461  ;;  %8469 = vrcp.f32 %v9231_v59  ;;  %v2269_v62 = vsel %vm2266_vm8, %v2268_v36, %v2264_v7  ;;  %v2310_v4 = vadd.f32 %v9212_v26, %v2309_v29  ;;  %v2330_v36 = vand.u32 2147483647, %v9205_v23  ;;  %vm9321_vm8 = vmor %vm2326_vm0, %vm2327_vm1  ;;  %3077 = vmatpush.bf16.msrb.mxu1 %v8026_v27  ;;  %v8016_v27 = vld [vmem:[#allocation8 + $0x190] sm:$0xff] }
 0x89d   : > { %v2224_v11 = vmul.f32 %v9229_v54, %v9208_v24  ;;  %v2323_v30 = vsub.f32 1.0, %v2322_v8  ;;  %v2279_v2 = vsel %vm9271_vm10, %v9210_v25, %v2275_v28  ;;  %v2283_v8 = vor.u32 1.1754944e-38, %v2282_v38  ;;  %3038 = vmatpush.bf16.msra.mxu2 %v8002_v6 }
 0x89e   : > { %v2315_v25 = vand.u32 2147483647, %v9191_v14  ;;  %v2314_v29 = vsel %vm9300_vm15, %v9212_v26, %v2310_v4  ;;  %v2332_v38 = vand.u32 2147483648, %v9205_v23  ;;  %vm2229_vm2 = vweird.f32 %v9229_v54  ;;  %v8017_v4 = vld [vmem:[#allocation8 + $0x198] sm:$0xff] }
 0x89f   : > { %v9260_v31 = vpop.eup %8463  ;;  %v2225_v40 = vsub.f32 1.0, %v2224_v11  ;;  %v2324_v3 = vmul.f32 %v9225_v46, %v2323_v30  ;;  %v2284_v7 = vsel %vm9275_vm12, %v2283_v8, %v2279_v2  ;;  %v9317_v17 = vmul.f32 %v2269_v62, %v9131_v32  ;;  %v8001_v32 = vld [vmem:[#allocation8 + $0x118] sm:$0xff]  ;;  %vm9341_vm12 = vmor %vm2228_vm9, %vm2229_vm2  ;;  %3065 = vmatpush.bf16.msrb.mxu3 %v8017_v4 }
 0x8a0   : > { %v9263_v52 = vpop.eup %8465  ;;  %v2357_v9 = vmul.f32 %v9260_v31, %v9219_v39  ;;  %vm2316_vm3 = vcmp.eq.f32.partialorder %v2315_v25, 8.507059e+37  ;;  %v2232_v2 = vand.u32 2147483647, %v9208_v24  ;;  %v8009_v62 = vld [vmem:[#allocation8 + $0x158] sm:$0xff]  ;;  %v9329_v23 = vmul.f32 %v2284_v7, %v9135_v34  ;;  %v8008_v25 = vld [vmem:[#allocation8 + $0x150] sm:$0xff] }
 0x8a1   : > { %v9267_v61 = vpop.eup %8467  ;;  %v2372_v11 = vmul.f32 %v9263_v52, %v9223_v45  ;;  %v2226_v16 = vmul.f32 %v9229_v54, %v2225_v40  ;;  %v2325_v30 = vadd.f32 %v9225_v46, %v2324_v3  ;;  %v2319_v63 = vsel %vm2316_vm3, %v2318_v19, %v2314_v29  ;;  %3039 = vmatpush.bf16.msra.mxu2 %v8001_v32  ;;  %v8024_v7 = vld [vmem:[#allocation8 + $0x1d0] sm:$0xff] }
 0x8a2   : > { %v9279_v12 = vpop.eup %8469  ;;  %v2407_v21 = vmul.f32 %v9267_v61, %v9227_v47  ;;  %v2358_v40 = vsub.f32 1.0, %v2357_v9  ;;  %vm9334_vm10 = vcmp.eq.f32.partialorder %v2330_v36, 8.507059e+37  ;;  %v2365_v9 = vand.u32 2147483647, %v9219_v39  ;;  %3052 = vmatpush.bf16.msrb.mxu0 %v8009_v62 }
 0x8a3   : > { %v2422_v14 = vmul.f32 %v9279_v12, %v9231_v59  ;;  %v2373_v5 = vsub.f32 1.0, %v2372_v11  ;;  %v2227_v51 = vadd.f32 %v9229_v54, %v2226_v16  ;;  %v2329_v3 = vsel %vm9321_vm8, %v9225_v46, %v2325_v30  ;;  %v8025_v11 = vld [vmem:[#allocation8 + $0x1d8] sm:$0xff]  ;;  %3066 = vmatpush.bf16.msrb.mxu3 %v8016_v27 }
 0x8a4   : > { %v2408_v53 = vsub.f32 1.0, %v2407_v21  ;;  %v2333_v16 = vor.u32 1.1754944e-38, %v2332_v38  ;;  %v2359_v34 = vmul.f32 %v9260_v31, %v2358_v40  ;;  %v9351_v19 = vmul.f32 %v2319_v63, %v9139_v41  ;;  %3078 = vmatpush.bf16.msrb.mxu1 %v8025_v11  ;;  %v8015_v63 = vld [vmem:[#allocation8 + $0x188] sm:$0xff]  ;;  %v7998_v11 = vld [vmem:[#allocation8 + $0x100] sm:$0xff] }
 0x8a5   : > { %v2423_v1 = vsub.f32 1.0, %v2422_v14  ;;  %v2374_v6 = vmul.f32 %v9263_v52, %v2373_v5  ;;  %v2231_v46 = vsel %vm9341_vm12, %v9229_v54, %v2227_v51  ;;  %v2235_v22 = vor.u32 1.1754944e-38, %v2234_v60  ;;  %3040 = vmatpush.bf16.msra.mxu2 %v8000_v15  ;;  %v7999_v5 = vld [vmem:[#allocation8 + $0x108] sm:$0xff]  ;;  %v8022_v15 = vld [vmem:[#allocation8 + $0x1c0] sm:$0xff] }
 0x8a6   : > { %v2409_v21 = vmul.f32 %v9267_v61, %v2408_v53  ;;  %v2334_v28 = vsel %vm9334_vm10, %v2333_v16, %v2329_v3  ;;  %v2367_v54 = vand.u32 2147483648, %v9219_v39  ;;  %vm2233_vm14 = vcmp.eq.f32.partialorder %v2232_v2, 8.507059e+37  ;;  %3053 = vmatpush.bf16.msrb.mxu0 %v8008_v25  ;;  %v8007_v51 = vld [vmem:[#allocation8 + $0x148] sm:$0xff] }
 0x8a7   : > { %v2424_v14 = vmul.f32 %v9279_v12, %v2423_v1  ;;  %vm2362_vm15 = vweird.f32 %v9260_v31  ;;  %vm9360_vm0 = vcmp.eq.f32.partialorder %v2365_v9, 8.507059e+37  ;;  %vm2376_vm1 = vweird.f32 %v9223_v45  ;;  %v8023_v1 = vld [vmem:[#allocation8 + $0x1c8] sm:$0xff]  ;;  %3067 = vmatpush.bf16.msrb.mxu3 %v8015_v63 }
 0x8a8   : > { %v2380_v29 = vand.u32 2147483647, %v9223_v45  ;;  %v2236_v30 = vsel %vm2233_vm14, %v2235_v22, %v2231_v46  ;;  %v2360_v36 = vadd.f32 %v9260_v31, %v2359_v34  ;;  %v2375_v38 = vadd.f32 %v9263_v52, %v2374_v6  ;;  %3079 = vmatpush.bf16.msrb.mxu1 %v8024_v7  ;;  %vm9378_vm8 = vmor %vm2361_vm13, %vm2362_vm15 }
 0x8a9   : > { %vm2377_vm2 = vweird.f32 %v9263_v52  ;;  %v2382_v40 = vand.u32 2147483648, %v9223_v45  ;;  %v2410_v26 = vadd.f32 %v9267_v61, %v2409_v21  ;;  %vm2412_vm3 = vweird.f32 %v9267_v61  ;;  %3041 = vmatpush.bf16.msra.mxu2 %v7999_v5 }
 0x8aa   : > { %v2415_v53 = vand.u32 2147483647, %v9227_v47  ;;  %v2417_v60 = vand.u32 2147483648, %v9227_v47  ;;  %v2425_v32 = vadd.f32 %v9279_v12, %v2424_v14  ;;  %vm2427_vm9 = vweird.f32 %v9279_v12  ;;  %vm9393_vm10 = vmor %vm2376_vm1, %vm2377_vm2  ;;  %3054 = vmatpush.bf16.msrb.mxu0 %v8007_v51 }
 0x8ab   : > { %v2432_v62 = vand.u32 2147483648, %v9231_v59  ;;  %v2238_v4 = vmul.f32 %v9199_v20, %v2236_v30  ;;  %v9387_v3 = vmul.f32 %v2334_v28, %v9143_v43  ;;  %v2368_v8 = vor.u32 1.1754944e-38, %v2367_v54 }
 0x8ac   : > { %vm2411_vm12 = vweird.f32 %v9227_v47  ;;  %v2239_v9 = vpack.c.bf16 %v2236_v30, %v2236_v30  ;;  %vm9398_vm13 = vcmp.eq.f32.partialorder %v2380_v29, 8.507059e+37  ;;  %v2383_v20 = vor.u32 1.1754944e-38, %v2382_v40  ;;  %v8006_v47 = vld [vmem:[#allocation8 + $0x140] sm:$0xff]  ;;  %3080 = vmatpush.bf16.msrb.mxu1 %v8023_v1 }
 0x8ad   : > { %vm9404_vm14 = vmor %vm2411_vm12, %vm2412_vm3  ;;  %vm2426_vm15 = vweird.f32 %v9231_v59  ;;  %v2430_v45 = vand.u32 2147483647, %v9231_v59  ;;  %v2364_v16 = vsel %vm9378_vm8, %v9260_v31, %v2360_v36  ;;  %v2379_v34 = vsel %vm9393_vm10, %v9263_v52, %v2375_v38  ;;  %v8014_v31 = vld [vmem:[#allocation8 + $0x180] sm:$0xff]  ;;  %3042 = vmatpush.bf16.msra.mxu2 %v7998_v11 }
 0x8ae   : > { %v2414_v6 = vsel %vm9404_vm14, %v9267_v61, %v2410_v26  ;;  %vm9419_vm1 = vcmp.eq.f32.partialorder %v2415_v53, 8.507059e+37  ;;  %vm9425_vm2 = vmor %vm2426_vm15, %vm2427_vm9  ;;  %v2418_v25 = vor.u32 1.1754944e-38, %v2417_v60  ;;  %v2433_v61 = vor.u32 1.1754944e-38, %v2432_v62  ;;  %3055 = vmatpush.bf16.msrb.mxu0 %v8006_v47  ;;  %3068 = vmatpush.bf16.msrb.mxu3 %v8014_v31 }
 0x8af   : > { %v2429_v52 = vsel %vm9425_vm2, %v9279_v12, %v2425_v32  ;;  %v2241_v21 = vpack.c.bf16 %v2238_v4, %v2238_v4  ;;  %v2240_v27 = vunpack.c.l.bf16 %v2239_v9  ;;  %v2369_v54 = vsel %vm9360_vm0, %v2368_v8, %v2364_v16 }
 0x8b0   : > { %v2384_v14 = vsel %vm9398_vm13, %v2383_v20, %v2379_v34  ;;  %v2419_v29 = vsel %vm9419_vm1, %v2418_v25, %v2414_v6  ;;  %vm2431_vm8 = vcmp.eq.f32.partialorder %v2430_v45, 8.507059e+37  ;;  %vm2243_vm9 = vcmp.eq.s32.totalorder %v9172_v13, 0  ;;  %3081 = vmatpush.bf16.msrb.mxu1 %v8022_v15 }
 0x8b1   : > { %v2434_v12 = vsel %vm2431_vm8, %v2433_v61, %v2429_v52  ;;  %vm2293_vm10 = vcmp.eq.s32.totalorder %v9172_v13, 1  ;;  %v2242_v36 = vunpack.c.l.bf16 %v2241_v21  ;;  %vm2343_vm0 = vcmp.eq.s32.totalorder %v9172_v13, 2 }
 0x8b2   : > { %vm2393_vm12 = vcmp.eq.s32.totalorder %v9172_v13, 3  ;;  %v2244_v38 = vsel %vm2243_vm9, %v2240_v27, 0.0  ;;  %v2294_v40 = vsel %vm2293_vm10, %v2240_v27, 0.0  ;;  %v2344_v5 = vsel %vm2343_vm0, %v2240_v27, 0.0 }
 0x8b3   : > { %v2394_v51 = vsel %vm2393_vm12, %v2240_v27, 0.0  ;;  %v2386_v4 = vmul.f32 %v2369_v54, %v9147_v37  ;;  %v2387_v13 = vmul.f32 %v2384_v14, %v9151_v49  ;;  %v2436_v8 = vmul.f32 %v2419_v29, %v9155_v55 }
 0x8b4   : > { %v2437_v39 = vmul.f32 %v2434_v12, %v9159_v57 }
 0x900   : > { %v2217_v22 = vpop.xlane.xlu0 %2216 }
 0x901   : > { %vm8284_vm3 = vcmp.lt.s32.totalorder %v2217_v22, 0  ;;  %v8285_v7 = vceil.f32 %v2217_v22  ;;  %v8286_v28 = vfloor.f32 %v2217_v22 }
 0x903   : > { %v8287_v30 = vsel %vm8284_vm3, %v8285_v7, %v8286_v28 }
 0x904   : > { %v8288_v41 = vcvt.f32.s32 %v8287_v30  ;;  %v6874_v30 = vld [vmem:[#allocation2 + $0x168] sm:$0xf] }
 0x906   : > { %vm2245_vm13 = vcmp.eq.s32.totalorder %v8288_v41, 0  ;;  %vm2295_vm14 = vcmp.eq.s32.totalorder %v8288_v41, 1  ;;  %vm2345_vm15 = vcmp.eq.s32.totalorder %v8288_v41, 2  ;;  %vm2395_vm1 = vcmp.eq.s32.totalorder %v8288_v41, 3  ;;  %v8051_v41 = vld [vmem:[#allocation2 + $0x16c] sm:$0xf] }
 0x907   : > { %v2246_v26 = vsel %vm2245_vm13, %v2242_v36, 0.0  ;;  %v2296_v53 = vsel %vm2295_vm14, %v2242_v36, 0.0  ;;  %v2346_v60 = vsel %vm2345_vm15, %v2242_v36, 0.0  ;;  %v2396_v63 = vsel %vm2395_vm1, %v2242_v36, 0.0  ;;  %v8052_v36 = vld [vmem:[#allocation2 + $0x170] sm:$0xf0] }
 0x908   : > { %v2247_v1 = vadd.f32 %v2246_v26, %v2244_v38  ;;  %v2297_v2 = vadd.f32 %v2296_v53, %v2294_v40  ;;  %v2347_v32 = vadd.f32 %v2346_v60, %v2344_v5  ;;  %v2397_v62 = vadd.f32 %v2396_v63, %v2394_v51  ;;  %v6876_v40 = vld [vmem:[#allocation2 + $0x174] sm:$0xf0]  ;;  %v6882_v5 = vld [vmem:[#allocation2 + $0x170] sm:$0xf]  ;;  %v8053_v51 = vld [vmem:[#allocation2 + $0x178] sm:$0xf0] }
 0x909   : > { %v6875_v38 = vor.u32 %v8052_v36, %v6874_v30  ;;  %v6879_v53 = vor.u32 %v8051_v41, %v6876_v40  ;;  %v6883_v60 = vor.u32 %v8053_v51, %v6882_v5  ;;  %v6828_v36 = vld [vmem:[#allocation2 + $0x114] sm:$0xf0]  ;;  %v6834_v41 = vld [vmem:[#allocation2 + $0x110] sm:$0xf] }
 0x90a   : > { %v2288_v9 = vmul.f32 %v9317_v17, %v2247_v1  ;;  %v2289_v24 = vmul.f32 %v9329_v23, %v2247_v1  ;;  %v2338_v20 = vmul.f32 %v9351_v19, %v2297_v2  ;;  %v2339_v43 = vmul.f32 %v9387_v3, %v2297_v2  ;;  %v6814_v51 = vld [vmem:[#allocation2 + $0xf0] sm:$0xf] }
 0x90b   : > { %v2388_v45 = vmul.f32 %v2386_v4, %v2347_v32  ;;  %v2389_v11 = vmul.f32 %v2387_v13, %v2347_v32  ;;  %v2438_v47 = vmul.f32 %v2436_v8, %v2397_v62  ;;  %v2439_v16 = vmul.f32 %v2437_v39, %v2397_v62 }
 0x90c   : > { %v2290_v37 = vmul.f32 %v2288_v9, %v9133_v33  ;;  %v2291_v49 = vmul.f32 %v2289_v24, %v9137_v35  ;;  %v2340_v55 = vmul.f32 %v2338_v20, %v9141_v42  ;;  %v2341_v57 = vmul.f32 %v2339_v43, %v9145_v44 }
 0x90d   : > { %v2390_v17 = vmul.f32 %v2388_v45, %v9149_v48  ;;  %v2391_v23 = vmul.f32 %v2389_v11, %v9153_v50  ;;  %v2440_v19 = vmul.f32 %v2438_v47, %v9157_v56  ;;  %v2441_v3 = vmul.f32 %v2439_v16, %v9161_v58 }
 0x90e   : > { %v2292_v34 = vpack.c.bf16 %v2291_v49, %v2290_v37  ;;  %v2342_v6 = vpack.c.bf16 %v2341_v57, %v2340_v55 }
 0x90f   : > { %v2392_v46 = vpack.c.bf16 %v2391_v23, %v2390_v17  ;;  %v2442_v59 = vpack.c.bf16 %v2441_v3, %v2440_v19  ;;  %v6862_v23 = vld [vmem:[#allocation2 + $0x150] sm:$0xf]  ;;  %v8049_v19 = vld [vmem:[#allocation2 + $0x158] sm:$0xf0]  ;;  %v8048_v3 = vld [vmem:[#allocation2 + $0x154] sm:$0xf] }
 0x910   : > { %v2444_v31 = vunpack.c.l.b16 %v2292_v34  ;;  %v2445_v33 = vunpack.c.h.b16 %v2292_v34  ;;  %v2451_v15 = vunpack.c.l.b16 %v2342_v6  ;;  %v2452_v35 = vunpack.c.h.b16 %v2342_v6  ;;  %v6864_v6 = vld [vmem:[#allocation2 + $0x15c] sm:$0xf0] }
 0x911   : > { %v2458_v48 = vunpack.c.l.b16 %v2392_v46  ;;  %v2459_v50 = vunpack.c.h.b16 %v2392_v46  ;;  %v2465_v56 = vunpack.c.l.b16 %v2442_v59  ;;  %v2466_v58 = vunpack.c.h.b16 %v2442_v59  ;;  %v6870_v46 = vld [vmem:[#allocation2 + $0x158] sm:$0xf]  ;;  %v8050_v59 = vld [vmem:[#allocation2 + $0x160] sm:$0xf0] }
 0x912   : > { %v2446_v25 = vpack.c.b16 %v2444_v31, %v2444_v31  ;;  %v2447_v42 = vpack.c.b16 %v2445_v33, %v2445_v33  ;;  %v2453_v52 = vpack.c.b16 %v2451_v15, %v2451_v15  ;;  %v2454_v44 = vpack.c.b16 %v2452_v35, %v2452_v35  ;;  %v8046_v15 = vld [vmem:[#allocation2 + $0x140] sm:$0xf0]  ;;  %v8045_v35 = vld [vmem:[#allocation2 + $0x13c] sm:$0xf] }
 0x913   : > { %v2460_v61 = vpack.c.b16 %v2458_v48, %v2458_v48  ;;  %v2461_v21 = vpack.c.b16 %v2459_v50, %v2459_v50  ;;  %v2467_v22 = vpack.c.b16 %v2465_v56, %v2465_v56  ;;  %v2468_v27 = vpack.c.b16 %v2466_v58, %v2466_v58  ;;  %v6838_v56 = vld [vmem:[#allocation2 + $0x120] sm:$0xf]  ;;  %v8043_v58 = vld [vmem:[#allocation2 + $0x128] sm:$0xf0] }
 0x914   : > { %2991 = vmatmul.bf16.vlgmr.msrb.gmra.mxu2 %v2446_v25  ;;  %3004 = vmatmul.bf16.vlgmr.msra.gmra.mxu0 %v2447_v42  ;;  %v6863_v34 = vor.u32 %v8049_v19, %v6862_v23  ;;  %v6867_v31 = vor.u32 %v8048_v3, %v6864_v6  ;;  %v6871_v33 = vor.u32 %v8050_v59, %v6870_v46  ;;  %v6852_v42 = vld [vmem:[#allocation2 + $0x144] sm:$0xf0] }
 0x915   : > { %3017 = vmatmul.bf16.vlgmr.msra.gmra.mxu3 %v2453_v52  ;;  %3030 = vmatmul.bf16.vlgmr.msra.gmra.mxu1 %v2454_v44  ;;  %v6858_v52 = vld [vmem:[#allocation2 + $0x140] sm:$0xf]  ;;  %v8047_v44 = vld [vmem:[#allocation2 + $0x148] sm:$0xf0]  ;;  %v6855_v48 = vor.u32 %v8045_v35, %v6852_v42 }
 0x916   : > { %3275 = vmatpush.bf16.msrb.mxu2 %v6875_v38  ;;  %3288 = vmatpush.bf16.msra.mxu0 %v6879_v53  ;;  %v6859_v50 = vor.u32 %v8047_v44, %v6858_v52  ;;  %v8041_v38 = vld [vmem:[#allocation2 + $0x118] sm:$0xf0]  ;;  %v8036_v53 = vld [vmem:[#allocation2 + $0xf4] sm:$0xf] }
 0x917   : > { %3301 = vmatpush.bf16.msra.mxu3 %v6883_v60  ;;  %v6835_v5 = vor.u32 %v8041_v38, %v6834_v41 }
 0x91a   : > { %3276 = vmatpush.bf16.msrb.mxu2 %v6863_v34  ;;  %3289 = vmatpush.bf16.msra.mxu0 %v6867_v31 }
 0x91b   : > { %3302 = vmatpush.bf16.msra.mxu3 %v6871_v33  ;;  %v6787_v33 = vld [vmem:[%s9943_s8 + $0x1] sm:$0x1] }
 0x91e   : > { %3290 = vmatpush.bf16.msra.mxu0 %v6855_v48 }
 0x91f   : > { %3303 = vmatpush.bf16.msra.mxu3 %v6859_v50 }
 0x924   : > { %3043 = vmatmul.bf16.vlgmr.msra.gmra.mxu2 %v2460_v61  ;;  %3056 = vmatmul.bf16.vlgmr.msrb.gmra.mxu0 %v2461_v21  ;;  %v8042_v61 = vld [vmem:[#allocation2 + $0x124] sm:$0xf]  ;;  %v6839_v21 = vor.u32 %v8043_v58, %v6838_v56 }
 0x925   : > { %3069 = vmatmul.bf16.vlgmr.msrb.gmra.mxu3 %v2467_v22  ;;  %3082 = vmatmul.bf16.vlgmr.msrb.gmra.mxu1 %v2468_v27  ;;  %v6840_v22 = vld [vmem:[#allocation2 + $0x12c] sm:$0xf0]  ;;  %v6846_v27 = vld [vmem:[#allocation2 + $0x128] sm:$0xf] }
 0x991   : > { %v3005_v7 = vpop.f32.mrf.mxu0 }
 0x992   : > { %v3031_v28 = vpop.f32.mrf.mxu1 }
 0x997   : > { %v2992_v54 = vpop.f32.mrf.mxu2 }
 0x998   : > { %v3018_v14 = vpop.f32.mrf.mxu3  ;;  %v3006_v26 = vadd.f32 %v3005_v7, %v2992_v54  ;;  %v8044_v7 = vld [vmem:[#allocation2 + $0x130] sm:$0xf0] }
 0x999   : > { %v3007_v29 = vpop.f32.mrf.mxu0  ;;  %v6847_v54 = vor.u32 %v8044_v7, %v6846_v27 }
 0x99a   : > { %v3033_v12 = vpop.f32.mrf.mxu1  ;;  %v3019_v32 = vadd.f32 %v3018_v14, %v3006_v26  ;;  %v6826_v14 = vld [vmem:[#allocation2 + $0x108] sm:$0xf]  ;;  %v8040_v29 = vld [vmem:[#allocation2 + $0x110] sm:$0xf0]  ;;  %v8037_v26 = vld [vmem:[#allocation2 + $0xf8] sm:$0xf0] }
 0x99b   : > { %3304 = vmatpush.bf16.msra.mxu3 %v6847_v54  ;;  %v8039_v12 = vld [vmem:[#allocation2 + $0x10c] sm:$0xf]  ;;  %v6827_v30 = vor.u32 %v8040_v29, %v6826_v14  ;;  %v6815_v60 = vor.u32 %v8037_v26, %v6814_v51  ;;  %v8529_v54 = vld [vmem:[%s9939_s4] sm:$0xff] }
 0x99c   : > { %v3032_v4 = vadd.f32 %v3031_v28, %v3019_v32  ;;  %v6843_v28 = vor.u32 %v8042_v61, %v6840_v22  ;;  %v6831_v40 = vor.u32 %v8039_v12, %v6828_v36  ;;  %v8530_v29 = vld [vmem:[%s9940_s5] sm:$0xff] }
 0x99e   : > { %3291 = vmatpush.bf16.msra.mxu0 %v6843_v28 }
 0x99f   : > { %v2994_v63 = vpop.f32.mrf.mxu2  ;;  %3305 = vmatpush.bf16.msra.mxu3 %v6835_v5  ;;  %v8532_v5 = vld [vmem:[%s9936_s1] sm:$0xff] }
 0x9a0   : > { %v3020_v1 = vpop.f32.mrf.mxu3  ;;  %v6816_v63 = vld [vmem:[#allocation2 + $0xfc] sm:$0xf0] }
 0x9a1   : > { %v3057_v2 = vpop.f32.mrf.mxu0  ;;  %v6822_v1 = vld [vmem:[#allocation2 + $0xf8] sm:$0xf]  ;;  %v6819_v32 = vor.u32 %v8036_v53, %v6816_v63  ;;  %v8533_v53 = vld [vmem:[%s9937_s2] sm:$0xff] }
 0x9a2   : > { %v3083_v62 = vpop.f32.mrf.mxu1  ;;  %3292 = vmatpush.bf16.msra.mxu0 %v6831_v40 }
 0x9a6   : > { %3293 = vmatpush.bf16.msra.mxu0 %v6819_v32 }
 0x9a7   : > { %v3044_v13 = vpop.f32.mrf.mxu2 }
 0x9a8   : > { %v3045_v8 = vadd.f32 %v3044_v13, %v3032_v4  ;;  %v3070_v39 = vpop.f32.mrf.mxu3  ;;  %v6802_v4 = vld [vmem:[#allocation2 + $0xd8] sm:$0xf]  ;;  %v8034_v13 = vld [vmem:[#allocation2 + $0xe0] sm:$0xf0] }
 0x9a9   : > { %v3059_v9 = vpop.f32.mrf.mxu0 }
 0x9aa   : > { %v3058_v24 = vadd.f32 %v3057_v2, %v3045_v8  ;;  %v3085_v20 = vpop.f32.mrf.mxu1  ;;  %v8038_v2 = vld [vmem:[#allocation2 + $0x100] sm:$0xf0]  ;;  %v8033_v8 = vld [vmem:[#allocation2 + $0xdc] sm:$0xf]  ;;  %v6804_v9 = vld [vmem:[#allocation2 + $0xe4] sm:$0xf0] }
 0x9ab   : > { %v8035_v20 = vld [vmem:[#allocation2 + $0xe8] sm:$0xf0] }
 0x9ac   : > { %v3071_v43 = vadd.f32 %v3070_v39, %v3058_v24  ;;  %v6803_v39 = vor.u32 %v8034_v13, %v6802_v4  ;;  %v6810_v24 = vld [vmem:[#allocation2 + $0xe0] sm:$0xf] }
 0x9ae   : > { %v3084_v45 = vadd.f32 %v3083_v62, %v3071_v43  ;;  %v6823_v62 = vor.u32 %v8038_v2, %v6822_v1  ;;  %v6807_v43 = vor.u32 %v8033_v8, %v6804_v9  ;;  %v8534_v2 = vld [vmem:[%s9938_s3] sm:$0xff] }
 0x9af   : > { %v3046_v11 = vpop.f32.mrf.mxu2 }
 0x9b0   : > { %v3087_v47 = vpack.c.bf16 %v3084_v45, %v3084_v45  ;;  %v3072_v16 = vpop.f32.mrf.mxu3  ;;  %3306 = vmatpush.bf16.msra.mxu3 %v6823_v62  ;;  %v6811_v45 = vor.u32 %v8035_v20, %v6810_v24  ;;  %v6790_v11 = vld [vmem:[#allocation2 + $0xc0] sm:$0xf]  ;;  %3294 = vmatpush.bf16.msra.mxu0 %v6807_v43 }
 0x9b1   : > { %v8030_v16 = vld [vmem:[#allocation2 + $0xc4] sm:$0xf] }
 0x9b2   : > { %v3088_v37 = vunpack.c.l.bf16 %v3087_v47  ;;  %v8031_v47 = vld [vmem:[#allocation2 + $0xc8] sm:$0xf0] }
 0x9b4   : > { %v3089_v49 = vadd.f32 %v3088_v37, %v9103_v10  ;;  %v6850_v10 = vld [vmem:[#allocation2 + $0x138] sm:$0xf]  ;;  %3307 = vmatpush.bf16.msra.mxu3 %v6811_v45  ;;  %v6791_v37 = vor.u32 %v8031_v47, %v6790_v11 }
 0x9b5   : > { %v6851_v25 = vor.u32 %v8046_v15, %v6850_v10  ;;  %v3110_v15 = vunpack.c.l.bf16 %v6787_v33 }
 0x9b6   : > { %v3090_v55 = vpack.c.bf16 %v3089_v49, %v3089_v49  ;;  %v6792_v49 = vld [vmem:[#allocation2 + $0xcc] sm:$0xf0] }
 0x9b7   : > { %3277 = vmatpush.bf16.msrb.mxu2 %v6851_v25  ;;  %v6795_v23 = vor.u32 %v8030_v16, %v6792_v49  ;;  %v3111_v42 = vperm.slane %v3110_v15, 0  ;;  %v8537_v15 = vld [vmem:[%s9942_s7 + $0x10] sm:$0xff] }
 0x9b8   : > { %v9459_v57 = vunpack.c.l.bf16 %v3090_v55  ;;  %v6798_v55 = vld [vmem:[#allocation2 + $0xc8] sm:$0xf] }
 0x9b9   : > { %3295 = vmatpush.bf16.msra.mxu0 %v6795_v23 }
 0x9ba   : > { %v3094_v17 = vmul.f32 %v9459_v57, %v9459_v57 }
 0x9bb   : > { %3278 = vmatpush.bf16.msrb.mxu2 %v6839_v21 }
 0x9bc   : > { %3095 = vadd.xlane.f32.xlu2 %v3094_v17  ;;  %v8032_v17 = vld [vmem:[#allocation2 + $0xd0] sm:$0xf0] }
 0x9bd   : > { %v6799_v19 = vor.u32 %v8032_v17, %v6798_v55 }
 0x9bf   : > { %3279 = vmatpush.bf16.msrb.mxu2 %v6827_v30  ;;  %3308 = vmatpush.bf16.msra.mxu3 %v6799_v19  ;;  %v8531_v30 = vld [vmem:[%s9941_s6] sm:$0xff] }
 0x9c3   : > { %3280 = vmatpush.bf16.msrb.mxu2 %v6815_v60 }
 0x9c7   : > { %3281 = vmatpush.bf16.msrb.mxu2 %v6803_v39 }
 0x9cb   : > { %3282 = vmatpush.bf16.msrb.mxu2 %v6791_v37 }
 0xa2f   : > { %v3096_v3 = vpop.xlane.xlu2 %3095 }
 0xa30   : > { %v3097_v34 = vmul.f32 %v3096_v3, %v9022_v18  ;;  %v8535_v3 = vld [vmem:[%s9942_s7] sm:$0xff] }
 0xa32   : > { %v3098_v6 = vadd.f32 1e-06, %v3097_v34 }
 0xa34   : > { %8471 = vrsqrt.f32 %v3098_v6  ;;  %vm3105_vm3 = vweird.f32 %v3098_v6 }
 0xa3a   : > { %v8472_v46 = vpop.eup %8471 }
 0xa3b   : > { %v3100_v59 = vmul.f32 %v8472_v46, %v3098_v6  ;;  %vm3106_vm2 = vweird.f32 %v8472_v46 }
 0xa3c   : > { %vm3107_vm8 = vmor %vm3105_vm3, %vm3106_vm2 }
 0xa3d   : > { %v3101_v31 = vmul.f32 %v8472_v46, %v3100_v59  ;;  %v8536_v59 = vld [vmem:[%s9942_s7 + $0x8] sm:$0xff] }
 0xa3f   : > { %v3102_v10 = vmul.f32 0.5, %v3101_v31 }
 0xa41   : > { %v3103_v35 = vsub.f32 1.5, %v3102_v10 }
 0xa43   : > { %v3104_v25 = vmul.f32 %v8472_v46, %v3103_v35 }
 0xa45   : > { %v3108_v52 = vsel %vm3107_vm8, %v8472_v46, %v3104_v25 }
 0xa46   : > { %v3109_v44 = vmul.f32 %v3108_v52, %v9459_v57  ;;  %v8538_v52 = vld [vmem:[%s9942_s7 + $0x18] sm:$0xff] }
 0xa48   : > { %v3112_v48 = vmul.f32 %v3111_v42, %v3109_v44 }
 0xa4a   : > { %v3113_v50 = vpack.c.bf16 %v3112_v48, %v3112_v48 }
 0xa4c   : > { %3283 = vmatmul.bf16.vlgmr.msrb.gmra.mxu2 %v3113_v50  ;;  %3296 = vmatmul.bf16.vlgmr.msra.gmra.mxu0 %v3113_v50 }
 0xa4d   : > { %3309 = vmatmul.bf16.vlgmr.msra.gmra.mxu3 %v3113_v50 }
 0xac9   : > { %v3297_v56 = vpop.f32.mrf.mxu0 }
 0xaca   : > { %3329 = vrot.lane.b32.xlu2 %v3297_v56, %s8814_s20  ;;  %3325 = vrot.lane.b32.xlu0 %v3297_v56, %s8815_s13  ;;  %v3324_v14 = vmul.f32 %v8529_v54, %v3297_v56 }
 0xacf   : > { %v3284_v58 = vpop.f32.mrf.mxu2 }
 0xad0   : > { %v9470_v61 = vpop.f32.mrf.mxu3  ;;  %3315 = vrot.lane.b32.xlu1 %v3284_v58, %s8815_s13  ;;  %v3314_v51 = vmul.f32 %v8532_v5, %v3284_v58  ;;  %s8278_s13 = sshll.u32 %s8925_s25, 4 }
 0xad1   : > { %v3299_v21 = vpop.f32.mrf.mxu0  ;;  %v3334_v50 = vpack.c.bf16 %v9470_v61, %v9470_v61  ;;  %s5705_s21 = scalar_lea.hbm %s10041_s30, %s8278_s13 }
 0xad2   : > { %3319 = vrot.lane.b32.xlu0 %v3284_v58, %s8814_s20  ;;  %s5709_s28 = sshll.u32 %s5705_s21, 4  ;;  %s5710_s28 = int_to_ptr.hbm [resolvable:$true] %s5709_s28 }
 0xad3   : > { %v3366_v56 = vunpack.c.l.b16 %v3334_v50  ;;  %s8733_s11 = sshra.s32 %s5710_s28, 4  ;;  %s8734_s11 = int_to_ptr.hbm [resolvable:$true] %s8733_s11 }
 0xad4   : > { %s8735_s0 = scalar_lea.hbm %s8734_s11, 16  ;;  %p8740_p3 = scmp.lt.s32.totalorder %s8734_s11, %s10041_s30 }
 0xad5   : > { %v3367_v58 = vpack.c.b16 %v3366_v56, %v3366_v56  ;;  %v8189_v56 = vld [vmem:[#allocation7 + $0x838] sm:$0xf0]  ;;  %p8736_p0 = scmp.ne.s32.totalorder %s8734_s11, %s8735_s0 }
 0xad7   : > { %v3286_v22 = vpop.f32.mrf.mxu2  ;;  %p8737_p1 = pnand %p8736_p0, %p8942_p5 }
 0xad8   : > { %v3312_v27 = vpop.f32.mrf.mxu3 }
 0xad9   : > { %p8738_p2 = pneg %p8737_p1 }
 0xb24   : > { %v3330_v7 = vpop.permute.xlu2 %3329 }
 0xb25   : > { %v3331_v36 = vmul.f32 %v8531_v30, %v3330_v7 }
 0xb3c   : > { %v3326_v28 = vpop.permute.xlu0 %3325 }
 0xb3d   : > { %v3327_v12 = vmul.f32 %v8530_v29, %v3326_v28 }
 0xb3f   : > { %v3328_v41 = vadd.f32 %v3327_v12, %v3324_v14 }
 0xb41   : > { %v3332_v38 = vadd.f32 %v3331_v36, %v3328_v41 }
 0xb42   : > { %v3316_v40 = vpop.permute.xlu1 %3315 }
 0xb43   : > { %v3333_v26 = vpack.c.bf16 %v3332_v38, %v3332_v38  ;;  %v3317_v60 = vmul.f32 %v8533_v53, %v3316_v40 }
 0xb44   : > { %v3320_v63 = vpop.permute.xlu0 %3319 }
 0xb45   : > { %v3318_v1 = vadd.f32 %v3317_v60, %v3314_v51  ;;  %v3321_v32 = vmul.f32 %v8534_v2, %v3320_v63  ;;  %v3351_v62 = vunpack.c.l.b16 %v3333_v26 }
 0xb47   : > { %v3322_v4 = vadd.f32 %v3321_v32, %v3318_v1  ;;  %v3352_v13 = vpack.c.b16 %v3351_v62, %v3351_v62 }
 0xb49   : > { %v3323_v8 = vpack.c.bf16 %v3322_v4, %v3322_v4  ;;  %3357 = vrot.lane.b32.xlu2 %v3352_v13, %s8817_s29  ;;  %3355 = vrot.lane.b32.xlu0 %v3352_v13, %s8816_s24 }
 0xb4a   : > { %3353 = vrot.lane.b32.xlu1 %v3352_v13, %s8818_s17 }
 0xb4b   : > { %v3336_v39 = vunpack.c.l.b16 %v3323_v8 }
 0xb4d   : > { %v3337_v9 = vpack.c.b16 %v3336_v39, %v3336_v39 }
 0xb51   : > { %3340 = vrot.lane.b32.xlu2 %v3337_v9, %s8816_s24  ;;  %3338 = vrot.lane.b32.xlu0 %v3337_v9, %s8818_s17 }
 0xb52   : > { %3342 = vrot.lane.b32.xlu1 %v3337_v9, %s8817_s29 }
 0xba3   : > { %v3358_v24 = vpop.permute.xlu2 %3357 }
 0xbab   : > { %v3341_v17 = vpop.permute.xlu2 %3340 }
 0xbbb   : > { %v3356_v20 = vpop.permute.xlu0 %3355 }
 0xbbc   : > { %v3364_v43 = vsel %vm888_vm4, %v3356_v20, %v3358_v24  ;;  %v3354_v11 = vpop.permute.xlu1 %3353 }
 0xbbd   : > { %v3388_v45 = vsel %vm927_vm5, %v3364_v43, 0  ;;  %v3361_v47 = vsel %vm888_vm4, %v3333_v26, %v3354_v11 }
 0xbbe   : > { %3396 = vmatpush.bf16.xpose.msra.mxu1 %v3388_v45  ;;  %v3386_v16 = vsel %vm927_vm5, %v3361_v47, 0 }
 0xbc3   : > { %v3339_v37 = vpop.permute.xlu0 %3338 }
 0xbc4   : > { %v3346_v49 = vsel %vm888_vm4, %v3323_v8, %v3339_v37  ;;  %v3343_v55 = vpop.permute.xlu1 %3342 }
 0xbc5   : > { %v3349_v23 = vsel %vm888_vm4, %v3341_v17, %v3343_v55 }
 0xbc6   : > { %3397 = vmatpush.bf16.xpose.msra.mxu1 %v3386_v16 }
 0xbcd   : > { %6884 = vmatmul.msk.bf16.vlgmr.msra.gmra.mxu1 %vm927_vm5, %v3346_v49 }
 0xbdd   : > { %6885 = vmatmul.msk.bf16.gmra.mxu1 %vm927_vm5, %v3349_v23 }
 0xc4a   : > { %v3399_v19 = vpop.f32.mrf.mxu1 }
 0xc4b   : > { %v3400_v34 = vadd.f32 %v8535_v3, %v3399_v19  ;;  %v8061_v3 = vld [vmem:[#allocation5 + $0x78] sm:$0xff] }
 0xc4c   : > { %3561 = vmatpush.bf16.msrb.mxu0 %v8061_v3 }
 0xc4d   : > { %v3409_v6 = vsel %vm927_vm5, %v3400_v34, -inf }
 0xc4e   : > { %3410 = vmax.xlane.f32.xlu0 %v3409_v6  ;;  %v8059_v6 = vld [vmem:[#allocation5 + $0x68] sm:$0xff] }
 0xc52   : > { %v3401_v46 = vpop.f32.mrf.mxu1 }
 0xc53   : > { %v3402_v31 = vadd.f32 %v8536_v59, %v3401_v46  ;;  %v8058_v46 = vld [vmem:[#allocation5 + $0x60] sm:$0xff]  ;;  %v8057_v59 = vld [vmem:[#allocation5 + $0x58] sm:$0xff] }
 0xc55   : > { %v3412_v33 = vsel %vm927_vm5, %v3402_v31, -inf }
 0xc56   : > { %3413 = vmax.xlane.f32.xlu2 %v3412_v33  ;;  %v8055_v33 = vld [vmem:[#allocation5 + $0x48] sm:$0xff] }
 0xc5a   : > { %v3404_v10 = vpop.f32.mrf.mxu1 }
 0xc5b   : > { %v3405_v35 = vadd.f32 %v8537_v15, %v3404_v10  ;;  %v8054_v10 = vld [vmem:[#allocation5 + $0x40] sm:$0xff] }
 0xc5d   : > { %v3415_v25 = vsel %vm927_vm5, %v3405_v35, -inf }
 0xc5e   : > { %3416 = vmax.xlane.f32.xlu1 %v3415_v25 }
 0xc62   : > { %v3406_v42 = vpop.f32.mrf.mxu1 }
 0xc63   : > { %v3407_v44 = vadd.f32 %v8538_v52, %v3406_v42 }
 0xc65   : > { %v3418_v48 = vsel %vm927_vm5, %v3407_v44, -inf }
 0xc66   : > { %3419 = vmax.xlane.f32.xlu0 %v3418_v48 }
 0xc7a   : > { %3370 = vrot.lane.b32.xlu0 %v3367_v58, %s8816_s24 }
 0xcc1   : > { %v3411_v21 = vpop.xlane.xlu0 %3410 }
 0xcc2   : > { %v3421_v22 = vsub.f32 %v3400_v34, %v3411_v21  ;;  %v8060_v34 = vld [vmem:[#allocation5 + $0x70] sm:$0xff] }
 0xcc3   : > { %3562 = vmatpush.bf16.msrb.mxu0 %v8060_v34  ;;  %v7127_v34 = vld [vmem:[#allocation7 + $0x5d8] sm:$0xf] }
 0xcc4   : > { %v3425_v27 = vmul.f32 1.442695, %v3421_v22  ;;  %v7401_v22 = vld [vmem:[#allocation7 + $0x83c] sm:$0xf0] }
 0xcc6   : > { %8473 = vpow2.f32 %v3425_v27  ;;  %v7407_v27 = vld [vmem:[#allocation7 + $0x800] sm:$0xf] }
 0xcc7   : > { %3563 = vmatpush.bf16.msrb.mxu0 %v8059_v6  ;;  %v8121_v6 = vld [vmem:[#allocation7 + $0x618] sm:$0xf0] }
 0xcc9   : > { %v3414_v7 = vpop.xlane.xlu2 %3413 }
 0xcca   : > { %v3422_v28 = vsub.f32 %v3402_v31, %v3414_v7  ;;  %v8056_v31 = vld [vmem:[#allocation5 + $0x50] sm:$0xff]  ;;  %v8190_v7 = vld [vmem:[#allocation7 + $0x840] sm:$0xf0] }
 0xccb   : > { %3564 = vmatpush.bf16.msrb.mxu0 %v8058_v46  ;;  %v8113_v46 = vld [vmem:[#allocation7 + $0x5dc] sm:$0xf] }
 0xccc   : > { %v8474_v54 = vpop.eup %8473  ;;  %v3427_v14 = vmul.f32 1.442695, %v3422_v28 }
 0xccd   : > { %v3433_v29 = vsel %vm927_vm5, %v8474_v54, 0.0 }
 0xcce   : > { %8475 = vpow2.f32 %v3427_v14  ;;  %3434 = vadd.xlane.f32.xlu2 %v3433_v29  ;;  %v8182_v14 = vld [vmem:[#allocation7 + $0x804] sm:$0xf]  ;;  %v7409_v29 = vld [vmem:[#allocation7 + $0x844] sm:$0xf0] }
 0xccf   : > { %3565 = vmatpush.bf16.msrb.mxu0 %v8057_v59 }
 0xcd1   : > { %v3417_v12 = vpop.xlane.xlu1 %3416 }
 0xcd2   : > { %v3423_v30 = vsub.f32 %v3405_v35, %v3417_v12  ;;  %v7331_v12 = vld [vmem:[#allocation7 + $0x770] sm:$0xf] }
 0xcd3   : > { %3566 = vmatpush.bf16.msrb.mxu0 %v8056_v31  ;;  %v7129_v31 = vld [vmem:[#allocation7 + $0x61c] sm:$0xf0] }
 0xcd4   : > { %v8476_v36 = vpop.eup %8475  ;;  %v3429_v61 = vmul.f32 1.442695, %v3423_v30  ;;  %v7412_v30 = vor.u32 %v8182_v14, %v7409_v29 }
 0xcd5   : > { %v3436_v41 = vsel %vm927_vm5, %v8476_v36, 0.0 }
 0xcd6   : > { %8477 = vpow2.f32 %v3429_v61  ;;  %3437 = vadd.xlane.f32.xlu1 %v3436_v41  ;;  %v8164_v61 = vld [vmem:[#allocation7 + $0x774] sm:$0xf]  ;;  %v7333_v41 = vld [vmem:[#allocation7 + $0x7b4] sm:$0xf0] }
 0xcd7   : > { %3567 = vmatpush.bf16.msrb.mxu0 %v8055_v33  ;;  %v7135_v33 = vld [vmem:[#allocation7 + $0x5e0] sm:$0xf] }
 0xcd9   : > { %v3420_v5 = vpop.xlane.xlu0 %3419 }
 0xcda   : > { %v3424_v51 = vsub.f32 %v3407_v44, %v3420_v5  ;;  %v7339_v5 = vld [vmem:[#allocation7 + $0x778] sm:$0xf] }
 0xcdb   : > { %3568 = vmatpush.bf16.msrb.mxu0 %v8054_v10  ;;  %v8122_v10 = vld [vmem:[#allocation7 + $0x620] sm:$0xf0] }
 0xcdc   : > { %v8478_v38 = vpop.eup %8477  ;;  %v3431_v26 = vmul.f32 1.442695, %v3424_v51  ;;  %v8173_v51 = vld [vmem:[#allocation7 + $0x7b8] sm:$0xf0] }
 0xcdd   : > { %v3439_v40 = vsel %vm927_vm5, %v8478_v38, 0.0 }
 0xcde   : > { %3440 = vadd.xlane.f32.xlu0 %v3439_v40  ;;  %8479 = vpow2.f32 %v3431_v26  ;;  %v7336_v40 = vor.u32 %v8164_v61, %v7333_v41  ;;  %v8165_v26 = vld [vmem:[#allocation7 + $0x77c] sm:$0xf]  ;;  %v8079_v61 = vld [vmem:[#allocation7 + $0x4cc] sm:$0xf] }
 0xcdf   : > { %4473 = vmatpush.bf16.msra.mxu0 %v7412_v30  ;;  %v6991_v30 = vld [vmem:[#allocation7 + $0x4c8] sm:$0xf] }
 0xce4   : > { %v8480_v53 = vpop.eup %8479 }
 0xce5   : > { %v3442_v60 = vsel %vm927_vm5, %v8480_v53, 0.0 }
 0xce6   : > { %3372 = vrot.lane.b32.xlu2 %v3367_v58, %s8817_s29 }
 0xcec   : > { %v3371_v1 = vpop.permute.xlu0 %3370 }
 0xcef   : > { %3368 = vrot.lane.b32.xlu1 %v3367_v58, %s8818_s17  ;;  %v8181_v58 = vld [vmem:[#allocation7 + $0x7fc] sm:$0xf] }
 0xcf0   : > { %v7404_v28 = vor.u32 %v8181_v58, %v7401_v22  ;;  %v7061_v58 = vld [vmem:[#allocation7 + $0x594] sm:$0xf0]  ;;  %v8105_v22 = vld [vmem:[#allocation7 + $0x598] sm:$0xf0] }
 0xd0f   : > { %3443 = vadd.xlane.f32.xlu2 %v3442_v60  ;;  %v7341_v60 = vld [vmem:[#allocation7 + $0x7bc] sm:$0xf0] }
 0xd41   : > { %v3435_v63 = vpop.xlane.xlu2 %3434 }
 0xd49   : > { %v3373_v2 = vpop.permute.xlu2 %3372  ;;  %v3438_v62 = vpop.xlane.xlu1 %3437 }
 0xd4a   : > { %v3380_v32 = vsel %vm888_vm4, %v3371_v1, %v3373_v2  ;;  %8481 = vrcp.f32 %v3438_v62  ;;  %v8155_v1 = vld [vmem:[#allocation7 + $0x728] sm:$0xf0]  ;;  %v7344_v2 = vor.u32 %v8165_v26, %v7341_v60  ;;  %v7265_v62 = vld [vmem:[#allocation7 + $0x72c] sm:$0xf0]  ;;  %v8080_v26 = vld [vmem:[#allocation7 + $0x4d4] sm:$0xf] }
 0xd4b   : > { %3467 = vmatpush.bf16.msra.mxu2 %v3380_v32  ;;  %8483 = vrcp.f32 %v3435_v63  ;;  %v7263_v63 = vld [vmem:[#allocation7 + $0x6e8] sm:$0xf]  ;;  %v8147_v32 = vld [vmem:[#allocation7 + $0x6ec] sm:$0xf] }
 0xd4c   : > { %4474 = vmatpush.bf16.msra.mxu0 %v7344_v2 }
 0xd50   : > { %v8482_v4 = vpop.eup %8481 }
 0xd51   : > { %v8484_v13 = vpop.eup %8483  ;;  %v3450_v8 = vmul.f32 %v8482_v4, %v8476_v36  ;;  %v3441_v43 = vpop.xlane.xlu0 %3440  ;;  %v8172_v36 = vld [vmem:[#allocation7 + $0x7b0] sm:$0xf0]  ;;  %v7271_v4 = vld [vmem:[#allocation7 + $0x6f0] sm:$0xf] }
 0xd52   : > { %v3449_v9 = vmul.f32 %v8484_v13, %v8474_v54  ;;  %8485 = vrcp.f32 %v3441_v43  ;;  %v7408_v54 = vor.u32 %v8190_v7, %v7407_v27  ;;  %v7264_v13 = vor.u32 %v8155_v1, %v7263_v63  ;;  %v7195_v43 = vld [vmem:[#allocation7 + $0x660] sm:$0xf]  ;;  %v8097_v27 = vld [vmem:[#allocation7 + $0x55c] sm:$0xf] }
 0xd53   : > { %v7069_v7 = vld [vmem:[#allocation7 + $0x59c] sm:$0xf0] }
 0xd54   : > { %v3453_v20 = vpack.c.bf16 %v3450_v8, %v3449_v9  ;;  %4460 = vmatpush.bf16.msrb.mxu3 %v7408_v54  ;;  %v8156_v8 = vld [vmem:[#allocation7 + $0x730] sm:$0xf0]  ;;  %v7273_v9 = vld [vmem:[#allocation7 + $0x734] sm:$0xf0]  ;;  %v7072_v41 = vor.u32 %v8097_v27, %v7069_v7  ;;  %v6923_v63 = vld [vmem:[#allocation7 + $0x440] sm:$0xf] }
 0xd55   : > { %v7279_v27 = vld [vmem:[#allocation7 + $0x6f8] sm:$0xf]  ;;  %v8157_v7 = vld [vmem:[#allocation7 + $0x738] sm:$0xf0] }
 0xd58   : > { %v8486_v11 = vpop.eup %8485 }
 0xd59   : > { %v3451_v16 = vmul.f32 %v8486_v11, %v8478_v38  ;;  %v7332_v38 = vor.u32 %v8172_v36, %v7331_v12  ;;  %v8130_v11 = vld [vmem:[#allocation7 + $0x664] sm:$0xf]  ;;  %v8087_v36 = vld [vmem:[#allocation7 + $0x508] sm:$0xf0] }
 0xd5a   : > { %v6992_v60 = vor.u32 %v8087_v36, %v6991_v30 }
 0xd61   : > { %v3369_v39 = vpop.permute.xlu1 %3368 }
 0xd62   : > { %v3376_v24 = vsel %vm888_vm4, %v3334_v50, %v3369_v39  ;;  %v7399_v50 = vld [vmem:[#allocation7 + $0x7f8] sm:$0xf]  ;;  %v8148_v39 = vld [vmem:[#allocation7 + $0x6f4] sm:$0xf] }
 0xd63   : > { %3468 = vmatpush.bf16.msra.mxu2 %v3376_v24  ;;  %v7400_v21 = vor.u32 %v8189_v56, %v7399_v50  ;;  %v7268_v24 = vor.u32 %v8147_v32, %v7265_v62  ;;  %v8096_v50 = vld [vmem:[#allocation7 + $0x554] sm:$0xf]  ;;  %v8070_v62 = vld [vmem:[#allocation7 + $0x480] sm:$0xf0] }
 0xd64   : > { %v7064_v29 = vor.u32 %v8096_v50, %v7061_v58  ;;  %v8167_v58 = vld [vmem:[#allocation7 + $0x78c] sm:$0xf] }
 0xd65   : > { %4434 = vmatpush.bf16.msrb.mxu1 %v7400_v21  ;;  %v7067_v21 = vld [vmem:[#allocation7 + $0x558] sm:$0xf] }
 0xd66   : > { %6886 = vmatmul.msk.bf16.vlgmr.msra.gmra.mxu2 %vm927_vm5, %v3453_v20  ;;  %v7272_v20 = vor.u32 %v8156_v8, %v7271_v4  ;;  %v7068_v12 = vor.u32 %v8105_v22, %v7067_v21  ;;  %v8062_v4 = vld [vmem:[#allocation7 + $0x444] sm:$0xf]  ;;  %v7357_v21 = vld [vmem:[#allocation7 + $0x7cc] sm:$0xf0] }
 0xd67   : > { %4447 = vmatpush.bf16.msrb.mxu2 %v7404_v28  ;;  %v7360_v22 = vor.u32 %v8167_v58, %v7357_v21  ;;  %v7017_v58 = vld [vmem:[#allocation7 + $0x524] sm:$0xf0] }
 0xd69   : > { %4435 = vmatpush.bf16.msrb.mxu1 %v7332_v38  ;;  %v6993_v38 = vld [vmem:[#allocation7 + $0x50c] sm:$0xf0] }
 0xd6a   : > { %v6996_v2 = vor.u32 %v8079_v61, %v6993_v38  ;;  %v8150_v61 = vld [vmem:[#allocation7 + $0x704] sm:$0xf] }
 0xd6b   : > { %4448 = vmatpush.bf16.msrb.mxu2 %v7336_v40  ;;  %v6999_v40 = vld [vmem:[#allocation7 + $0x4d0] sm:$0xf] }
 0xd6d   : > { %4436 = vmatpush.bf16.msrb.mxu1 %v7264_v13  ;;  %v6925_v13 = vld [vmem:[#allocation7 + $0x484] sm:$0xf0] }
 0xd6f   : > { %4449 = vmatpush.bf16.msrb.mxu2 %v7268_v24  ;;  %v8063_v24 = vld [vmem:[#allocation7 + $0x44c] sm:$0xf] }
 0xd82   : > { %v3444_v45 = vpop.xlane.xlu2 %3443 }
 0xd83   : > { %8487 = vrcp.f32 %v3444_v45  ;;  %v8138_v45 = vld [vmem:[#allocation7 + $0x6a0] sm:$0xf0] }
 0xd89   : > { %v8488_v47 = vpop.eup %8487 }
 0xd8a   : > { %v3452_v37 = vmul.f32 %v8488_v47, %v8480_v53  ;;  %v7340_v53 = vor.u32 %v8173_v51, %v7339_v5  ;;  %v7276_v47 = vor.u32 %v8148_v39, %v7273_v9  ;;  %v8088_v5 = vld [vmem:[#allocation7 + $0x510] sm:$0xf0]  ;;  %v6931_v39 = vld [vmem:[#allocation7 + $0x448] sm:$0xf]  ;;  %v8071_v9 = vld [vmem:[#allocation7 + $0x488] sm:$0xf0] }
 0xd8b   : > { %v7000_v32 = vor.u32 %v8088_v5, %v6999_v40  ;;  %v7211_v40 = vld [vmem:[#allocation7 + $0x670] sm:$0xf]  ;;  %v8140_v5 = vld [vmem:[#allocation7 + $0x6b0] sm:$0xf0] }
 0xd8c   : > { %v3454_v49 = vpack.c.bf16 %v3452_v37, %v3451_v16  ;;  %4461 = vmatpush.bf16.msrb.mxu3 %v7340_v53  ;;  %v7197_v16 = vld [vmem:[#allocation7 + $0x6a4] sm:$0xf0]  ;;  %4475 = vmatpush.bf16.msra.mxu0 %v7276_v47  ;;  %v7001_v53 = vld [vmem:[#allocation7 + $0x514] sm:$0xf0] }
 0xd8d   : > { %v7203_v37 = vld [vmem:[#allocation7 + $0x668] sm:$0xf]  ;;  %v7004_v8 = vor.u32 %v8080_v26, %v7001_v53  ;;  %v7212_v26 = vor.u32 %v8140_v5, %v7211_v40  ;;  %v7213_v53 = vld [vmem:[#allocation7 + $0x6b4] sm:$0xf0] }
 0xd8e   : > { %6887 = vmatmul.msk.bf16.gmra.mxu2 %vm927_vm5, %v3454_v49  ;;  %v8139_v49 = vld [vmem:[#allocation7 + $0x6a8] sm:$0xf0] }
 0xd8f   : > { %v7204_v3 = vor.u32 %v8139_v49, %v7203_v37  ;;  %v7417_v37 = vld [vmem:[#allocation7 + $0x84c] sm:$0xf0] }
 0xd90   : > { %4462 = vmatpush.bf16.msrb.mxu3 %v7272_v20  ;;  %v7423_v49 = vld [vmem:[#allocation7 + $0x810] sm:$0xf] }
 0xd94   : > { %4463 = vmatpush.bf16.msrb.mxu3 %v7204_v3  ;;  %v7425_v3 = vld [vmem:[#allocation7 + $0x854] sm:$0xf0] }
 0xde9   : > { %v3470_v55 = vpop.f32.mrf.mxu2 }
 0xdf1   : > { %v3472_v17 = vpop.f32.mrf.mxu2 }
 0xdf2   : > { %3481 = vrot.lane.b32.xlu1 %v3472_v17, %s8817_s29  ;;  %v7205_v17 = vld [vmem:[#allocation7 + $0x6ac] sm:$0xf0]  ;;  %s8739_s29 = scalar_lea.hbm %s10041_s30, 32 }
 0xdf3   : > { %p8741_p4 = scmp.lt.s32.totalorder %s8739_s29, %s8735_s0 }
 0xdf5   : > { %p8742_p7 = por %p8741_p4, %p8740_p3 }
 0xdf7   : > { %p8743_p8 = pnand %p8742_p7, %p8738_p2 }
 0xe11   : > { %v3475_v23 = vpop.f32.mrf.mxu2 }
 0xe12   : > { %3485 = vrot.lane.b32.xlu1 %v3475_v23, %s8816_s24  ;;  %v7196_v23 = vor.u32 %v8138_v45, %v7195_v43  ;;  %v6933_v43 = vld [vmem:[#allocation7 + $0x48c] sm:$0xf0]  ;;  %v7415_v45 = vld [vmem:[#allocation7 + $0x808] sm:$0xf] }
 0xe14   : > { %4437 = vmatpush.bf16.msrb.mxu1 %v7196_v23  ;;  %v8192_v23 = vld [vmem:[#allocation7 + $0x850] sm:$0xf0] }
 0xe19   : > { %v3477_v19 = vpop.f32.mrf.mxu2 }
 0xe1a   : > { %3489 = vrot.lane.b32.xlu1 %v3477_v19, %s8818_s17  ;;  %v7200_v19 = vor.u32 %v8130_v11, %v7197_v16  ;;  %v8191_v11 = vld [vmem:[#allocation7 + $0x848] sm:$0xf0]  ;;  %v6924_v16 = vor.u32 %v8070_v62, %v6923_v63  ;;  %v8141_v63 = vld [vmem:[#allocation7 + $0x6b8] sm:$0xf0]  ;;  %v7221_v62 = vld [vmem:[#allocation7 + $0x6bc] sm:$0xf0] }
 0xe1b   : > { %s10040_s17 = sld [smem:[#allocation20_spill]] }
 0xe1c   : > { %4450 = vmatpush.bf16.msrb.mxu2 %v7200_v19  ;;  %v8184_v19 = vld [vmem:[#allocation7 + $0x814] sm:$0xf] }
 0xe21   : > { %s608_s20 = sand.u32 1, %s10040_s17  }
 0xe22   : > { %s5845_s27 = sshll.u32 %s608_s20, 4  ;;  %s5694_s23 = scalar_lea.sflag [#allocation4], %s608_s20 }
 0xe23   : > { %s610_s19 = scalar_lea.vmem [#allocation13], %s5845_s27 }
 0xe24   : > { %s5707_s16 = sshll.u32 %s610_s19, 4  ;;  %s5708_s16 = int_to_ptr.vmem [resolvable:$true] %s5707_s16 }
 0xe64   : > { %v3482_v15 = vpop.permute.xlu1 %3481 }
 0xe65   : > { %v3492_v25 = vsel %vm927_vm5, %v3470_v55, %v3482_v15  ;;  %v8131_v55 = vld [vmem:[#allocation7 + $0x66c] sm:$0xf]  ;;  %v8114_v15 = vld [vmem:[#allocation7 + $0x5e4] sm:$0xf] }
 0xe66   : > { %v7208_v59 = vor.u32 %v8131_v55, %v7205_v17  ;;  %v6928_v17 = vor.u32 %v8062_v4, %v6925_v13  ;;  %v7143_v13 = vld [vmem:[#allocation7 + $0x5e8] sm:$0xf] }
 0xe68   : > { %4476 = vmatpush.bf16.msra.mxu0 %v7208_v59  ;;  %v7416_v59 = vor.u32 %v8191_v11, %v7415_v45 }
 0xe84   : > { %v3486_v35 = vpop.permute.xlu1 %3485 }
 0xe85   : > { %v3493_v42 = vsel %vm1039_vm6, %v3492_v25, %v3486_v35  ;;  %v7137_v35 = vld [vmem:[#allocation7 + $0x624] sm:$0xf0]  ;;  %v7128_v25 = vor.u32 %v8121_v6, %v7127_v34  ;;  %v6932_v34 = vor.u32 %v8071_v9, %v6931_v39  ;;  %v6936_v6 = vor.u32 %v8063_v24, %v6933_v43  ;;  %v8115_v39 = vld [vmem:[#allocation7 + $0x5ec] sm:$0xf]  ;;  %v7145_v24 = vld [vmem:[#allocation7 + $0x62c] sm:$0xf0] }
 0xe86   : > { %v7140_v56 = vor.u32 %v8114_v15, %v7137_v35  ;;  %v7347_v15 = vld [vmem:[#allocation7 + $0x780] sm:$0xf]  ;;  %v8174_v35 = vld [vmem:[#allocation7 + $0x7c0] sm:$0xf0]  ;;  %v8124_v43 = vld [vmem:[#allocation7 + $0x630] sm:$0xf0]  ;;  %v7148_v45 = vor.u32 %v8115_v39, %v7145_v24 }
 0xe87   : > { %4438 = vmatpush.bf16.msrb.mxu1 %v7128_v25  ;;  %v8166_v25 = vld [vmem:[#allocation7 + $0x784] sm:$0xf]  ;;  %v8193_v39 = vld [vmem:[#allocation7 + $0x858] sm:$0xf0]  ;;  %v7433_v24 = vld [vmem:[#allocation7 + $0x85c] sm:$0xf0] }
 0xe88   : > { %4477 = vmatpush.bf16.msra.mxu0 %v7140_v56 }
 0xe8c   : > { %v3490_v52 = vpop.permute.xlu1 %3489  ;;  %4478 = vmatpush.bf16.msra.mxu0 %v7072_v41  ;;  %v7289_v41 = vld [vmem:[#allocation7 + $0x744] sm:$0xf0] }
 0xe8d   : > { %v3494_v44 = vsel %vm1041_vm7, %v3493_v42, %v3490_v52  ;;  %v7132_v42 = vor.u32 %v8113_v46, %v7129_v31  ;;  %v7136_v52 = vor.u32 %v8122_v10, %v7135_v33  ;;  %v7424_v33 = vor.u32 %v8192_v23, %v7423_v49  ;;  %v8106_v49 = vld [vmem:[#allocation7 + $0x5a0] sm:$0xf0] }
 0xe8e   : > { %v3495_v48 = vpack.c.bf16 %v3494_v44, %v3494_v44  ;;  %v7059_v44 = vld [vmem:[#allocation7 + $0x550] sm:$0xf]  ;;  %v7428_v10 = vor.u32 %v8184_v19, %v7425_v3  ;;  %v7292_v38 = vor.u32 %v8150_v61, %v7289_v41  ;;  %v7077_v19 = vld [vmem:[#allocation7 + $0x5a4] sm:$0xf0]  ;;  %v6949_v61 = vld [vmem:[#allocation7 + $0x49c] sm:$0xf0] }
 0xe8f   : > { %4451 = vmatpush.bf16.msrb.mxu2 %v7132_v42  ;;  %4464 = vmatpush.bf16.msrb.mxu3 %v7136_v52  ;;  %v7348_v42 = vor.u32 %v8174_v35, %v7347_v15  ;;  %v7349_v52 = vld [vmem:[#allocation7 + $0x7c4] sm:$0xf0]  ;;  %v8089_v15 = vld [vmem:[#allocation7 + $0x518] sm:$0xf0] }
 0xe90   : > { %3569 = vmatmul.bf16.vlgmr.msrb.gmra.mxu0 %v3495_v48  ;;  %v8104_v48 = vld [vmem:[#allocation7 + $0x590] sm:$0xf0]  ;;  %v7352_v50 = vor.u32 %v8166_v25, %v7349_v52  ;;  %v7083_v3 = vld [vmem:[#allocation7 + $0x568] sm:$0xf]  ;;  %v8081_v35 = vld [vmem:[#allocation7 + $0x4dc] sm:$0xf] }
 0xe91   : > { %v7060_v54 = vor.u32 %v8104_v48, %v7059_v44  ;;  %4479 = vmatpush.bf16.msra.mxu0 %v7004_v8  ;;  %v7355_v44 = vld [vmem:[#allocation7 + $0x788] sm:$0xf]  ;;  %v8175_v48 = vld [vmem:[#allocation7 + $0x7c8] sm:$0xf0]  ;;  %v7015_v52 = vld [vmem:[#allocation7 + $0x4e0] sm:$0xf] }
 0xe92   : > { %v7356_v56 = vor.u32 %v8175_v48, %v7355_v44  ;;  %v8123_v8 = vld [vmem:[#allocation7 + $0x628] sm:$0xf0]  ;;  %v8090_v44 = vld [vmem:[#allocation7 + $0x520] sm:$0xf0] }
 0xe93   : > { %4439 = vmatpush.bf16.msrb.mxu1 %v7060_v54  ;;  %4452 = vmatpush.bf16.msrb.mxu2 %v7064_v29  ;;  %v7280_v54 = vor.u32 %v8157_v7, %v7279_v27  ;;  %v7287_v29 = vld [vmem:[#allocation7 + $0x700] sm:$0xf]  ;;  %v7144_v9 = vor.u32 %v8123_v8, %v7143_v13  ;;  %v8072_v27 = vld [vmem:[#allocation7 + $0x490] sm:$0xf0]  ;;  %v7431_v8 = vld [vmem:[#allocation7 + $0x818] sm:$0xf] }
 0xe94   : > { %4465 = vmatpush.bf16.msrb.mxu3 %v7068_v12  ;;  %v8158_v12 = vld [vmem:[#allocation7 + $0x740] sm:$0xf0]  ;;  %v8064_v7 = vld [vmem:[#allocation7 + $0x454] sm:$0xf] }
 0xe95   : > { %4480 = vmatpush.bf16.msra.mxu0 %v6936_v6  ;;  %v7288_v36 = vor.u32 %v8158_v12, %v7287_v29  ;;  %v8073_v29 = vld [vmem:[#allocation7 + $0x498] sm:$0xf0] }
 0xe97   : > { %4440 = vmatpush.bf16.msrb.mxu1 %v6992_v60  ;;  %4453 = vmatpush.bf16.msrb.mxu2 %v6996_v2  ;;  %v7219_v60 = vld [vmem:[#allocation7 + $0x678] sm:$0xf] }
 0xe98   : > { %4466 = vmatpush.bf16.msrb.mxu3 %v7000_v32  ;;  %v7220_v2 = vor.u32 %v8141_v63, %v7219_v60  ;;  %v8133_v32 = vld [vmem:[#allocation7 + $0x67c] sm:$0xf] }
 0xe99   : > { %4525 = vmatpush.bf16.msrb.mxu0 %v7428_v10  ;;  %v7224_v4 = vor.u32 %v8133_v32, %v7221_v62  ;;  %v7007_v10 = vld [vmem:[#allocation7 + $0x4d8] sm:$0xf] }
 0xe9a   : > { %v7008_v25 = vor.u32 %v8089_v15, %v7007_v10  ;;  %v7295_v15 = vld [vmem:[#allocation7 + $0x708] sm:$0xf] }
 0xe9b   : > { %4441 = vmatpush.bf16.msrb.mxu1 %v6924_v16  ;;  %4454 = vmatpush.bf16.msrb.mxu2 %v6928_v17  ;;  %v7153_v16 = vld [vmem:[#allocation7 + $0x634] sm:$0xf0]  ;;  %v8098_v17 = vld [vmem:[#allocation7 + $0x564] sm:$0xf] }
 0xe9c   : > { %4467 = vmatpush.bf16.msrb.mxu3 %v6932_v34  ;;  %v8107_v34 = vld [vmem:[#allocation7 + $0x5a8] sm:$0xf0]  ;;  %v7080_v6 = vor.u32 %v8098_v17, %v7077_v19  ;;  %v8176_v17 = vld [vmem:[#allocation7 + $0x7d0] sm:$0xf0] }
 0xe9d   : > { %4526 = vmatpush.bf16.msrb.mxu0 %v7360_v22  ;;  %v6939_v22 = vld [vmem:[#allocation7 + $0x450] sm:$0xf] }
 0xe9f   : > { %4486 = vmatpush.bf16.msra.mxu1 %v7416_v59  ;;  %v8099_v59 = vld [vmem:[#allocation7 + $0x56c] sm:$0xf] }
 0xea0   : > { %4512 = vmatpush.bf16.msra.mxu3 %v7424_v33 }
 0xea1   : > { %4527 = vmatpush.bf16.msrb.mxu0 %v7292_v38 }
 0xea3   : > { %4487 = vmatpush.bf16.msra.mxu1 %v7348_v42  ;;  %v7009_v42 = vld [vmem:[#allocation7 + $0x51c] sm:$0xf0] }
 0xea4   : > { %4513 = vmatpush.bf16.msra.mxu3 %v7356_v56  ;;  %v7012_v48 = vor.u32 %v8081_v35, %v7009_v42  ;;  %v8082_v56 = vld [vmem:[#allocation7 + $0x4e4] sm:$0xf]  ;;  %v8159_v35 = vld [vmem:[#allocation7 + $0x748] sm:$0xf0] }
 0xea5   : > { %4528 = vmatpush.bf16.msrb.mxu0 %v7224_v4  ;;  %v7020_v21 = vor.u32 %v8082_v56, %v7017_v58  ;;  %v8152_v56 = vld [vmem:[#allocation7 + $0x714] sm:$0xf]  ;;  %v7305_v58 = vld [vmem:[#allocation7 + $0x754] sm:$0xf0] }
 0xea7   : > { %4488 = vmatpush.bf16.msra.mxu1 %v7280_v54  ;;  %v6941_v54 = vld [vmem:[#allocation7 + $0x494] sm:$0xf0] }
 0xea8   : > { %4514 = vmatpush.bf16.msra.mxu3 %v7288_v36  ;;  %v6944_v12 = vor.u32 %v8064_v7, %v6941_v54  ;;  %v8065_v36 = vld [vmem:[#allocation7 + $0x45c] sm:$0xf]  ;;  %v8142_v7 = vld [vmem:[#allocation7 + $0x6c0] sm:$0xf0]  ;;  %v7308_v54 = vor.u32 %v8152_v56, %v7305_v58  ;;  %v8067_v56 = vld [vmem:[#allocation7 + $0x46c] sm:$0xf] }
 0xea9   : > { %v6952_v41 = vor.u32 %v8065_v36, %v6949_v61  ;;  %v8135_v36 = vld [vmem:[#allocation7 + $0x68c] sm:$0xf]  ;;  %v7237_v61 = vld [vmem:[#allocation7 + $0x6cc] sm:$0xf0] }
 0xeaa   : > { %v6965_v58 = vld [vmem:[#allocation7 + $0x4ac] sm:$0xf0] }
 0xeab   : > { %4489 = vmatpush.bf16.msra.mxu1 %v7212_v26 }
 0xeac   : > { %4515 = vmatpush.bf16.msra.mxu3 %v7220_v2 }
 0xeaf   : > { %4490 = vmatpush.bf16.msra.mxu1 %v7144_v9  ;;  %v8185_v9 = vld [vmem:[#allocation7 + $0x81c] sm:$0xf] }
 0xf0d   : > { %v3570_v28 = vpop.f32.mrf.mxu0 }
 0xf0e   : > { %v3574_v14 = vpack.c.bf16 %v3570_v28, %v3570_v28  ;;  %v8149_v28 = vld [vmem:[#allocation7 + $0x6fc] sm:$0xf] }
 0xf10   : > { %v3575_v51 = vunpack.c.l.bf16 %v3574_v14  ;;  %v7281_v14 = vld [vmem:[#allocation7 + $0x73c] sm:$0xf0] }
 0xf11   : > { %v7284_v30 = vor.u32 %v8149_v28, %v7281_v14  ;;  %v6940_v28 = vor.u32 %v8072_v27, %v6939_v22  ;;  %v6947_v14 = vld [vmem:[#allocation7 + $0x458] sm:$0xf]  ;;  %v7227_v27 = vld [vmem:[#allocation7 + $0x680] sm:$0xf] }
 0xf12   : > { %v3576_v1 = vadd.f32 %v3575_v51, %v9459_v57  ;;  %v8183_v57 = vld [vmem:[#allocation7 + $0x80c] sm:$0xf]  ;;  %v8132_v51 = vld [vmem:[#allocation7 + $0x674] sm:$0xf] }
 0xf13   : > { %v7420_v31 = vor.u32 %v8183_v57, %v7417_v37  ;;  %v7075_v37 = vld [vmem:[#allocation7 + $0x560] sm:$0xf] }
 0xf14   : > { %v3577_v20 = vpack.c.bf16 %v3576_v1, %v3576_v1  ;;  %v7216_v1 = vor.u32 %v8132_v51, %v7213_v53  ;;  %v7076_v23 = vor.u32 %v8106_v49, %v7075_v37  ;;  %v6920_v53 = vld [vmem:[%s9983_s18 + $0x1] sm:$0x1]  ;;  %v7436_v37 = vor.u32 %v8185_v9, %v7433_v24  ;;  %v7363_v49 = vld [vmem:[#allocation7 + $0x790] sm:$0xf]  ;;  %v8100_v24 = vld [vmem:[#allocation7 + $0x574] sm:$0xf] }
 0xf15   : > { %v3572_v47 = vpop.f32.mrf.mxu0  ;;  %4499 = vmatpush.bf16.msra.mxu2 %v7420_v31  ;;  %v7085_v31 = vld [vmem:[#allocation7 + $0x5ac] sm:$0xf0] }
 0xf16   : > { %v9542_v55 = vunpack.c.l.bf16 %v3577_v20  ;;  %v7151_v20 = vld [vmem:[#allocation7 + $0x5f0] sm:$0xf]  ;;  %v8116_v47 = vld [vmem:[#allocation7 + $0x5f4] sm:$0xf]  ;;  %4491 = vmatpush.bf16.msra.mxu1 %v7076_v23  ;;  %v7088_v33 = vor.u32 %v8099_v59, %v7085_v31  ;;  %v8169_v59 = vld [vmem:[#allocation7 + $0x79c] sm:$0xf] }
 0xf17   : > { %v7152_v11 = vor.u32 %v8124_v43, %v7151_v20  ;;  %v7156_v57 = vor.u32 %v8116_v47, %v7153_v16  ;;  %v7439_v20 = vld [vmem:[#allocation7 + $0x820] sm:$0xf]  ;;  %v7441_v47 = vld [vmem:[#allocation7 + $0x864] sm:$0xf0] }
 0xf18   : > { %v3581_v46 = vmul.f32 %v9542_v55, %v9542_v55  ;;  %v7373_v31 = vld [vmem:[#allocation7 + $0x7dc] sm:$0xf0] }
 0xf19   : > { %4500 = vmatpush.bf16.msra.mxu2 %v7352_v50  ;;  %4516 = vmatpush.bf16.msra.mxu3 %v7152_v11  ;;  %v7016_v50 = vor.u32 %v8090_v44, %v7015_v52  ;;  %v8186_v11 = vld [vmem:[#allocation7 + $0x824] sm:$0xf]  ;;  %v7376_v42 = vor.u32 %v8169_v59, %v7373_v31  ;;  %v8151_v52 = vld [vmem:[#allocation7 + $0x70c] sm:$0xf]  ;;  %v7297_v44 = vld [vmem:[#allocation7 + $0x74c] sm:$0xf0] }
 0xf1a   : > { %3582 = vadd.xlane.f32.xlu1 %v3581_v46  ;;  %4529 = vmatpush.bf16.msrb.mxu0 %v7156_v57  ;;  %v7084_v46 = vor.u32 %v8107_v34, %v7083_v3  ;;  %v7432_v57 = vor.u32 %v8193_v39, %v7431_v8  ;;  %v7444_v19 = vor.u32 %v8186_v11, %v7441_v47  ;;  %v8168_v3 = vld [vmem:[#allocation7 + $0x794] sm:$0xf]  ;;  %v7365_v34 = vld [vmem:[#allocation7 + $0x7d4] sm:$0xf0]  ;;  %v8101_v11 = vld [vmem:[#allocation7 + $0x57c] sm:$0xf] }
 0xf1b   : > { %4492 = vmatpush.bf16.msra.mxu1 %v7008_v25  ;;  %v7368_v10 = vor.u32 %v8168_v3, %v7365_v34  ;;  %v7300_v22 = vor.u32 %v8151_v52, %v7297_v44  ;;  %v8108_v8 = vld [vmem:[#allocation7 + $0x5b0] sm:$0xf0]  ;;  %v7101_v47 = vld [vmem:[#allocation7 + $0x5bc] sm:$0xf0]  ;;  %v8083_v3 = vld [vmem:[#allocation7 + $0x4ec] sm:$0xf] }
 0xf1c   : > { %v7025_v34 = vld [vmem:[#allocation7 + $0x52c] sm:$0xf0]  ;;  %v8084_v59 = vld [vmem:[#allocation7 + $0x4f4] sm:$0xf]  ;;  %v7033_v31 = vld [vmem:[#allocation7 + $0x534] sm:$0xf0] }
 0xf1d   : > { %4501 = vmatpush.bf16.msra.mxu2 %v7284_v30  ;;  %4517 = vmatpush.bf16.msra.mxu3 %v7084_v46  ;;  %v6948_v30 = vor.u32 %v8073_v29, %v6947_v14  ;;  %v8177_v46 = vld [vmem:[#allocation7 + $0x7d8] sm:$0xf0]  ;;  %v8134_v14 = vld [vmem:[#allocation7 + $0x684] sm:$0xf]  ;;  %v7229_v29 = vld [vmem:[#allocation7 + $0x6c4] sm:$0xf0]  ;;  %v7036_v44 = vor.u32 %v8084_v59, %v7033_v31 }
 0xf1e   : > { %4530 = vmatpush.bf16.msrb.mxu0 %v7088_v33  ;;  %v7364_v33 = vor.u32 %v8176_v17, %v7363_v49  ;;  %v7023_v49 = vld [vmem:[#allocation7 + $0x4e8] sm:$0xf]  ;;  %v8091_v17 = vld [vmem:[#allocation7 + $0x528] sm:$0xf0]  ;;  %v8137_v59 = vld [vmem:[#allocation7 + $0x69c] sm:$0xf] }
 0xf1f   : > { %4493 = vmatpush.bf16.msra.mxu1 %v6940_v28  ;;  %v7253_v31 = vld [vmem:[#allocation7 + $0x6dc] sm:$0xf0] }
 0xf21   : > { %4502 = vmatpush.bf16.msra.mxu2 %v7216_v1  ;;  %4518 = vmatpush.bf16.msra.mxu3 %v7016_v50  ;;  %v3597_v1 = vunpack.c.l.bf16 %v6920_v53  ;;  %v8160_v50 = vld [vmem:[#allocation7 + $0x750] sm:$0xf0]  ;;  %v8117_v53 = vld [vmem:[#allocation7 + $0x5fc] sm:$0xf] }
 0xf22   : > { %4531 = vmatpush.bf16.msrb.mxu0 %v7020_v21  ;;  %v7296_v21 = vor.u32 %v8159_v35, %v7295_v15  ;;  %v7028_v15 = vor.u32 %v8083_v3, %v7025_v34  ;;  %v8074_v35 = vld [vmem:[#allocation7 + $0x4a0] sm:$0xf0]  ;;  %v8136_v3 = vld [vmem:[#allocation7 + $0x694] sm:$0xf]  ;;  %v7245_v34 = vld [vmem:[#allocation7 + $0x6d4] sm:$0xf0] }
 0xf23   : > { %v3598_v62 = vperm.slane %v3597_v1, 0  ;;  %v8126_v1 = vld [vmem:[#allocation7 + $0x640] sm:$0xf0] }
 0xf25   : > { %4503 = vmatpush.bf16.msra.mxu2 %v7148_v45  ;;  %4519 = vmatpush.bf16.msra.mxu3 %v6948_v30  ;;  %v8194_v45 = vld [vmem:[#allocation7 + $0x860] sm:$0xf0]  ;;  %v8143_v30 = vld [vmem:[#allocation7 + $0x6c8] sm:$0xf0] }
 0xf26   : > { %4532 = vmatpush.bf16.msrb.mxu0 %v6952_v41  ;;  %v7440_v23 = vor.u32 %v8194_v45, %v7439_v20  ;;  %v7228_v41 = vor.u32 %v8142_v7, %v7227_v27  ;;  %v7093_v20 = vld [vmem:[#allocation7 + $0x5b4] sm:$0xf0]  ;;  %v8109_v45 = vld [vmem:[#allocation7 + $0x5b8] sm:$0xf0]  ;;  %v8187_v27 = vld [vmem:[#allocation7 + $0x82c] sm:$0xf] }
 0xf27   : > { %v7449_v7 = vld [vmem:[#allocation7 + $0x86c] sm:$0xf0] }
 0xf29   : > { %4504 = vmatpush.bf16.msra.mxu2 %v7080_v6  ;;  %v7371_v6 = vld [vmem:[#allocation7 + $0x798] sm:$0xf] }
 0xf2a   : > { %v7372_v25 = vor.u32 %v8177_v46, %v7371_v6  ;;  %v7031_v6 = vld [vmem:[#allocation7 + $0x4f0] sm:$0xf]  ;;  %v8092_v46 = vld [vmem:[#allocation7 + $0x530] sm:$0xf0] }
 0xf2b   : > { %v7032_v52 = vor.u32 %v8092_v46, %v7031_v6  ;;  %v7251_v6 = vld [vmem:[#allocation7 + $0x698] sm:$0xf]  ;;  %v8145_v46 = vld [vmem:[#allocation7 + $0x6d8] sm:$0xf0] }
 0xf2d   : > { %4505 = vmatpush.bf16.msra.mxu2 %v7012_v48  ;;  %v7303_v48 = vld [vmem:[#allocation7 + $0x710] sm:$0xf] }
 0xf2e   : > { %v7304_v28 = vor.u32 %v8160_v50, %v7303_v48  ;;  %v6963_v48 = vld [vmem:[#allocation7 + $0x468] sm:$0xf]  ;;  %v8075_v50 = vld [vmem:[#allocation7 + $0x4a8] sm:$0xf0] }
 0xf31   : > { %4506 = vmatpush.bf16.msra.mxu2 %v6944_v12  ;;  %v7235_v12 = vld [vmem:[#allocation7 + $0x688] sm:$0xf] }
 0xf8d   : > { %v3583_v38 = vpop.xlane.xlu1 %3582 }
 0xf8e   : > { %v3584_v40 = vmul.f32 %v3583_v38, %v9022_v18  ;;  %v7232_v38 = vor.u32 %v8134_v14, %v7229_v29  ;;  %v8196_v29 = vld [vmem:[#allocation7 + $0x870] sm:$0xf0] }
 0xf90   : > { %v3585_v5 = vadd.f32 1e-06, %v3584_v40  ;;  %v7159_v40 = vld [vmem:[#allocation7 + $0x5f8] sm:$0xf] }
 0xf92   : > { %8489 = vrsqrt.f32 %v3585_v5  ;;  %vm3592_vm5 = vweird.f32 %v3585_v5 }
 0xf98   : > { %v8490_v51 = vpop.eup %8489 }
 0xf99   : > { %v3587_v26 = vmul.f32 %v8490_v51, %v3585_v5  ;;  %vm3593_vm4 = vweird.f32 %v8490_v51  ;;  %v8125_v5 = vld [vmem:[#allocation7 + $0x638] sm:$0xf0] }
 0xf9a   : > { %vm3594_vm6 = vmor %vm3592_vm5, %vm3593_vm4 }
 0xf9b   : > { %v3588_v60 = vmul.f32 %v8490_v51, %v3587_v26  ;;  %v7240_v26 = vor.u32 %v8135_v36, %v7237_v61  ;;  %v6964_v36 = vor.u32 %v8075_v50, %v6963_v48  ;;  %v6968_v61 = vor.u32 %v8067_v56, %v6965_v58  ;;  %v7183_v48 = vld [vmem:[#allocation7 + $0x610] sm:$0xf]  ;;  %v8128_v50 = vld [vmem:[#allocation7 + $0x650] sm:$0xf0]  ;;  %v7185_v58 = vld [vmem:[#allocation7 + $0x654] sm:$0xf0] }
 0xf9c   : > { %v8120_v56 = vld [vmem:[#allocation7 + $0x614] sm:$0xf] }
 0xf9d   : > { %v3589_v63 = vmul.f32 0.5, %v3588_v60  ;;  %v7161_v60 = vld [vmem:[#allocation7 + $0x63c] sm:$0xf0] }
 0xf9f   : > { %v3590_v2 = vsub.f32 1.5, %v3589_v63  ;;  %v7167_v63 = vld [vmem:[#allocation7 + $0x600] sm:$0xf] }
 0xfa0   : > { %v7168_v39 = vor.u32 %v8126_v1, %v7167_v63  ;;  %v7387_v63 = vld [vmem:[#allocation7 + $0x7a8] sm:$0xf]  ;;  %v8179_v1 = vld [vmem:[#allocation7 + $0x7e8] sm:$0xf0] }
 0xfa1   : > { %v3591_v32 = vmul.f32 %v8490_v51, %v3590_v2  ;;  %v8118_v2 = vld [vmem:[#allocation7 + $0x604] sm:$0xf] }
 0xfa3   : > { %v3595_v4 = vsel %vm3594_vm6, %v8490_v51, %v3591_v32  ;;  %v7236_v51 = vor.u32 %v8143_v30, %v7235_v12  ;;  %v7169_v32 = vld [vmem:[#allocation7 + $0x644] sm:$0xf0]  ;;  %v8188_v12 = vld [vmem:[#allocation7 + $0x834] sm:$0xf]  ;;  %v7457_v30 = vld [vmem:[#allocation7 + $0x874] sm:$0xf0] }
 0xfa4   : > { %v3596_v13 = vmul.f32 %v3595_v4, %v9542_v55  ;;  %v7164_v4 = vor.u32 %v8117_v53, %v7161_v60  ;;  %v7172_v9 = vor.u32 %v8118_v2, %v7169_v32  ;;  %v8170_v53 = vld [vmem:[#allocation7 + $0x7a4] sm:$0xf]  ;;  %v7381_v60 = vld [vmem:[#allocation7 + $0x7e4] sm:$0xf0]  ;;  %v8171_v2 = vld [vmem:[#allocation7 + $0x7ac] sm:$0xf] }
 0xfa5   : > { %v7389_v32 = vld [vmem:[#allocation7 + $0x7ec] sm:$0xf0] }
 0xfa6   : > { %v3599_v43 = vmul.f32 %v3598_v62, %v3596_v13  ;;  %v7160_v62 = vor.u32 %v8125_v5, %v7159_v40  ;;  %v7091_v13 = vld [vmem:[#allocation7 + $0x570] sm:$0xf]  ;;  %v7379_v40 = vld [vmem:[#allocation7 + $0x7a0] sm:$0xf]  ;;  %v8178_v5 = vld [vmem:[#allocation7 + $0x7e0] sm:$0xf0] }
 0xfa8   : > { %v9551_v16 = vpack.c.bf16 %v3599_v43, %v3599_v43  ;;  %v7099_v43 = vld [vmem:[#allocation7 + $0x578] sm:$0xf] }
 0xfaa   : > { %4442 = vmatmul.bf16.vlgmr.msrb.gmra.mxu1 %v9551_v16  ;;  %4455 = vmatmul.bf16.vlgmr.msrb.gmra.mxu2 %v9551_v16 }
 0xfab   : > { %4468 = vmatmul.bf16.vlgmr.msrb.gmra.mxu3 %v9551_v16  ;;  %4481 = vmatmul.bf16.vlgmr.msra.gmra.mxu0 %v9551_v16 }
 0xfac   : > { %4538 = vmatpush.bf16.msrb.mxu1 %v7432_v57  ;;  %4551 = vmatpush.bf16.msrb.mxu2 %v7436_v37  ;;  %v7092_v57 = vor.u32 %v8108_v8, %v7091_v13  ;;  %v7096_v37 = vor.u32 %v8100_v24, %v7093_v20  ;;  %v7311_v13 = vld [vmem:[#allocation7 + $0x718] sm:$0xf]  ;;  %v8161_v8 = vld [vmem:[#allocation7 + $0x758] sm:$0xf0]  ;;  %v7313_v20 = vld [vmem:[#allocation7 + $0x75c] sm:$0xf0] }
 0xfad   : > { %4564 = vmatpush.bf16.msrb.mxu3 %v7440_v23  ;;  %4577 = vmatpush.bf16.msra.mxu0 %v7444_v19  ;;  %v7100_v23 = vor.u32 %v8109_v45, %v7099_v43  ;;  %v7104_v19 = vor.u32 %v8101_v11, %v7101_v47  ;;  %v8153_v24 = vld [vmem:[#allocation7 + $0x71c] sm:$0xf]  ;;  %v7319_v43 = vld [vmem:[#allocation7 + $0x720] sm:$0xf]  ;;  %v8162_v45 = vld [vmem:[#allocation7 + $0x760] sm:$0xf0] }
 0xfae   : > { %v8154_v11 = vld [vmem:[#allocation7 + $0x724] sm:$0xf]  ;;  %v7321_v47 = vld [vmem:[#allocation7 + $0x764] sm:$0xf0] }
 0xfb0   : > { %4539 = vmatpush.bf16.msrb.mxu1 %v7364_v33  ;;  %4552 = vmatpush.bf16.msrb.mxu2 %v7368_v10  ;;  %v6955_v33 = vld [vmem:[#allocation7 + $0x460] sm:$0xf]  ;;  %v7024_v10 = vor.u32 %v8091_v17, %v7023_v49  ;;  %v7243_v49 = vld [vmem:[#allocation7 + $0x690] sm:$0xf]  ;;  %v8144_v17 = vld [vmem:[#allocation7 + $0x6d0] sm:$0xf0] }
 0xfb1   : > { %4565 = vmatpush.bf16.msrb.mxu3 %v7372_v25  ;;  %4578 = vmatpush.bf16.msra.mxu0 %v7376_v42  ;;  %v8066_v25 = vld [vmem:[#allocation7 + $0x464] sm:$0xf]  ;;  %v6957_v42 = vld [vmem:[#allocation7 + $0x4a4] sm:$0xf0] }
 0xfb2   : > { %v6960_v14 = vor.u32 %v8066_v25, %v6957_v42  ;;  %v7252_v25 = vor.u32 %v8145_v46, %v7251_v6  ;;  %v7256_v42 = vor.u32 %v8137_v59, %v7253_v31  ;;  %v8180_v6 = vld [vmem:[#allocation7 + $0x7f0] sm:$0xf0]  ;;  %v7327_v59 = vld [vmem:[#allocation7 + $0x728] sm:$0xf]  ;;  %v8163_v31 = vld [vmem:[#allocation7 + $0x768] sm:$0xf0] }
 0xfb4   : > { %4540 = vmatpush.bf16.msrb.mxu1 %v7296_v21  ;;  %4553 = vmatpush.bf16.msrb.mxu2 %v7300_v22  ;;  %v7447_v21 = vld [vmem:[#allocation7 + $0x828] sm:$0xf]  ;;  %v8195_v22 = vld [vmem:[#allocation7 + $0x868] sm:$0xf0] }
 0xfb5   : > { %4566 = vmatpush.bf16.msrb.mxu3 %v7304_v28  ;;  %4579 = vmatpush.bf16.msra.mxu0 %v7308_v54  ;;  %v7455_v28 = vld [vmem:[#allocation7 + $0x830] sm:$0xf]  ;;  %v6956_v54 = vor.u32 %v8074_v35, %v6955_v33  ;;  %v7244_v33 = vor.u32 %v8144_v17, %v7243_v49  ;;  %v8127_v35 = vld [vmem:[#allocation7 + $0x648] sm:$0xf0] }
 0xfb8   : > { %4541 = vmatpush.bf16.msrb.mxu1 %v7228_v41  ;;  %4554 = vmatpush.bf16.msrb.mxu2 %v7232_v38  ;;  %v7448_v41 = vor.u32 %v8195_v22, %v7447_v21  ;;  %v7452_v38 = vor.u32 %v8187_v27, %v7449_v7  ;;  %v7107_v27 = vld [vmem:[#allocation7 + $0x580] sm:$0xf]  ;;  %v8110_v7 = vld [vmem:[#allocation7 + $0x5c0] sm:$0xf0] }
 0xfb9   : > { %4567 = vmatpush.bf16.msrb.mxu3 %v7236_v51  ;;  %4580 = vmatpush.bf16.msra.mxu0 %v7240_v26  ;;  %v7456_v51 = vor.u32 %v8196_v29, %v7455_v28  ;;  %v7460_v26 = vor.u32 %v8188_v12, %v7457_v30  ;;  %v7184_v28 = vor.u32 %v8128_v50, %v7183_v48  ;;  %v7109_v29 = vld [vmem:[#allocation7 + $0x5c4] sm:$0xf0]  ;;  %v8111_v30 = vld [vmem:[#allocation7 + $0x5c8] sm:$0xf0]  ;;  %v8112_v48 = vld [vmem:[#allocation7 + $0x5d0] sm:$0xf0] }
 0xfba   : > { %4494 = vmatmul.bf16.vlgmr.msra.gmra.mxu1 %v9551_v16  ;;  %4507 = vmatmul.bf16.vlgmr.msra.gmra.mxu2 %v9551_v16  ;;  %v7115_v12 = vld [vmem:[#allocation7 + $0x588] sm:$0xf] }
 0xfbb   : > { %4520 = vmatmul.bf16.vlgmr.msra.gmra.mxu3 %v9551_v16  ;;  %4533 = vmatmul.bf16.vlgmr.msrb.gmra.mxu0 %v9551_v16 }
 0xfbc   : > { %4542 = vmatpush.bf16.msrb.mxu1 %v7160_v62  ;;  %4555 = vmatpush.bf16.msrb.mxu2 %v7164_v4  ;;  %v7380_v62 = vor.u32 %v8178_v5, %v7379_v40  ;;  %v7384_v4 = vor.u32 %v8170_v53, %v7381_v60  ;;  %v7039_v40 = vld [vmem:[#allocation7 + $0x4f8] sm:$0xf]  ;;  %v8093_v5 = vld [vmem:[#allocation7 + $0x538] sm:$0xf0]  ;;  %v7041_v60 = vld [vmem:[#allocation7 + $0x53c] sm:$0xf0] }
 0xfbd   : > { %4568 = vmatpush.bf16.msrb.mxu3 %v7168_v39  ;;  %4581 = vmatpush.bf16.msra.mxu0 %v7172_v9  ;;  %v7388_v39 = vor.u32 %v8179_v1, %v7387_v63  ;;  %v7392_v9 = vor.u32 %v8171_v2, %v7389_v32  ;;  %v8085_v53 = vld [vmem:[#allocation7 + $0x4fc] sm:$0xf]  ;;  %v7047_v63 = vld [vmem:[#allocation7 + $0x500] sm:$0xf]  ;;  %v8094_v1 = vld [vmem:[#allocation7 + $0x540] sm:$0xf0] }
 0xfbe   : > { %v8086_v2 = vld [vmem:[#allocation7 + $0x504] sm:$0xf]  ;;  %v7049_v32 = vld [vmem:[#allocation7 + $0x544] sm:$0xf0] }
 0xfc0   : > { %4543 = vmatpush.bf16.msrb.mxu1 %v7092_v57  ;;  %4556 = vmatpush.bf16.msrb.mxu2 %v7096_v37  ;;  %v7312_v57 = vor.u32 %v8161_v8, %v7311_v13  ;;  %v7316_v37 = vor.u32 %v8153_v24, %v7313_v20  ;;  %v6971_v13 = vld [vmem:[#allocation7 + $0x470] sm:$0xf]  ;;  %v8076_v8 = vld [vmem:[#allocation7 + $0x4b0] sm:$0xf0]  ;;  %v6973_v20 = vld [vmem:[#allocation7 + $0x4b4] sm:$0xf0] }
 0xfc1   : > { %4569 = vmatpush.bf16.msrb.mxu3 %v7100_v23  ;;  %4582 = vmatpush.bf16.msra.mxu0 %v7104_v19  ;;  %v7320_v23 = vor.u32 %v8162_v45, %v7319_v43  ;;  %v7324_v19 = vor.u32 %v8154_v11, %v7321_v47  ;;  %v8068_v24 = vld [vmem:[#allocation7 + $0x474] sm:$0xf]  ;;  %v6979_v43 = vld [vmem:[#allocation7 + $0x478] sm:$0xf]  ;;  %v8077_v45 = vld [vmem:[#allocation7 + $0x4b8] sm:$0xf0]  ;;  %v6972_v49 = vor.u32 %v8076_v8, %v6971_v13 }
 0xfc2   : > { %v8069_v11 = vld [vmem:[#allocation7 + $0x47c] sm:$0xf]  ;;  %v6981_v47 = vld [vmem:[#allocation7 + $0x4bc] sm:$0xf0]  ;;  %v6976_v17 = vor.u32 %v8068_v24, %v6973_v20 }
 0xfc4   : > { %4544 = vmatpush.bf16.msrb.mxu1 %v7024_v10  ;;  %4557 = vmatpush.bf16.msrb.mxu2 %v7028_v15  ;;  %v7248_v10 = vor.u32 %v8136_v3, %v7245_v34  ;;  %v7175_v15 = vld [vmem:[#allocation7 + $0x608] sm:$0xf]  ;;  %v7395_v34 = vld [vmem:[#allocation7 + $0x7b0] sm:$0xf] }
 0xfc5   : > { %4570 = vmatpush.bf16.msrb.mxu3 %v7032_v52  ;;  %4583 = vmatpush.bf16.msra.mxu0 %v7036_v44  ;;  %v8119_v52 = vld [vmem:[#allocation7 + $0x60c] sm:$0xf]  ;;  %v7177_v44 = vld [vmem:[#allocation7 + $0x64c] sm:$0xf0]  ;;  %v7176_v21 = vor.u32 %v8127_v35, %v7175_v15  ;;  %v7396_v46 = vor.u32 %v8180_v6, %v7395_v34  ;;  %v8146_v15 = vld [vmem:[#allocation7 + $0x6e0] sm:$0xf0] }
 0xfc6   : > { %v7180_v22 = vor.u32 %v8119_v52, %v7177_v44  ;;  %v7123_v44 = vld [vmem:[#allocation7 + $0x590] sm:$0xf] }
 0xfc7   : > { %v7124_v50 = vor.u32 %v8112_v48, %v7123_v44  ;;  %v8212_v44 = vld [vmem:[#allocation8 + $0x270] sm:$0xff] }
 0xfc8   : > { %4545 = vmatpush.bf16.msrb.mxu1 %v6956_v54  ;;  %4558 = vmatpush.bf16.msrb.mxu2 %v6960_v14  ;;  %v7188_v54 = vor.u32 %v8120_v56, %v7185_v58  ;;  %v8102_v14 = vld [vmem:[#allocation7 + $0x584] sm:$0xf]  ;;  %v7055_v56 = vld [vmem:[#allocation7 + $0x508] sm:$0xf]  ;;  %v8095_v58 = vld [vmem:[#allocation7 + $0x548] sm:$0xf0] }
 0xfc9   : > { %4571 = vmatpush.bf16.msrb.mxu3 %v6964_v36  ;;  %4584 = vmatpush.bf16.msra.mxu0 %v6968_v61  ;;  %v8103_v36 = vld [vmem:[#allocation7 + $0x58c] sm:$0xf]  ;;  %v7117_v61 = vld [vmem:[#allocation7 + $0x5cc] sm:$0xf0] }
 0xfca   : > { %v8220_v48 = vld [vmem:[#allocation8 + $0x2b0] sm:$0xff] }
 0xfcb   : > { %4546 = vmatmul.bf16.vlgmr.msrb.gmra.mxu1 %v9551_v16  ;;  %4559 = vmatmul.bf16.vlgmr.msrb.gmra.mxu2 %v9551_v16 }
 0xfcc   : > { %4590 = vmatpush.bf16.msra.mxu1 %v7448_v41  ;;  %4603 = vmatpush.bf16.msra.mxu2 %v7452_v38  ;;  %v7108_v41 = vor.u32 %v8110_v7, %v7107_v27  ;;  %v7112_v38 = vor.u32 %v8102_v14, %v7109_v29  ;;  %v8078_v27 = vld [vmem:[#allocation7 + $0x4c0] sm:$0xf0] }
 0xfcd   : > { %4616 = vmatpush.bf16.msra.mxu3 %v7456_v51  ;;  %4629 = vmatpush.bf16.msrb.mxu0 %v7460_v26  ;;  %v7116_v51 = vor.u32 %v8111_v30, %v7115_v12  ;;  %v7120_v26 = vor.u32 %v8103_v36, %v7117_v61 }
 0xfce   : > { %4572 = vmatmul.bf16.vlgmr.msrb.gmra.mxu3 %v9551_v16  ;;  %4585 = vmatmul.bf16.vlgmr.msra.gmra.mxu0 %v9551_v16 }
 0xfd0   : > { %4591 = vmatpush.bf16.msra.mxu1 %v7380_v62  ;;  %4604 = vmatpush.bf16.msra.mxu2 %v7384_v4  ;;  %v7040_v62 = vor.u32 %v8093_v5, %v7039_v40  ;;  %v7044_v4 = vor.u32 %v8085_v53, %v7041_v60 }
 0xfd1   : > { %4617 = vmatpush.bf16.msra.mxu3 %v7388_v39  ;;  %4630 = vmatpush.bf16.msrb.mxu0 %v7392_v9  ;;  %v7048_v39 = vor.u32 %v8094_v1, %v7047_v63  ;;  %v7052_v9 = vor.u32 %v8086_v2, %v7049_v32 }
 0xfd4   : > { %4592 = vmatpush.bf16.msra.mxu1 %v7312_v57  ;;  %4605 = vmatpush.bf16.msra.mxu2 %v7316_v37  ;;  %v7463_v57 = vld [vmem:[#allocation7 + $0x838] sm:$0xf]  ;;  %v8197_v37 = vld [vmem:[#allocation7 + $0x878] sm:$0xf0] }
 0xfd5   : > { %4618 = vmatpush.bf16.msra.mxu3 %v7320_v23  ;;  %4631 = vmatpush.bf16.msrb.mxu0 %v7324_v19  ;;  %v6980_v23 = vor.u32 %v8077_v45, %v6979_v43  ;;  %v6984_v19 = vor.u32 %v8069_v11, %v6981_v47  ;;  %v7464_v3 = vor.u32 %v8197_v37, %v7463_v57 }
 0xfd8   : > { %4593 = vmatpush.bf16.msra.mxu1 %v7244_v33  ;;  %4606 = vmatpush.bf16.msra.mxu2 %v7248_v10  ;;  %v7328_v33 = vor.u32 %v8163_v31, %v7327_v59  ;;  %v7259_v10 = vld [vmem:[#allocation7 + $0x6a0] sm:$0xf] }
 0xfd9   : > { %4619 = vmatpush.bf16.msra.mxu3 %v7252_v25  ;;  %4632 = vmatpush.bf16.msrb.mxu0 %v7256_v42  ;;  %v7260_v35 = vor.u32 %v8146_v15, %v7259_v10  ;;  %v7191_v25 = vld [vmem:[#allocation7 + $0x618] sm:$0xf]  ;;  %v8129_v42 = vld [vmem:[#allocation7 + $0x658] sm:$0xf0] }
 0xfda   : > { %v7192_v52 = vor.u32 %v8129_v42, %v7191_v25  ;;  %v8205_v15 = vld [vmem:[#allocation8 + $0x238] sm:$0xff] }
 0xfdb   : > { %v8221_v25 = vld [vmem:[#allocation8 + $0x2b8] sm:$0xff] }
 0xfdc   : > { %4594 = vmatpush.bf16.msra.mxu1 %v7176_v21  ;;  %4607 = vmatpush.bf16.msra.mxu2 %v7180_v22  ;;  %v7056_v21 = vor.u32 %v8095_v58, %v7055_v56  ;;  %v6987_v22 = vld [vmem:[#allocation7 + $0x480] sm:$0xf]  ;;  %v8229_v42 = vld [vmem:[#allocation8 + $0x2f8] sm:$0xff]  ;;  %v8203_v56 = vld [vmem:[#allocation8 + $0x228] sm:$0xff] }
 0xfdd   : > { %4620 = vmatpush.bf16.msra.mxu3 %v7184_v28  ;;  %4633 = vmatpush.bf16.msrb.mxu0 %v7188_v54  ;;  %v6988_v7 = vor.u32 %v8078_v27, %v6987_v22  ;;  %v8211_v58 = vld [vmem:[#allocation8 + $0x268] sm:$0xff]  ;;  %v8202_v22 = vld [vmem:[#allocation8 + $0x220] sm:$0xff] }
 0xfde   : > { %v8210_v27 = vld [vmem:[#allocation8 + $0x260] sm:$0xff] }
 0xfe0   : > { %4595 = vmatpush.bf16.msra.mxu1 %v7108_v41  ;;  %4608 = vmatpush.bf16.msra.mxu2 %v7112_v38 }
 0xfe1   : > { %4621 = vmatpush.bf16.msra.mxu3 %v7116_v51  ;;  %4634 = vmatpush.bf16.msrb.mxu0 %v7120_v26 }
 0xfe4   : > { %4596 = vmatpush.bf16.msra.mxu1 %v7040_v62  ;;  %4609 = vmatpush.bf16.msra.mxu2 %v7044_v4 }
 0xfe5   : > { %4622 = vmatpush.bf16.msra.mxu3 %v7048_v39  ;;  %4635 = vmatpush.bf16.msrb.mxu0 %v7052_v9 }
 0xfe8   : > { %4597 = vmatpush.bf16.msra.mxu1 %v6972_v49  ;;  %4610 = vmatpush.bf16.msra.mxu2 %v6976_v17 }
 0xfe9   : > { %4623 = vmatpush.bf16.msra.mxu3 %v6980_v23  ;;  %4636 = vmatpush.bf16.msrb.mxu0 %v6984_v19 }
 0xfeb   : > { %4598 = vmatmul.bf16.vlgmr.msra.gmra.mxu1 %v9551_v16  ;;  %4611 = vmatmul.bf16.vlgmr.msra.gmra.mxu2 %v9551_v16 }
 0xfec   : > { %4642 = vmatpush.bf16.msrb.mxu1 %v7464_v3  ;;  %4624 = vmatmul.bf16.vlgmr.msra.gmra.mxu3 %v9551_v16 }
 0xfed   : > { %4637 = vmatmul.bf16.vlgmr.msrb.gmra.mxu0 %v9551_v16  ;;  %5439 = vmatpush.bf16.msrb.mxu2 %v8205_v15 }
 0xfee   : > { %5465 = vmatpush.bf16.msra.mxu0 %v8221_v25 }
 0xff0   : > { %4643 = vmatpush.bf16.msrb.mxu1 %v7396_v46 }
 0xff2   : > { %5466 = vmatpush.bf16.msra.mxu0 %v8220_v48 }
 0xff4   : > { %4644 = vmatpush.bf16.msrb.mxu1 %v7328_v33 }
 0xff8   : > { %4645 = vmatpush.bf16.msrb.mxu1 %v7260_v35  ;;  %v8213_v35 = vld [vmem:[#allocation8 + $0x278] sm:$0xff] }
 0xff9   : > { %5452 = vmatpush.bf16.msrb.mxu3 %v8213_v35 }
 0xffc   : > { %4646 = vmatpush.bf16.msrb.mxu1 %v7192_v52  ;;  %v8204_v52 = vld [vmem:[#allocation8 + $0x230] sm:$0xff] }
 0xffd   : > { %5440 = vmatpush.bf16.msrb.mxu2 %v8204_v52  ;;  %5453 = vmatpush.bf16.msrb.mxu3 %v8212_v44 }
0x1000   : > { %4647 = vmatpush.bf16.msrb.mxu1 %v7124_v50  ;;  %v8228_v50 = vld [vmem:[#allocation8 + $0x2f0] sm:$0xff] }
0x1001   : > { %5441 = vmatpush.bf16.msrb.mxu2 %v8203_v56  ;;  %5454 = vmatpush.bf16.msrb.mxu3 %v8211_v58 }
0x1004   : > { %4648 = vmatpush.bf16.msrb.mxu1 %v7056_v21  ;;  %v8227_v21 = vld [vmem:[#allocation8 + $0x2e8] sm:$0xff] }
0x1005   : > { %5442 = vmatpush.bf16.msrb.mxu2 %v8202_v22  ;;  %5455 = vmatpush.bf16.msrb.mxu3 %v8210_v27 }
0x1008   : > { %4649 = vmatpush.bf16.msrb.mxu1 %v6988_v7  ;;  %v8218_v7 = vld [vmem:[#allocation8 + $0x2a0] sm:$0xff] }
0x100b   : > { %4650 = vmatmul.bf16.vlgmr.msrb.gmra.mxu1 %v9551_v16 }
0x100c   : > { %5478 = vmatpush.bf16.msra.mxu1 %v8229_v42 }
0x1010   : > { %5479 = vmatpush.bf16.msra.mxu1 %v8228_v50 }
0x1014   : > { %5480 = vmatpush.bf16.msra.mxu1 %v8227_v21 }
0x1027   : > { %v9570_v28 = vpop.f32.mrf.mxu1 }
0x1028   : > { %v9572_v54 = vpop.f32.mrf.mxu0 }
0x102d   : > { %v9574_v14 = vpop.f32.mrf.mxu2 }
0x102e   : > { %v9576_v29 = vpop.f32.mrf.mxu3 }
0x102f   : > { %v4445_v12 = vpop.f32.mrf.mxu1 }
0x1030   : > { %v4484_v30 = vpop.f32.mrf.mxu0  ;;  %v8226_v12 = vld [vmem:[#allocation8 + $0x2e0] sm:$0xff] }
0x1031   : > { %v8201_v30 = vld [vmem:[#allocation8 + $0x218] sm:$0xff]  ;;  %5481 = vmatpush.bf16.msra.mxu1 %v8226_v12 }
0x1032   : > { %5443 = vmatpush.bf16.msrb.mxu2 %v8201_v30 }
0x1035   : > { %v4458_v36 = vpop.f32.mrf.mxu2 }
0x1036   : > { %v4471_v61 = vpop.f32.mrf.mxu3  ;;  %v8209_v36 = vld [vmem:[#allocation8 + $0x258] sm:$0xff] }
0x1037   : > { %v9578_v41 = vpop.f32.mrf.mxu1  ;;  %v8217_v61 = vld [vmem:[#allocation8 + $0x298] sm:$0xff]  ;;  %5456 = vmatpush.bf16.msrb.mxu3 %v8209_v36 }
0x1038   : > { %v9580_v38 = vpop.f32.mrf.mxu0 }
0x103d   : > { %v9582_v40 = vpop.f32.mrf.mxu2 }
0x103e   : > { %v9584_v5 = vpop.f32.mrf.mxu3 }
0x103f   : > { %v4497_v16 = vpop.f32.mrf.mxu1 }
0x1040   : > { %v4536_v51 = vpop.f32.mrf.mxu0  ;;  %v8225_v16 = vld [vmem:[#allocation8 + $0x2d8] sm:$0xff] }
0x1041   : > { %v8200_v51 = vld [vmem:[#allocation8 + $0x210] sm:$0xff]  ;;  %5482 = vmatpush.bf16.msra.mxu1 %v8225_v16 }
0x1042   : > { %5444 = vmatpush.bf16.msrb.mxu2 %v8200_v51 }
0x1045   : > { %v4510_v26 = vpop.f32.mrf.mxu2 }
0x1046   : > { %v4523_v53 = vpop.f32.mrf.mxu3  ;;  %v8208_v26 = vld [vmem:[#allocation8 + $0x250] sm:$0xff] }
0x1047   : > { %v8216_v53 = vld [vmem:[#allocation8 + $0x290] sm:$0xff]  ;;  %5457 = vmatpush.bf16.msrb.mxu3 %v8208_v26 }
0x1048   : > { %v9586_v60 = vpop.f32.mrf.mxu1 }
0x104b   : > { %v9588_v63 = vpop.f32.mrf.mxu0 }
0x104e   : > { %v9590_v1 = vpop.f32.mrf.mxu2 }
0x1050   : > { %v4549_v32 = vpop.f32.mrf.mxu1 }
0x1051   : > { %v9592_v2 = vpop.f32.mrf.mxu3  ;;  %v8224_v32 = vld [vmem:[#allocation8 + $0x2d0] sm:$0xff] }
0x1052   : > { %5483 = vmatpush.bf16.msra.mxu1 %v8224_v32  ;;  %v8206_v32 = vld [vmem:[#allocation8 + $0x240] sm:$0xff] }
0x1053   : > { %v4588_v62 = vpop.f32.mrf.mxu0 }
0x1054   : > { %v8199_v62 = vld [vmem:[#allocation8 + $0x208] sm:$0xff] }
0x1055   : > { %5445 = vmatpush.bf16.msrb.mxu2 %v8199_v62  ;;  %v8214_v62 = vld [vmem:[#allocation8 + $0x280] sm:$0xff] }
0x1056   : > { %v4562_v4 = vpop.f32.mrf.mxu2 }
0x1057   : > { %v8207_v4 = vld [vmem:[#allocation8 + $0x248] sm:$0xff] }
0x1058   : > { %5458 = vmatpush.bf16.msrb.mxu3 %v8207_v4  ;;  %v8222_v4 = vld [vmem:[#allocation8 + $0x2c0] sm:$0xff] }
0x1059   : > { %v4575_v13 = vpop.f32.mrf.mxu3 }
0x105a   : > { %v8215_v13 = vld [vmem:[#allocation8 + $0x288] sm:$0xff] }
0x105c   : > { %5459 = vmatpush.bf16.msrb.mxu3 %v8206_v32 }
0x1068   : > { %v9594_v8 = vpop.f32.mrf.mxu1 }
0x106a   : > { %v9596_v39 = vpop.f32.mrf.mxu0 }
0x106e   : > { %v9598_v9 = vpop.f32.mrf.mxu2 }
0x106f   : > { %v9600_v24 = vpop.f32.mrf.mxu3  ;;  %v7472_v15 = vmul.f32 -1.442695, %v9598_v9 }
0x1070   : > { %v4601_v20 = vpop.f32.mrf.mxu1 }
0x1071   : > { %v8223_v20 = vld [vmem:[#allocation8 + $0x2c8] sm:$0xff] }
0x1072   : > { %v4640_v43 = vpop.f32.mrf.mxu0  ;;  %5484 = vmatpush.bf16.msra.mxu1 %v8223_v20  ;;  %v8245_v20 = vld [vmem:[#allocation8 + $0x378] sm:$0xff] }
0x1073   : > { %v7465_v43 = vmul.f32 -1.442695, %v9570_v28  ;;  %5504 = vmatpush.bf16.msra.mxu3 %v8245_v20  ;;  %v8259_v20 = vld [vmem:[#allocation8 + $0x3e8] sm:$0xff] }
0x1075   : > { %8491 = vpow2.f32 %v7465_v43 }
0x1076   : > { %v4614_v45 = vpop.f32.mrf.mxu2  ;;  %5485 = vmatpush.bf16.msra.mxu1 %v8222_v4 }
0x1077   : > { %v4627_v11 = vpop.f32.mrf.mxu3  ;;  %v7466_v45 = vmul.f32 -1.442695, %v9574_v14 }
0x1078   : > { %v7467_v11 = vmul.f32 -1.442695, %v9578_v41 }
0x1079   : > { %8493 = vpow2.f32 %v7466_v45 }
0x107a   : > { %8495 = vpow2.f32 %v7467_v11 }
0x1088   : > { %v4651_v47 = vpop.f32.mrf.mxu1 }
0x1089   : > { %v4655_v57 = vsel %vm629_vm11, %v4651_v47, -inf }
0x108a   : > { %4656 = vmax.xlane.f32.xlu0 %v4655_v57 }
0x1090   : > { %v4653_v37 = vpop.f32.mrf.mxu1 }
0x1091   : > { %v7468_v37 = vmul.f32 -1.442695, %v9582_v40 }
0x1093   : > { %8497 = vpow2.f32 %v7468_v37 }
0x10fd   : > { %v9604_v49 = vpop.xlane.xlu0 %4656 }
0x10fe   : > { %vm4658_vm7 = vcmp.eq.f32.partialorder %v4655_v57, %v9604_v49 }
0x10ff   : > { %v4659_v17 = vsel %vm4658_vm7, %v9163_v0, 128 }
0x1100   : > { %v4660_v23 = vcvt.s32.f32 %v4659_v17 }
0x1102   : > { %4661 = vmin.xlane.f32.xlu2 %v4660_v23 }
0x1175   : > { %v4662_v19 = vpop.xlane.xlu2 %4661 }
0x1176   : > { %vm8289_vm9 = vcmp.lt.s32.totalorder %v4662_v19, 0  ;;  %v8290_v3 = vceil.f32 %v4662_v19  ;;  %v8291_v34 = vfloor.f32 %v4662_v19 }
0x1178   : > { %v8292_v6 = vsel %vm8289_vm9, %v8290_v3, %v8291_v34 }
0x1179   : > { %v9608_v46 = vcvt.f32.s32 %v8292_v6 }
0x117b   : > { %vm4664_vm11 = vcmp.eq.s32.totalorder %v9163_v0, %v9608_v46 }
0x117c   : > { %v4665_v59 = vsel %vm4664_vm11, -inf, %v4655_v57  ;;  %v8492_v57 = vpop.eup %8491 }
0x117d   : > { %4666 = vmax.xlane.f32.xlu0 %v4665_v59  ;;  %v8494_v23 = vpop.eup %8493  ;;  %v9622_v19 = vadd.f32 1.0, %v8492_v57  ;;  %v8261_v57 = vld [vmem:[#allocation8 + $0x3f8] sm:$0xff] }
0x117e   : > { %v8496_v3 = vpop.eup %8495  ;;  %v9624_v34 = vadd.f32 1.0, %v8494_v23  ;;  %5530 = vmatpush.bf16.msrb.mxu1 %v8261_v57 }
0x117f   : > { %v9627_v6 = vadd.f32 1.0, %v8496_v3  ;;  %v4720_v37 = vand.u32 2147483647, %v9622_v19  ;;  %v4722_v3 = vand.u32 2147483648, %v9622_v19  ;;  %vm4716_vm12 = vweird.f32 %v9622_v19 }
0x1180   : > { %vm4731_vm15 = vweird.f32 %v9624_v34 }
0x1181   : > { %vm4721_vm1 = vcmp.eq.f32.partialorder %v4720_v37, 8.507059e+37  ;;  %vm4766_vm4 = vweird.f32 %v9627_v6 }
0x11f0   : > { %v9612_v31 = vpop.xlane.xlu0 %4666 }
0x11f1   : > { %vm4668_vm10 = vcmp.eq.f32.partialorder %v4665_v59, %v9612_v31  ;;  %v4674_v47 = vsub.f32 %v9612_v31, %v9604_v49  ;;  %v7469_v59 = vmul.f32 -1.442695, %v9586_v60  ;;  %v7470_v49 = vmul.f32 -1.442695, %v9590_v1  ;;  %v8498_v31 = vpop.eup %8497 }
0x11f2   : > { %v4669_v33 = vsel %vm4668_vm10, %v9163_v0, 128  ;;  %v8219_v0 = vld [vmem:[#allocation8 + $0x2a8] sm:$0xff]  ;;  %v9639_v25 = vadd.f32 1.0, %v8498_v31  ;;  %v8236_v31 = vld [vmem:[#allocation8 + $0x330] sm:$0xff] }
0x11f3   : > { %v4670_v10 = vcvt.s32.f32 %v4669_v33  ;;  %5467 = vmatpush.bf16.msra.mxu0 %v8219_v0  ;;  %v4675_v17 = vmul.f32 1.442695, %v4674_v47  ;;  %v7471_v33 = vmul.f32 -1.442695, %v9594_v8  ;;  %v8253_v47 = vld [vmem:[#allocation8 + $0x3b8] sm:$0xff] }
0x11f4   : > { %vm4781_vm6 = vweird.f32 %v9639_v25 }
0x11f5   : > { %4671 = vmin.xlane.f32.xlu2 %v4670_v10  ;;  %8499 = vpow2.f32 %v4675_v17 }
0x11f6   : > { %8501 = vrcp.f32 %v9622_v19 }
0x11f7   : > { %5468 = vmatpush.bf16.msra.mxu0 %v8218_v7  ;;  %8503 = vrcp.f32 %v9624_v34 }
0x11f8   : > { %8505 = vrcp.f32 %v9627_v6 }
0x11f9   : > { %8507 = vpow2.f32 %v7469_v59  ;;  %v4735_v59 = vand.u32 2147483647, %v9624_v34 }
0x11fa   : > { %8509 = vpow2.f32 %v7470_v49  ;;  %v4737_v49 = vand.u32 2147483648, %v9624_v34 }
0x11fb   : > { %5469 = vmatpush.bf16.msra.mxu0 %v8217_v61  ;;  %v9633_v10 = vpop.eup %8499  ;;  %8511 = vpow2.f32 %v7471_v33  ;;  %v8244_v33 = vld [vmem:[#allocation8 + $0x370] sm:$0xff]  ;;  %vm9711_vm3 = vcmp.eq.f32.partialorder %v4735_v59, 8.507059e+37 }
0x11fc   : > { %v9637_v35 = vpop.eup %8501  ;;  %v9642_v42 = vadd.f32 1.0, %v9633_v10  ;;  %8513 = vpow2.f32 %v7472_v15  ;;  %v8252_v15 = vld [vmem:[#allocation8 + $0x3b0] sm:$0xff]  ;;  %5505 = vmatpush.bf16.msra.mxu3 %v8244_v33 }
0x11fd   : > { %v9644_v52 = vpop.eup %8503  ;;  %v4712_v44 = vmul.f32 %v9637_v35, %v9622_v19  ;;  %8515 = vrcp.f32 %v9639_v25  ;;  %vm4717_vm0 = vweird.f32 %v9637_v35  ;;  %v4785_v19 = vand.u32 2147483647, %v9639_v25 }
0x11fe   : > { %v9648_v48 = vpop.eup %8505  ;;  %v4727_v56 = vmul.f32 %v9644_v52, %v9624_v34  ;;  %8517 = vrcp.f32 %v9642_v42  ;;  %vm4732_vm13 = vweird.f32 %v9644_v52  ;;  %vm9692_vm14 = vmor %vm4716_vm12, %vm4717_vm0  ;;  %v4738_v34 = vor.u32 1.1754944e-38, %v4737_v49  ;;  %v8234_v49 = vld [vmem:[#allocation8 + $0x320] sm:$0xff] }
0x11ff   : > { %5470 = vmatpush.bf16.msra.mxu0 %v8216_v53  ;;  %v8508_v50 = vpop.eup %8507  ;;  %v4713_v21 = vsub.f32 1.0, %v4712_v44  ;;  %v4762_v12 = vmul.f32 %v9648_v48, %v9627_v6  ;;  %v8198_v53 = vld [vmem:[#allocation8 + $0x200] sm:$0xff]  ;;  %vm9707_vm2 = vmor %vm4731_vm15, %vm4732_vm13  ;;  %vm4767_vm8 = vweird.f32 %v9648_v48  ;;  %v4689_v4 = vand.u32 2147483648, %v9642_v42 }
0x1200   : > { %v8510_v58 = vpop.eup %8509  ;;  %v9654_v27 = vadd.f32 1.0, %v8508_v50  ;;  %v4728_v7 = vsub.f32 1.0, %v4727_v56  ;;  %5446 = vmatpush.bf16.msrb.mxu2 %v8198_v53  ;;  %v8243_v53 = vld [vmem:[#allocation8 + $0x368] sm:$0xff]  ;;  %vm9736_vm5 = vmor %vm4766_vm4, %vm4767_vm8  ;;  %vm4683_vm0 = vweird.f32 %v9642_v42  ;;  %vm9772_vm12 = vcmp.eq.f32.partialorder %v4785_v19, 8.507059e+37 }
0x1201   : > { %v8512_v0 = vpop.eup %8511  ;;  %v9658_v30 = vadd.f32 1.0, %v8510_v58  ;;  %v4714_v51 = vmul.f32 %v9637_v35, %v4713_v21  ;;  %v4763_v45 = vsub.f32 1.0, %v4762_v12  ;;  %v8260_v58 = vld [vmem:[#allocation8 + $0x3f0] sm:$0xff]  ;;  %v4772_v12 = vand.u32 2147483648, %v9627_v6  ;;  %5506 = vmatpush.bf16.msra.mxu3 %v8243_v53 }
0x1202   : > { %v8514_v22 = vpop.eup %8513  ;;  %v9662_v61 = vadd.f32 1.0, %v8512_v0  ;;  %8519 = vrcp.f32 %v9654_v27  ;;  %v4729_v43 = vmul.f32 %v9644_v52, %v4728_v7  ;;  %5531 = vmatpush.bf16.msrb.mxu1 %v8260_v58 }
0x1203   : > { %5471 = vmatpush.bf16.msra.mxu0 %v8215_v13  ;;  %v9660_v36 = vpop.eup %8515  ;;  %v9667_v26 = vadd.f32 1.0, %v8514_v22  ;;  %v8237_v13 = vld [vmem:[#allocation8 + $0x338] sm:$0xff]  ;;  %8521 = vrcp.f32 %v9658_v30  ;;  %v4715_v23 = vadd.f32 %v9637_v35, %v4714_v51  ;;  %v4764_v50 = vmul.f32 %v9648_v48, %v4763_v45  ;;  %v8235_v51 = vld [vmem:[#allocation8 + $0x328] sm:$0xff] }
0x1204   : > { %v9664_v16 = vpop.eup %8517  ;;  %v4777_v11 = vmul.f32 %v9660_v36, %v9639_v25  ;;  %8523 = vrcp.f32 %v9662_v61  ;;  %5491 = vmatpush.bf16.msra.mxu2 %v8237_v13  ;;  %v4730_v44 = vadd.f32 %v9644_v52, %v4729_v43  ;;  %v8251_v13 = vld [vmem:[#allocation8 + $0x3a8] sm:$0xff]  ;;  %vm4782_vm7 = vweird.f32 %v9660_v36 }
0x1205   : > { %v4679_v17 = vmul.f32 %v9664_v16, %v9642_v42  ;;  %8525 = vrcp.f32 %v9667_v26  ;;  %v4719_v7 = vsel %vm9692_vm14, %v9637_v35, %v4715_v23  ;;  %vm4684_vm9 = vweird.f32 %v9664_v16  ;;  %vm9759_vm10 = vmor %vm4781_vm6, %vm4782_vm7 }
0x1206   : > { %v4778_v56 = vsub.f32 1.0, %v4777_v11  ;;  %v4734_v45 = vsel %vm9707_vm2, %v9644_v52, %v4730_v44  ;;  %v4765_v11 = vadd.f32 %v9648_v48, %v4764_v50  ;;  %v4773_v52 = vor.u32 1.1754944e-38, %v4772_v12  ;;  %5532 = vmatpush.bf16.msrb.mxu1 %v8259_v20  ;;  %v8250_v44 = vld [vmem:[#allocation8 + $0x3a0] sm:$0xff]  ;;  %v8241_v20 = vld [vmem:[#allocation8 + $0x358] sm:$0xff]  ;;  %vm9779_vm13 = vmor %vm4683_vm0, %vm4684_vm9 }
0x1207   : > { %5472 = vmatpush.bf16.msra.mxu0 %v8214_v62  ;;  %v4680_v21 = vsub.f32 1.0, %v4679_v17  ;;  %v4723_v62 = vor.u32 1.1754944e-38, %v4722_v3  ;;  %v4770_v3 = vand.u32 2147483647, %v9627_v6  ;;  %v4739_v33 = vsel %vm9711_vm3, %v4738_v34, %v4734_v45  ;;  %v8258_v50 = vld [vmem:[#allocation8 + $0x3e0] sm:$0xff] }
0x1208   : > { %v9688_v0 = vpop.eup %8519  ;;  %5492 = vmatpush.bf16.msra.mxu2 %v8236_v31  ;;  %v8242_v31 = vld [vmem:[#allocation8 + $0x360] sm:$0xff]  ;;  %v9767_v45 = vmul.f32 %v4739_v33, %v9574_v14  ;;  %vm4816_vm14 = vweird.f32 %v9654_v27  ;;  %vm4831_vm3 = vweird.f32 %v9658_v30  ;;  %vm4866_vm9 = vweird.f32 %v9662_v61 }
0x1209   : > { %v9696_v22 = vpop.eup %8521  ;;  %v4724_v57 = vsel %vm4721_vm1, %v4723_v62, %v4719_v7  ;;  %v4812_v37 = vmul.f32 %v9688_v0, %v9654_v27  ;;  %v4681_v23 = vmul.f32 %v9664_v16, %v4680_v21  ;;  %v4787_v21 = vand.u32 2147483648, %v9639_v25  ;;  %5507 = vmatpush.bf16.msra.mxu3 %v8242_v31  ;;  %v8249_v25 = vld [vmem:[#allocation8 + $0x398] sm:$0xff]  ;;  %v8240_v31 = vld [vmem:[#allocation8 + $0x350] sm:$0xff] }
0x120a   : > { %v9703_v32 = vpop.eup %8523  ;;  %v4827_v17 = vmul.f32 %v9696_v22, %v9658_v30  ;;  %v9753_v53 = vmul.f32 %v4724_v57, %v9570_v28  ;;  %vm4771_vm11 = vcmp.eq.f32.partialorder %v4770_v3, 8.507059e+37  ;;  %v4687_v28 = vand.u32 2147483647, %v9642_v42  ;;  %5533 = vmatpush.bf16.msrb.mxu1 %v8258_v50 }
0x120b   : > { %5517 = vmatpush.bf16.msrb.mxu0 %v8253_v47  ;;  %v9715_v43 = vpop.eup %8525  ;;  %v4779_v47 = vmul.f32 %v9660_v36, %v4778_v56  ;;  %v4862_v59 = vmul.f32 %v9703_v32, %v9662_v61  ;;  %v4769_v56 = vsel %vm9736_vm5, %v9648_v48, %v4765_v11  ;;  %v4813_v7 = vsub.f32 1.0, %v4812_v37  ;;  %v8257_v37 = vld [vmem:[#allocation8 + $0x3d8] sm:$0xff]  ;;  %v8231_v48 = vld [vmem:[#allocation8 + $0x308] sm:$0xff] }
0x120c   : > { %5493 = vmatpush.bf16.msra.mxu2 %v8235_v51  ;;  %v4877_v6 = vmul.f32 %v9715_v43, %v9667_v26  ;;  %v4828_v12 = vsub.f32 1.0, %v4827_v17  ;;  %v4682_v51 = vadd.f32 %v9664_v16, %v4681_v23  ;;  %v4774_v35 = vsel %vm4771_vm11, %v4773_v52, %v4769_v56 }
0x120d   : > { %v4780_v58 = vadd.f32 %v9660_v36, %v4779_v47  ;;  %v4863_v62 = vsub.f32 1.0, %v4862_v59  ;;  %v4820_v57 = vand.u32 2147483647, %v9654_v27  ;;  %v4788_v17 = vor.u32 1.1754944e-38, %v4787_v21  ;;  %5508 = vmatpush.bf16.msra.mxu3 %v8241_v20  ;;  %v8255_v20 = vld [vmem:[#allocation8 + $0x3c8] sm:$0xff] }
0x120e   : > { %v4878_v34 = vsub.f32 1.0, %v4877_v6  ;;  %v4814_v14 = vmul.f32 %v9688_v0, %v4813_v7  ;;  %v4829_v23 = vmul.f32 %v9696_v22, %v4828_v12  ;;  %v9789_v3 = vmul.f32 %v4774_v35, %v9578_v41  ;;  %5534 = vmatpush.bf16.msrb.mxu1 %v8257_v37  ;;  %v8248_v41 = vld [vmem:[#allocation8 + $0x390] sm:$0xff] }
0x120f   : > { %5518 = vmatpush.bf16.msrb.mxu0 %v8252_v15  ;;  %v4784_v11 = vsel %vm9759_vm10, %v9660_v36, %v4780_v58  ;;  %v4686_v36 = vsel %vm9779_vm13, %v9664_v16, %v4682_v51  ;;  %v4864_v52 = vmul.f32 %v9703_v32, %v4863_v62  ;;  %v4690_v59 = vor.u32 1.1754944e-38, %v4689_v4  ;;  %v8256_v16 = vld [vmem:[#allocation8 + $0x3d0] sm:$0xff]  ;;  %v8239_v62 = vld [vmem:[#allocation8 + $0x348] sm:$0xff] }
0x1210   : > { %5494 = vmatpush.bf16.msra.mxu2 %v8234_v49  ;;  %v8232_v49 = vld [vmem:[#allocation8 + $0x310] sm:$0xff]  ;;  %v4789_v33 = vsel %vm9772_vm12, %v4788_v17, %v4784_v11  ;;  %v4822_v15 = vand.u32 2147483648, %v9654_v27  ;;  %v4879_v6 = vmul.f32 %v9715_v43, %v4878_v34  ;;  %vm4688_vm15 = vcmp.eq.f32.partialorder %v4687_v28, 8.507059e+37 }
0x1211   : > { %vm4817_vm1 = vweird.f32 %v9688_v0  ;;  %vm9798_vm2 = vcmp.eq.f32.partialorder %v4820_v57, 8.507059e+37  ;;  %v4835_v50 = vand.u32 2147483647, %v9658_v30  ;;  %v4691_v56 = vsel %vm4688_vm15, %v4690_v59, %v4686_v36  ;;  %5509 = vmatpush.bf16.msra.mxu3 %v8240_v31  ;;  %v8246_v59 = vld [vmem:[#allocation8 + $0x380] sm:$0xff] }
0x1212   : > { %v4815_v58 = vadd.f32 %v9688_v0, %v4814_v14  ;;  %v4830_v19 = vadd.f32 %v9696_v22, %v4829_v23  ;;  %vm4832_vm8 = vweird.f32 %v9696_v22  ;;  %v4837_v21 = vand.u32 2147483648, %v9658_v30  ;;  %vm9816_vm5 = vmor %vm4816_vm14, %vm4817_vm1  ;;  %5535 = vmatpush.bf16.msrb.mxu1 %v8256_v16  ;;  %v8238_v14 = vld [vmem:[#allocation8 + $0x340] sm:$0xff] }
0x1213   : > { %5519 = vmatpush.bf16.msrb.mxu0 %v8251_v13  ;;  %v8233_v13 = vld [vmem:[#allocation8 + $0x318] sm:$0xff]  ;;  %v4865_v7 = vadd.f32 %v9703_v32, %v4864_v52  ;;  %vm4867_vm4 = vweird.f32 %v9703_v32  ;;  %v4870_v12 = vand.u32 2147483647, %v9662_v61  ;;  %v4872_v51 = vand.u32 2147483648, %v9662_v61  ;;  %vm9831_vm7 = vmor %vm4831_vm3, %vm4832_vm8 }
0x1214   : > { %5495 = vmatpush.bf16.msra.mxu2 %v8233_v13  ;;  %v4880_v35 = vadd.f32 %v9715_v43, %v4879_v6  ;;  %vm4882_vm6 = vweird.f32 %v9715_v43  ;;  %v4887_v34 = vand.u32 2147483648, %v9667_v26  ;;  %v4693_v28 = vmul.f32 %v9633_v10, %v4691_v56  ;;  %v8247_v13 = vld [vmem:[#allocation8 + $0x388] sm:$0xff]  ;;  %vm9842_vm10 = vmor %vm4866_vm9, %vm4867_vm4 }
0x1215   : > { %v4823_v27 = vor.u32 1.1754944e-38, %v4822_v15  ;;  %v4694_v47 = vpack.c.bf16 %v4691_v56, %v4691_v56  ;;  %vm9836_vm11 = vcmp.eq.f32.partialorder %v4835_v50, 8.507059e+37  ;;  %v4838_v57 = vor.u32 1.1754944e-38, %v4837_v21  ;;  %5510 = vmatpush.bf16.msra.mxu3 %v8239_v62 }
0x1216   : > { %vm4881_vm0 = vweird.f32 %v9667_v26  ;;  %v4885_v30 = vand.u32 2147483647, %v9667_v26  ;;  %v4819_v61 = vsel %vm9816_vm5, %v9688_v0, %v4815_v58  ;;  %v4834_v42 = vsel %vm9831_vm7, %v9696_v22, %v4830_v19  ;;  %v8230_v0 = vld [vmem:[#allocation8 + $0x300] sm:$0xff]  ;;  %5536 = vmatpush.bf16.msrb.mxu1 %v8255_v20 }
0x1217   : > { %5520 = vmatpush.bf16.msrb.mxu0 %v8250_v44  ;;  %v4869_v37 = vsel %vm9842_vm10, %v9703_v32, %v4865_v7  ;;  %vm9857_vm12 = vcmp.eq.f32.partialorder %v4870_v12, 8.507059e+37  ;;  %vm9863_vm13 = vmor %vm4881_vm0, %vm4882_vm6  ;;  %v4873_v23 = vor.u32 1.1754944e-38, %v4872_v51  ;;  %v4888_v32 = vor.u32 1.1754944e-38, %v4887_v34 }
0x1218   : > { %5496 = vmatpush.bf16.msra.mxu2 %v8232_v49  ;;  %v4884_v22 = vsel %vm9863_vm13, %v9715_v43, %v4880_v35  ;;  %v4696_v36 = vpack.c.bf16 %v4693_v28, %v4693_v28  ;;  %v8254_v49 = vld [vmem:[#allocation8 + $0x3c0] sm:$0xff]  ;;  %v4695_v31 = vunpack.c.l.bf16 %v4694_v47  ;;  %v4824_v6 = vsel %vm9798_vm2, %v4823_v27, %v4819_v61 }
0x1219   : > { %v4874_v43 = vsel %vm9857_vm12, %v4873_v23, %v4869_v37  ;;  %vm4886_vm15 = vcmp.eq.f32.partialorder %v4885_v30, 8.507059e+37  ;;  %vm4698_vm1 = vcmp.eq.s32.totalorder %v9608_v46, 0  ;;  %vm4748_vm3 = vcmp.eq.s32.totalorder %v9608_v46, 1  ;;  %5511 = vmatpush.bf16.msra.mxu3 %v8238_v14 }
0x121a   : > { %v4889_v16 = vsel %vm4886_vm15, %v4888_v32, %v4884_v22  ;;  %v4697_v56 = vunpack.c.l.bf16 %v4696_v36  ;;  %vm4798_vm8 = vcmp.eq.s32.totalorder %v9608_v46, 2  ;;  %vm4848_vm2 = vcmp.eq.s32.totalorder %v9608_v46, 3  ;;  %5537 = vmatpush.bf16.msrb.mxu1 %v8254_v49 }
0x121b   : > { %5521 = vmatpush.bf16.msrb.mxu0 %v8249_v25  ;;  %v9825_v25 = vmul.f32 %v4789_v33, %v9582_v40  ;;  %v4699_v58 = vsel %vm4698_vm1, %v4695_v31, 0.0  ;;  %v4749_v19 = vsel %vm4748_vm3, %v4695_v31, 0.0  ;;  %v4799_v21 = vsel %vm4798_vm8, %v4695_v31, 0.0 }
0x121c   : > { %5497 = vmatpush.bf16.msra.mxu2 %v8231_v48  ;;  %v4849_v7 = vsel %vm4848_vm2, %v4695_v31, 0.0  ;;  %v4841_v46 = vmul.f32 %v4824_v6, %v9586_v60  ;;  %v4891_v20 = vmul.f32 %v4874_v43, %v9594_v8  ;;  %v4892_v27 = vmul.f32 %v4889_v16, %v9598_v9  ;;  %v7787_v16 = vld [vmem:[#allocation11 + $0x70] sm:$0xf] }
0x121f   : > { %5522 = vmatpush.bf16.msrb.mxu0 %v8248_v41  ;;  %v4839_v41 = vsel %vm9836_vm11, %v4838_v57, %v4834_v42 }
0x1220   : > { %5498 = vmatpush.bf16.msra.mxu2 %v8230_v0 }
0x1223   : > { %5523 = vmatpush.bf16.msrb.mxu0 %v8247_v13  ;;  %v4842_v13 = vmul.f32 %v4839_v41, %v9590_v1 }
0x1227   : > { %5524 = vmatpush.bf16.msrb.mxu0 %v8246_v59 }
0x1268   : > { %v4672_v52 = vpop.xlane.xlu2 %4671 }
0x1269   : > { %vm8294_vm14 = vcmp.lt.s32.totalorder %v4672_v52, 0  ;;  %v8295_v33 = vceil.f32 %v4672_v52  ;;  %v8296_v15 = vfloor.f32 %v4672_v52 }
0x126b   : > { %v8297_v50 = vsel %vm8294_vm14, %v8295_v33, %v8296_v15 }
0x126c   : > { %v8298_v44 = vcvt.f32.s32 %v8297_v50  ;;  %v8277_v50 = vld [vmem:[#allocation11 + $0x74] sm:$0xf0] }
0x126e   : > { %vm4700_vm4 = vcmp.eq.s32.totalorder %v8298_v44, 0  ;;  %vm4750_vm5 = vcmp.eq.s32.totalorder %v8298_v44, 1  ;;  %vm4800_vm6 = vcmp.eq.s32.totalorder %v8298_v44, 2  ;;  %vm4850_vm7 = vcmp.eq.s32.totalorder %v8298_v44, 3 }
0x126f   : > { %v4701_v12 = vsel %vm4700_vm4, %v4697_v56, 0.0  ;;  %v4751_v51 = vsel %vm4750_vm5, %v4697_v56, 0.0  ;;  %v4801_v48 = vsel %vm4800_vm6, %v4697_v56, 0.0  ;;  %v4851_v62 = vsel %vm4850_vm7, %v4697_v56, 0.0  ;;  %v8276_v56 = vld [vmem:[#allocation11 + $0x74] sm:$0xf] }
0x1270   : > { %v4702_v4 = vadd.f32 %v4701_v12, %v4699_v58  ;;  %v4752_v35 = vadd.f32 %v4751_v51, %v4749_v19  ;;  %v4802_v34 = vadd.f32 %v4801_v48, %v4799_v21  ;;  %v4852_v28 = vadd.f32 %v4851_v62, %v4849_v7  ;;  %v7789_v58 = vld [vmem:[#allocation11 + $0x78] sm:$0xf0] }
0x1271   : > { %v7788_v44 = vor.u32 %v8277_v50, %v7787_v16  ;;  %v7792_v21 = vor.u32 %v8276_v56, %v7789_v58  ;;  %v7741_v16 = vld [vmem:[#allocation11 + $0x18] sm:$0xf0]  ;;  %v7731_v56 = vld [vmem:[#allocation11] sm:$0xf]  ;;  %v8262_v58 = vld [vmem:[#allocation11 + $0x4] sm:$0xf] }
0x1272   : > { %v4743_v11 = vmul.f32 %v9753_v53, %v4702_v4  ;;  %v4744_v47 = vmul.f32 %v9767_v45, %v4702_v4  ;;  %v4793_v10 = vmul.f32 %v9789_v3, %v4752_v35  ;;  %v4794_v57 = vmul.f32 %v9825_v25, %v4752_v35 }
0x1273   : > { %v4843_v40 = vmul.f32 %v4841_v46, %v4802_v34  ;;  %v4844_v30 = vmul.f32 %v4842_v13, %v4802_v34  ;;  %v4893_v61 = vmul.f32 %v4891_v20, %v4852_v28  ;;  %v4894_v42 = vmul.f32 %v4892_v27, %v4852_v28 }
0x1274   : > { %v4745_v60 = vmul.f32 %v4743_v11, %v9576_v29  ;;  %v4746_v1 = vmul.f32 %v4744_v47, %v9572_v54  ;;  %v4795_v8 = vmul.f32 %v4793_v10, %v9584_v5  ;;  %v4796_v9 = vmul.f32 %v4794_v57, %v9580_v38 }
0x1275   : > { %v4845_v53 = vmul.f32 %v4843_v40, %v9592_v2  ;;  %v4846_v45 = vmul.f32 %v4844_v30, %v9588_v63  ;;  %v4895_v3 = vmul.f32 %v4893_v61, %v9600_v24  ;;  %v4896_v25 = vmul.f32 %v4894_v42, %v9596_v39 }
0x1276   : > { %v4747_v37 = vpack.c.bf16 %v4746_v1, %v4745_v60  ;;  %v4797_v17 = vpack.c.bf16 %v4796_v9, %v4795_v8  ;;  %v7779_v1 = vld [vmem:[#allocation11 + $0x60] sm:$0xf]  ;;  %v8275_v8 = vld [vmem:[#allocation11 + $0x64] sm:$0xf0]  ;;  %v8274_v9 = vld [vmem:[#allocation11 + $0x64] sm:$0xf] }
0x1277   : > { %v4847_v26 = vpack.c.bf16 %v4846_v45, %v4845_v53  ;;  %v4897_v0 = vpack.c.bf16 %v4896_v25, %v4895_v3  ;;  %v7780_v53 = vor.u32 %v8275_v8, %v7779_v1  ;;  %v7781_v45 = vld [vmem:[#allocation11 + $0x68] sm:$0xf0]  ;;  %v7771_v25 = vld [vmem:[#allocation11 + $0x50] sm:$0xf] }
0x1278   : > { %v4899_v14 = vunpack.c.l.b16 %v4747_v37  ;;  %v4900_v29 = vunpack.c.h.b16 %v4747_v37  ;;  %v4906_v23 = vunpack.c.l.b16 %v4797_v17  ;;  %v4907_v54 = vunpack.c.h.b16 %v4797_v17  ;;  %v8273_v37 = vld [vmem:[#allocation11 + $0x54] sm:$0xf0]  ;;  %v8272_v17 = vld [vmem:[#allocation11 + $0x54] sm:$0xf] }
0x1279   : > { %v4913_v63 = vunpack.c.l.b16 %v4847_v26  ;;  %v4914_v2 = vunpack.c.h.b16 %v4847_v26  ;;  %v4920_v24 = vunpack.c.l.b16 %v4897_v0  ;;  %v4921_v39 = vunpack.c.h.b16 %v4897_v0 }
0x127a   : > { %v4901_v22 = vpack.c.b16 %v4899_v14, %v4899_v14  ;;  %v4902_v5 = vpack.c.b16 %v4900_v29, %v4900_v29  ;;  %v4908_v32 = vpack.c.b16 %v4906_v23, %v4906_v23  ;;  %v4909_v38 = vpack.c.b16 %v4907_v54, %v4907_v54  ;;  %v7763_v14 = vld [vmem:[#allocation11 + $0x40] sm:$0xf]  ;;  %v8271_v29 = vld [vmem:[#allocation11 + $0x44] sm:$0xf0]  ;;  %v8270_v23 = vld [vmem:[#allocation11 + $0x44] sm:$0xf] }
0x127b   : > { %v4915_v36 = vpack.c.b16 %v4913_v63, %v4913_v63  ;;  %v4916_v52 = vpack.c.b16 %v4914_v2, %v4914_v2  ;;  %v4922_v59 = vpack.c.b16 %v4920_v24, %v4920_v24  ;;  %v4923_v49 = vpack.c.b16 %v4921_v39, %v4921_v39  ;;  %v8268_v63 = vld [vmem:[#allocation11 + $0x34] sm:$0xf]  ;;  %v7757_v24 = vld [vmem:[#allocation11 + $0x38] sm:$0xf0] }
0x127c   : > { %5447 = vmatmul.bf16.vlgmr.msrb.gmra.mxu2 %v4901_v22  ;;  %5460 = vmatmul.bf16.vlgmr.msrb.gmra.mxu3 %v4902_v5  ;;  %v7784_v3 = vor.u32 %v8274_v9, %v7781_v45  ;;  %v7772_v26 = vor.u32 %v8273_v37, %v7771_v25  ;;  %v7764_v54 = vor.u32 %v8271_v29, %v7763_v14  ;;  %v7765_v22 = vld [vmem:[#allocation11 + $0x48] sm:$0xf0] }
0x127d   : > { %5473 = vmatmul.bf16.vlgmr.msra.gmra.mxu0 %v4908_v32  ;;  %5486 = vmatmul.bf16.vlgmr.msra.gmra.mxu1 %v4909_v38  ;;  %v7768_v5 = vor.u32 %v8270_v23, %v7765_v22  ;;  %v7755_v32 = vld [vmem:[#allocation11 + $0x30] sm:$0xf]  ;;  %v8269_v38 = vld [vmem:[#allocation11 + $0x34] sm:$0xf0]  ;;  %v7760_v39 = vor.u32 %v8268_v63, %v7757_v24 }
0x127e   : > { %5665 = vmatpush.bf16.msrb.mxu2 %v7788_v44  ;;  %5678 = vmatpush.bf16.msrb.mxu3 %v7792_v21  ;;  %v7756_v2 = vor.u32 %v8269_v38, %v7755_v32  ;;  %v8263_v44 = vld [vmem:[#allocation11 + $0x4] sm:$0xf0]  ;;  %v7733_v21 = vld [vmem:[#allocation11 + $0x8] sm:$0xf0] }
0x1282   : > { %5666 = vmatpush.bf16.msrb.mxu2 %v7780_v53  ;;  %5679 = vmatpush.bf16.msrb.mxu3 %v7784_v3 }
0x1286   : > { %5667 = vmatpush.bf16.msrb.mxu2 %v7772_v26 }
0x128a   : > { %5668 = vmatpush.bf16.msrb.mxu2 %v7764_v54 }
0x128c   : > { %5499 = vmatmul.bf16.vlgmr.msra.gmra.mxu2 %v4915_v36  ;;  %5512 = vmatmul.bf16.vlgmr.msra.gmra.mxu3 %v4916_v52  ;;  %v7747_v36 = vld [vmem:[#allocation11 + $0x20] sm:$0xf]  ;;  %v8267_v52 = vld [vmem:[#allocation11 + $0x24] sm:$0xf0] }
0x128d   : > { %5525 = vmatmul.bf16.vlgmr.msrb.gmra.mxu0 %v4922_v59  ;;  %5538 = vmatmul.bf16.vlgmr.msrb.gmra.mxu1 %v4923_v49  ;;  %v8266_v59 = vld [vmem:[#allocation11 + $0x24] sm:$0xf]  ;;  %v7748_v49 = vor.u32 %v8267_v52, %v7747_v36 }
0x128e   : > { %5669 = vmatpush.bf16.msrb.mxu2 %v7756_v2 }
0x1292   : > { %5670 = vmatpush.bf16.msrb.mxu2 %v7748_v49 }
0x12fa   : > { %v5474_v31 = vpop.f32.mrf.mxu0  ;;  %v5487_v33 = vpop.f32.mrf.mxu1 }
0x12ff   : > { %v5448_v15 = vpop.f32.mrf.mxu2  ;;  %v5461_v6 = vpop.f32.mrf.mxu3 }
0x1300   : > { %v5462_v19 = vadd.f32 %v5461_v6, %v5448_v15  ;;  %v7739_v15 = vld [vmem:[#allocation11 + $0x10] sm:$0xf]  ;;  %v8265_v6 = vld [vmem:[#allocation11 + $0x14] sm:$0xf0] }
0x1302   : > { %v5476_v41 = vpop.f32.mrf.mxu0  ;;  %v5489_v43 = vpop.f32.mrf.mxu1  ;;  %v5475_v51 = vadd.f32 %v5474_v31, %v5462_v19  ;;  %v7749_v31 = vld [vmem:[#allocation11 + $0x28] sm:$0xf0]  ;;  %v7732_v19 = vor.u32 %v8263_v44, %v7731_v56 }
0x1303   : > { %v8264_v41 = vld [vmem:[#allocation11 + $0x14] sm:$0xf]  ;;  %v7740_v43 = vor.u32 %v8265_v6, %v7739_v15 }
0x1304   : > { %v5488_v4 = vadd.f32 %v5487_v33, %v5475_v51  ;;  %v7752_v33 = vor.u32 %v8266_v59, %v7749_v31  ;;  %v7744_v50 = vor.u32 %v8264_v41, %v7741_v16 }
0x1305   : > { %5671 = vmatpush.bf16.msrb.mxu2 %v7740_v43 }
0x1307   : > { %v5450_v7 = vpop.f32.mrf.mxu2  ;;  %v5463_v12 = vpop.f32.mrf.mxu3 }
0x1308   : > { %v7736_v7 = vor.u32 %v8262_v58, %v7733_v21 }
0x1309   : > { %5672 = vmatpush.bf16.msrb.mxu2 %v7732_v19 }
0x130a   : > { %v5526_v48 = vpop.f32.mrf.mxu0  ;;  %v5539_v62 = vpop.f32.mrf.mxu1 }
0x130f   : > { %v5500_v35 = vpop.f32.mrf.mxu2  ;;  %v5513_v34 = vpop.f32.mrf.mxu3 }
0x1310   : > { %v5501_v28 = vadd.f32 %v5500_v35, %v5488_v4  ;;  %v5547_v35 = vld [vmem:[#allocation10] sm:$0x1] }
0x1312   : > { %v5514_v46 = vadd.f32 %v5513_v34, %v5501_v28  ;;  %v5528_v13 = vpop.f32.mrf.mxu0  ;;  %v5541_v20 = vpop.f32.mrf.mxu1 }
0x1314   : > { %v5527_v27 = vadd.f32 %v5526_v48, %v5514_v46  ;;  %v5565_v46 = vunpack.c.l.bf16 %v5547_v35 }
0x1316   : > { %v5540_v11 = vadd.f32 %v5539_v62, %v5527_v27  ;;  %v5566_v27 = vperm.slane %v5565_v46, 0 }
0x1317   : > { %v5502_v47 = vpop.f32.mrf.mxu2  ;;  %v5515_v10 = vpop.f32.mrf.mxu3 }
0x1318   : > { %v5543_v57 = vpack.c.bf16 %v5540_v11, %v5540_v11 }
0x131a   : > { %v5544_v40 = vunpack.c.l.bf16 %v5543_v57 }
0x131c   : > { %v5545_v30 = vadd.f32 %v5544_v40, %v9542_v55  ;;  %v7773_v55 = vld [vmem:[#allocation11 + $0x58] sm:$0xf0] }
0x131d   : > { %v7776_v0 = vor.u32 %v8272_v17, %v7773_v55 }
0x131e   : > { %v5546_v61 = vpack.c.bf16 %v5545_v30, %v5545_v30 }
0x131f   : > { %5680 = vmatpush.bf16.msrb.mxu3 %v7776_v0 }
0x1320   : > { %v9897_v42 = vunpack.c.l.bf16 %v5546_v61 }
0x1322   : > { %v5549_v60 = vmul.f32 %v9897_v42, %v9897_v42 }
0x1323   : > { %5681 = vmatpush.bf16.msrb.mxu3 %v7768_v5 }
0x1324   : > { %5550 = vadd.xlane.f32.xlu0 %v5549_v60 }
0x1327   : > { %5682 = vmatpush.bf16.msrb.mxu3 %v7760_v39 }
0x132b   : > { %5683 = vmatpush.bf16.msrb.mxu3 %v7752_v33 }
0x132f   : > { %5684 = vmatpush.bf16.msrb.mxu3 %v7744_v50 }
0x1333   : > { %5685 = vmatpush.bf16.msrb.mxu3 %v7736_v7 }
0x1397   : > { %v5551_v12 = vpop.xlane.xlu0 %5550 }
0x1398   : > { %v5552_v51 = vmul.f32 %v5551_v12, %v9022_v18 }
0x139a   : > { %v5553_v48 = vadd.f32 1e-06, %v5552_v51 }
0x139c   : > { %8527 = vrsqrt.f32 %v5553_v48  ;;  %vm5560_vm11 = vweird.f32 %v5553_v48 }
0x13a2   : > { %v8528_v62 = vpop.eup %8527 }
0x13a3   : > { %v5555_v4 = vmul.f32 %v8528_v62, %v5553_v48  ;;  %vm5561_vm9 = vweird.f32 %v8528_v62 }
0x13a4   : > { %vm5562_vm10 = vmor %vm5560_vm11, %vm5561_vm9 }
0x13a5   : > { %v5556_v34 = vmul.f32 %v8528_v62, %v5555_v4 }
0x13a7   : > { %v5557_v28 = vmul.f32 0.5, %v5556_v34 }
0x13a9   : > { %v5558_v13 = vsub.f32 1.5, %v5557_v28 }
0x13ab   : > { %v5559_v20 = vmul.f32 %v8528_v62, %v5558_v13 }
0x13ad   : > { %v5563_v11 = vsel %vm5562_vm10, %v8528_v62, %v5559_v20 }
0x13ae   : > { %v5564_v47 = vmul.f32 %v5563_v11, %v9897_v42 }
0x13b0   : > { %v5567_v18 = vmul.f32 %v5566_v27, %v5564_v47 }
0x13b2   : > { %v5568_v10 = vpack.c.bf16 %v5567_v18, %v5567_v18 }
0x13b4   : > { %5673 = vmatmul.bf16.vlgmr.msrb.gmra.mxu2 %v5568_v10  ;;  %5686 = vmatmul.bf16.vlgmr.msrb.gmra.mxu3 %v5568_v10 }
0x1437   : > { %v5674_v57 = vpop.f32.mrf.mxu2  ;;  %v5687_v40 = vpop.f32.mrf.mxu3 }
0x1438   : > { %5691 = vst [vmem:[%s610_s19] sm:$0xff] %v5674_v57 }
0x1439   : > { %5692 = vst [vmem:[%s610_s19 + $0x8] sm:$0xff] %v5687_v40 }
0x143a   : > { %8746 = shalt.err (!%p8743_p8)
}
0x143b   : > { %8323 = dma.vmem_to_hbm [thread:$0]  (%p8942_p5), %s5708_s16, 256, %s5710_s28, %s5694_s23  }
0x143f   : > { %v5676_v30 = vpop.f32.mrf.mxu2  ;;  %v5689_v61 = vpop.f32.mrf.mxu3 }
0x1440 PF: > { %s10043_s20 = sld [smem:[#allocation22_spill]] }
0x1441   : > { %s10044_s27 = sld [smem:[#allocation19_spill]] }
0x1446   : > { %p8360_p9 = scmp.ge.s32.totalorder %s10043_s20, 2 }
0x1447   : > { %s5721_s22 = sand.u32 1, %s10044_s27  }
0x1448   : > { %p8345_p10 = pnand %p8360_p9, %p8946_p6  ;;  %s5722_s21 = scalar_lea.sflag [#allocation4], %s5721_s22 }
0x144a   : > { %p8346_p11 = pneg %p8345_p10 }
0x144c   : > { %8780 = dma.done.wait (%p8346_p11), %s5722_s21, 256  }
0x144d   : > { %8782 = vsyncadd (%p8346_p11), %s5722_s21, 4294967040  ;;  %s10046_s24 = sld [smem:[#allocation23_spill]] }
0x144e   : > { %s10047_s21 = sld [smem:[#allocation20_spill]] }
0x144f   : > { %s10048_s22 = sld [smem:[#allocation21_spill]] }
0x1450   : > { %s10049_s23 = sld [smem:[#allocation24_spill]] }
0x1453   : > { %p30_p5 = scmp.ge.s32.totalorder %s10046_s24, 4  }
0x1455   :  { %32 = sbr.rel (!%p30_p5) target bundleno = 13 (0xd), region = 150 }
0x145a   :  { %5728 = vsyncpa [#allocation3], 1 }
0x145b   :  { %5730 = vsyncpa [#allocation3 + $0x1], 1 }
0x145c   :  { %5731 = vsyncpa [#allocation6], 1 }
0x145d   :  { %5732 = vsyncpa [#allocation9], 1 }
0x145e   :  { %5733 = vsyncpa [#allocation12], 1 }
0x145f   :  { %5734 = vsyncpa [#allocation4], 1 }
0x1460   :  { %5736 = vsyncpa [#allocation4 + $0x1], 1 }

</bundles_post_ra>
